<compile_context>
chip_gen: v7x
topology: tpu7x:2x2x1
jax: 0.10.0
libtpu: 0.0.40
codegen_flags: <defaults>
</compile_context>

<pallas_src>
import functools

import jax
import jax.numpy as jnp
import numpy as np
from jax import lax
from jax.experimental import pallas as pl
from jax.experimental.pallas import tpu as pltpu


def _ipa_kernel(xs_ref, dwt_ref, dws_ref, w1_ref, w2_ref, wa1_ref, wa2_ref,
                o_ref, *, Bblk, H, W, C):
    # xs_ref : (Bblk, 3, H+2, W*C) pre-shifted dx planes, lane-dense (512)
    # dwt_ref: (9, H, W*C) pre-tiled + pre-broadcast depthwise taps, t-path
    # dws_ref: (9, H, W*C) pre-tiled + pre-broadcast depthwise taps, s-path
    # w1_ref : (W*C, Nh_pad)  block-diag 1x1-conv layer-1, zero-padded to 128
    # w2_ref : (Nh_pad, W*C)  block-diag 1x1-conv layer-2, zero-padded rows
    # wa1_ref: (W*C, hidden)  pooled-path layer-1 (tiled over W lane groups)
    # wa2_ref: (hidden, W*C)  pooled-path layer-2 (tiled over W lane groups)
    WC = W * C

    xs = xs_ref[...]                                  # (Bblk, 3, H+2, WC)

    # ---- two 3x3 depthwise convs as 9 row-window FMAs --------------------
    # dx lane shifts were pre-aligned in the wrapper; each dy row window is
    # staged once and reused for both td and sd; tap weights are already
    # (H, WC) so no per-tap broadcast_in_dim is emitted.
    td = jnp.zeros((Bblk, H, WC), jnp.float32)
    sd = jnp.zeros((Bblk, H, WC), jnp.float32)
    for dx in range(3):
        plane = xs[:, dx]                             # (Bblk, H+2, WC), aligned
        for dy in range(3):
            patch = plane[:, dy:dy + H, :]            # (Bblk, H, WC)
            k = dy * 3 + dx
            td = td + patch * dwt_ref[k]
            sd = sd + patch * dws_ref[k]

    x_in = xs[:, 1, 1:H + 1, :]                       # un-padded interior
    s = jnp.maximum(sd, 0.0)                          # s-path: dwconv -> ReLU

    # ---- t-path 1x1-conv MLP: two lane-aligned MXU matmuls ---------------
    td2 = td.reshape(Bblk * H, WC)
    h1 = jnp.maximum(
        jnp.dot(td2, w1_ref[...], preferred_element_type=jnp.float32), 0.0)
    z = jnp.dot(h1, w2_ref[...], preferred_element_type=jnp.float32)
    t = pl.reciprocal(1.0 + jnp.exp(-z), approx=True)        # sigmoid on EUP
    t = t.reshape(Bblk, H, WC)

    # ---- a-path: global average pool + tiny MLP --------------------------
    pooled = jnp.sum(x_in, axis=1) * (1.0 / (H * W))          # (Bblk, WC)
    ha = jnp.maximum(
        jnp.dot(pooled, wa1_ref[...], preferred_element_type=jnp.float32), 0.0)
    za = jnp.dot(ha, wa2_ref[...], preferred_element_type=jnp.float32)
    a = pl.reciprocal(1.0 + jnp.exp(-za), approx=True)        # (Bblk, WC)
    a = a[:, None, :]                                         # broadcast over H

    # ---- final combine: x*t - s + (1-t)*a, full-width lane-dense store ----
    o_ref[...] = x_in * t - s + (1.0 - t) * a


def ipa_pallas(x_nhwc, dw_t, dw_s, w_t1, w_t2, w_a1, w_a2, *, block_batch=None):
    B, H, W, C = x_nhwc.shape
    hidden = w_t1.shape[1]
    WC = W * C
    Nh = W * hidden
    Nh_pad = ((Nh + 127) // 128) * 128                # lane-aligned hidden width
    f32 = jnp.float32

    # Batch blocking: default keeps 2 parallel blocks (feeds both v7x TCs)
    # while folding ceil(B/2) images per block; pass block_batch=B to fold the
    # whole batch into one block on single-TC v5e/v6e.
    if block_batch is None:
        num_blocks = 2 if B >= 2 else 1
        block_batch = -(-B // num_blocks)
    Bblk = block_batch
    G = -(-B // Bblk)
    B_pad = G * Bblk

    # ---- wrapper-side layout plumbing (pure pad/reshape/tile, done once) ---
    xpad = jnp.pad(x_nhwc.astype(f32),
                   ((0, B_pad - B), (1, 1), (1, 1), (0, 0)))
    xpad = xpad.reshape(B_pad, H + 2, (W + 2) * C)
    # Pre-shifted dx lane windows: plane[dx] = padded[:, :, dx*C : dx*C+WC]
    xs = jnp.stack([xpad[:, :, dx * C: dx * C + WC] for dx in range(3)], axis=1)

    # Depthwise taps pre-tiled across W (lanes) and pre-broadcast across H
    # (sublanes): (9, H, W*C) with [k, h, w*C+c] = dw[k, c].
    dwt_k = jnp.tile(dw_t.astype(f32).reshape(9, 1, C), (1, H, W))
    dws_k = jnp.tile(dw_s.astype(f32).reshape(9, 1, C), (1, H, W))

    # Fused block-diagonal 1x1-conv weights for the per-pixel t-path, padded
    # to a lane-aligned hidden width (pad cols of w1 / pad rows of w2 are
    # exactly zero, so they contribute nothing through relu + matmul).
    eye_w = jnp.eye(W, dtype=f32)
    w1 = jnp.einsum("wv,cf->wcvf", eye_w, w_t1.astype(f32)).reshape(WC, Nh)
    w1 = jnp.pad(w1, ((0, 0), (0, Nh_pad - Nh)))
    w2 = jnp.einsum("wv,fc->wfvc", eye_w, w_t2.astype(f32)).reshape(Nh, WC)
    w2 = jnp.pad(w2, ((0, Nh_pad - Nh), (0, 0)))

    # Pooled a-path weights, tiled so the sum over W lane groups folds into
    # the dot (the 1/(H*W) scale is applied to the pooled row in-kernel).
    wa1 = jnp.tile(w_a1.astype(f32), (W, 1))          # (WC, hidden)
    wa2 = jnp.tile(w_a2.astype(f32), (1, W))          # (hidden, WC)

    kernel = functools.partial(_ipa_kernel, Bblk=Bblk, H=H, W=W, C=C)

    out_ld = pl.pallas_call(
        kernel,
        out_shape=jax.ShapeDtypeStruct((B_pad, H, WC), f32),
        grid_spec=pltpu.PrefetchScalarGridSpec(
            num_scalar_prefetch=0,
            grid=(G,),
            in_specs=[
                pl.BlockSpec((Bblk, 3, H + 2, WC), lambda g: (g, 0, 0, 0)),
                pl.BlockSpec((9, H, WC), lambda g: (0, 0, 0)),
                pl.BlockSpec((9, H, WC), lambda g: (0, 0, 0)),
                pl.BlockSpec((WC, Nh_pad), lambda g: (0, 0)),
                pl.BlockSpec((Nh_pad, WC), lambda g: (0, 0)),
                pl.BlockSpec((WC, hidden), lambda g: (0, 0)),
                pl.BlockSpec((hidden, WC), lambda g: (0, 0)),
            ],
            out_specs=pl.BlockSpec((Bblk, H, WC), lambda g: (g, 0, 0)),
        ),
        compiler_params=pltpu.CompilerParams(
            dimension_semantics=("parallel",)),
    )(xs, dwt_k, dws_k, w1, w2, wa1, wa2)

    return out_ld[:B].reshape(B, H, W, C)


def ipa_reference(x_nhwc, dw_t, dw_s, w_t1, w_t2, w_a1, w_a2):
    """Pure-JAX (XLA) reference for the same NHWC math."""
    C = x_nhwc.shape[-1]
    dn = ("NHWC", "HWIO", "NHWC")
    k_t = dw_t[:, :, None, :]   # (3,3,1,C)
    k_s = dw_s[:, :, None, :]
    td = lax.conv_general_dilated(x_nhwc, k_t, (1, 1), "SAME",
                                  dimension_numbers=dn, feature_group_count=C)
    sd = lax.conv_general_dilated(x_nhwc, k_s, (1, 1), "SAME",
                                  dimension_numbers=dn, feature_group_count=C)
    s = jnp.maximum(sd, 0.0)
    h_t = jnp.maximum(jnp.einsum("bhwc,cf->bhwf", td, w_t1), 0.0)
    t = jax.nn.sigmoid(jnp.einsum("bhwf,fc->bhwc", h_t, w_t2))
    pooled = jnp.mean(x_nhwc, axis=(1, 2), keepdims=True)
    h_a = jnp.maximum(jnp.einsum("bhwc,cf->bhwf", pooled, w_a1), 0.0)
    a = jax.nn.sigmoid(jnp.einsum("bhwf,fc->bhwc", h_a, w_a2))
    return x_nhwc * t - s + (1.0 - t) * a


if __name__ == "__main__":
    B, C, H, W = 2, 32, 16, 16
    reduction = 8
    hidden = C // reduction

    key = jax.random.PRNGKey(0)
    keys = jax.random.split(key, 8)

    # Deterministic synthetic parameters (PyTorch shapes noted in comments).
    x_nchw = jax.random.normal(keys[0], (B, C, H, W), jnp.float32)
    dw_t = 0.2 * jax.random.normal(keys[1], (3, 3, C), jnp.float32)   # torch (C,1,3,3)
    dw_s = 0.2 * jax.random.normal(keys[2], (3, 3, C), jnp.float32)   # torch (C,1,3,3)
    w_t1 = 0.2 * jax.random.normal(keys[3], (C, hidden), jnp.float32)  # torch (hid,C,1,1)
    w_t2 = 0.2 * jax.random.normal(keys[4], (hidden, C), jnp.float32)  # torch (C,hid,1,1)
    w_a1 = 0.2 * jax.random.normal(keys[5], (C, hidden), jnp.float32)  # torch (hid,C,1,1)
    w_a2 = 0.2 * jax.random.normal(keys[6], (hidden, C), jnp.float32)  # torch (C,hid,1,1)

    # NCHW -> NHWC for the kernel.
    x_nhwc = jnp.transpose(x_nchw, (0, 2, 3, 1))

    out = jax.block_until_ready(
        ipa_pallas(x_nhwc, dw_t, dw_s, w_t1, w_t2, w_a1, w_a2))
    ref = jax.block_until_ready(
        ipa_reference(x_nhwc, dw_t, dw_s, w_t1, w_t2, w_a1, w_a2))
    np.testing.assert_allclose(np.asarray(out), np.asarray(ref),
                               rtol=1e-2, atol=1e-2)

    # Output corresponding to the PyTorch module is NCHW:
    out_nchw = jnp.transpose(out, (0, 3, 1, 2))
    assert out_nchw.shape == (B, C, H, W)

    print("KERNEL_OK")
</pallas_src>

<mosaic_0001>
module attributes {stable_mosaic.version = 11 : i64} {
  func.func @_ipa_kernel(%arg0: i32, %arg1: memref<1x3x18x512xf32, #tpu.memory_space<vmem>>, %arg2: memref<9x16x512xf32, #tpu.memory_space<vmem>>, %arg3: memref<9x16x512xf32, #tpu.memory_space<vmem>>, %arg4: memref<512x128xf32, #tpu.memory_space<vmem>>, %arg5: memref<128x512xf32, #tpu.memory_space<vmem>>, %arg6: memref<512x4xf32, #tpu.memory_space<vmem>>, %arg7: memref<4x512xf32, #tpu.memory_space<vmem>>, %arg8: memref<1x16x512xf32, #tpu.memory_space<vmem>>) attributes {dimension_semantics = [#tpu.dimension_semantics<parallel>], iteration_bounds = array<i64: 2>, scalar_prefetch = 0 : i64, scratch_operands = 0 : i64, tpu.core_type = #tpu.core_type<tc>, window_params = [{transform_indices = @transform_0, window_bounds = array<i64: 1, 3, 18, 512>}, {pipeline_mode = #tpu.pipeline_mode<synchronous>, transform_indices = @transform_1, window_bounds = array<i64: 9, 16, 512>}, {pipeline_mode = #tpu.pipeline_mode<synchronous>, transform_indices = @transform_2, window_bounds = array<i64: 9, 16, 512>}, {pipeline_mode = #tpu.pipeline_mode<synchronous>, transform_indices = @transform_3, window_bounds = array<i64: 512, 128>}, {pipeline_mode = #tpu.pipeline_mode<synchronous>, transform_indices = @transform_4, window_bounds = array<i64: 128, 512>}, {pipeline_mode = #tpu.pipeline_mode<synchronous>, transform_indices = @transform_5, window_bounds = array<i64: 512, 4>}, {pipeline_mode = #tpu.pipeline_mode<synchronous>, transform_indices = @transform_6, window_bounds = array<i64: 4, 512>}, {transform_indices = @transform_7, window_bounds = array<i64: 1, 16, 512>}]} {
    %c0 = arith.constant 0 : index
    %c0_0 = arith.constant 0 : index
    %c0_1 = arith.constant 0 : index
    %c0_2 = arith.constant 0 : index
    %0 = vector.load %arg1[%c0, %c0_0, %c0_1, %c0_2] : memref<1x3x18x512xf32, #tpu.memory_space<vmem>>, vector<1x3x18x512xf32>
    %cst = arith.constant 0.000000e+00 : f32
    %1 = vector.broadcast %cst : f32 to vector<1x16x512xf32>
    %cst_3 = arith.constant 0.000000e+00 : f32
    %2 = vector.broadcast %cst_3 : f32 to vector<1x16x512xf32>
    %3 = vector.extract_strided_slice %0 {offsets = [0, 0, 0, 0], sizes = [1, 1, 18, 512], strides = [1, 1, 1, 1]} : vector<1x3x18x512xf32> to vector<1x1x18x512xf32>
    %4 = vector.shape_cast %3 : vector<1x1x18x512xf32> to vector<1x18x512xf32>
    %5 = vector.extract_strided_slice %4 {offsets = [0, 0, 0], sizes = [1, 16, 512], strides = [1, 1, 1]} : vector<1x18x512xf32> to vector<1x16x512xf32>
    %c0_4 = arith.constant 0 : index
    %c0_5 = arith.constant 0 : index
    %c0_6 = arith.constant 0 : index
    %6 = vector.load %arg2[%c0_4, %c0_5, %c0_6] : memref<9x16x512xf32, #tpu.memory_space<vmem>>, vector<1x16x512xf32>
    %7 = vector.shape_cast %6 : vector<1x16x512xf32> to vector<16x512xf32>
    %8 = vector.shape_cast %7 : vector<16x512xf32> to vector<1x16x512xf32>
    %9 = arith.mulf %5, %8 : vector<1x16x512xf32>
    %10 = arith.addf %1, %9 : vector<1x16x512xf32>
    %c0_7 = arith.constant 0 : index
    %c0_8 = arith.constant 0 : index
    %c0_9 = arith.constant 0 : index
    %11 = vector.load %arg3[%c0_7, %c0_8, %c0_9] : memref<9x16x512xf32, #tpu.memory_space<vmem>>, vector<1x16x512xf32>
    %12 = vector.shape_cast %11 : vector<1x16x512xf32> to vector<16x512xf32>
    %13 = vector.shape_cast %12 : vector<16x512xf32> to vector<1x16x512xf32>
    %14 = arith.mulf %5, %13 : vector<1x16x512xf32>
    %15 = arith.addf %2, %14 : vector<1x16x512xf32>
    %16 = vector.extract_strided_slice %4 {offsets = [0, 1, 0], sizes = [1, 16, 512], strides = [1, 1, 1]} : vector<1x18x512xf32> to vector<1x16x512xf32>
    %c3 = arith.constant 3 : index
    %c0_10 = arith.constant 0 : index
    %c0_11 = arith.constant 0 : index
    %17 = vector.load %arg2[%c3, %c0_10, %c0_11] : memref<9x16x512xf32, #tpu.memory_space<vmem>>, vector<1x16x512xf32>
    %18 = vector.shape_cast %17 : vector<1x16x512xf32> to vector<16x512xf32>
    %19 = vector.shape_cast %18 : vector<16x512xf32> to vector<1x16x512xf32>
    %20 = arith.mulf %16, %19 : vector<1x16x512xf32>
    %21 = arith.addf %10, %20 : vector<1x16x512xf32>
    %c3_12 = arith.constant 3 : index
    %c0_13 = arith.constant 0 : index
    %c0_14 = arith.constant 0 : index
    %22 = vector.load %arg3[%c3_12, %c0_13, %c0_14] : memref<9x16x512xf32, #tpu.memory_space<vmem>>, vector<1x16x512xf32>
    %23 = vector.shape_cast %22 : vector<1x16x512xf32> to vector<16x512xf32>
    %24 = vector.shape_cast %23 : vector<16x512xf32> to vector<1x16x512xf32>
    %25 = arith.mulf %16, %24 : vector<1x16x512xf32>
    %26 = arith.addf %15, %25 : vector<1x16x512xf32>
    %27 = vector.extract_strided_slice %4 {offsets = [0, 2, 0], sizes = [1, 16, 512], strides = [1, 1, 1]} : vector<1x18x512xf32> to vector<1x16x512xf32>
    %c6 = arith.constant 6 : index
    %c0_15 = arith.constant 0 : index
    %c0_16 = arith.constant 0 : index
    %28 = vector.load %arg2[%c6, %c0_15, %c0_16] : memref<9x16x512xf32, #tpu.memory_space<vmem>>, vector<1x16x512xf32>
    %29 = vector.shape_cast %28 : vector<1x16x512xf32> to vector<16x512xf32>
    %30 = vector.shape_cast %29 : vector<16x512xf32> to vector<1x16x512xf32>
    %31 = arith.mulf %27, %30 : vector<1x16x512xf32>
    %32 = arith.addf %21, %31 : vector<1x16x512xf32>
    %c6_17 = arith.constant 6 : index
    %c0_18 = arith.constant 0 : index
    %c0_19 = arith.constant 0 : index
    %33 = vector.load %arg3[%c6_17, %c0_18, %c0_19] : memref<9x16x512xf32, #tpu.memory_space<vmem>>, vector<1x16x512xf32>
    %34 = vector.shape_cast %33 : vector<1x16x512xf32> to vector<16x512xf32>
    %35 = vector.shape_cast %34 : vector<16x512xf32> to vector<1x16x512xf32>
    %36 = arith.mulf %27, %35 : vector<1x16x512xf32>
    %37 = arith.addf %26, %36 : vector<1x16x512xf32>
    %38 = vector.extract_strided_slice %0 {offsets = [0, 1, 0, 0], sizes = [1, 1, 18, 512], strides = [1, 1, 1, 1]} : vector<1x3x18x512xf32> to vector<1x1x18x512xf32>
    %39 = vector.shape_cast %38 : vector<1x1x18x512xf32> to vector<1x18x512xf32>
    %40 = vector.extract_strided_slice %39 {offsets = [0, 0, 0], sizes = [1, 16, 512], strides = [1, 1, 1]} : vector<1x18x512xf32> to vector<1x16x512xf32>
    %c1 = arith.constant 1 : index
    %c0_20 = arith.constant 0 : index
    %c0_21 = arith.constant 0 : index
    %41 = vector.load %arg2[%c1, %c0_20, %c0_21] : memref<9x16x512xf32, #tpu.memory_space<vmem>>, vector<1x16x512xf32>
    %42 = vector.shape_cast %41 : vector<1x16x512xf32> to vector<16x512xf32>
    %43 = vector.shape_cast %42 : vector<16x512xf32> to vector<1x16x512xf32>
    %44 = arith.mulf %40, %43 : vector<1x16x512xf32>
    %45 = arith.addf %32, %44 : vector<1x16x512xf32>
    %c1_22 = arith.constant 1 : index
    %c0_23 = arith.constant 0 : index
    %c0_24 = arith.constant 0 : index
    %46 = vector.load %arg3[%c1_22, %c0_23, %c0_24] : memref<9x16x512xf32, #tpu.memory_space<vmem>>, vector<1x16x512xf32>
    %47 = vector.shape_cast %46 : vector<1x16x512xf32> to vector<16x512xf32>
    %48 = vector.shape_cast %47 : vector<16x512xf32> to vector<1x16x512xf32>
    %49 = arith.mulf %40, %48 : vector<1x16x512xf32>
    %50 = arith.addf %37, %49 : vector<1x16x512xf32>
    %51 = vector.extract_strided_slice %39 {offsets = [0, 1, 0], sizes = [1, 16, 512], strides = [1, 1, 1]} : vector<1x18x512xf32> to vector<1x16x512xf32>
    %c4 = arith.constant 4 : index
    %c0_25 = arith.constant 0 : index
    %c0_26 = arith.constant 0 : index
    %52 = vector.load %arg2[%c4, %c0_25, %c0_26] : memref<9x16x512xf32, #tpu.memory_space<vmem>>, vector<1x16x512xf32>
    %53 = vector.shape_cast %52 : vector<1x16x512xf32> to vector<16x512xf32>
    %54 = vector.shape_cast %53 : vector<16x512xf32> to vector<1x16x512xf32>
    %55 = arith.mulf %51, %54 : vector<1x16x512xf32>
    %56 = arith.addf %45, %55 : vector<1x16x512xf32>
    %c4_27 = arith.constant 4 : index
    %c0_28 = arith.constant 0 : index
    %c0_29 = arith.constant 0 : index
    %57 = vector.load %arg3[%c4_27, %c0_28, %c0_29] : memref<9x16x512xf32, #tpu.memory_space<vmem>>, vector<1x16x512xf32>
    %58 = vector.shape_cast %57 : vector<1x16x512xf32> to vector<16x512xf32>
    %59 = vector.shape_cast %58 : vector<16x512xf32> to vector<1x16x512xf32>
    %60 = arith.mulf %51, %59 : vector<1x16x512xf32>
    %61 = arith.addf %50, %60 : vector<1x16x512xf32>
    %62 = vector.extract_strided_slice %39 {offsets = [0, 2, 0], sizes = [1, 16, 512], strides = [1, 1, 1]} : vector<1x18x512xf32> to vector<1x16x512xf32>
    %c7 = arith.constant 7 : index
    %c0_30 = arith.constant 0 : index
    %c0_31 = arith.constant 0 : index
    %63 = vector.load %arg2[%c7, %c0_30, %c0_31] : memref<9x16x512xf32, #tpu.memory_space<vmem>>, vector<1x16x512xf32>
    %64 = vector.shape_cast %63 : vector<1x16x512xf32> to vector<16x512xf32>
    %65 = vector.shape_cast %64 : vector<16x512xf32> to vector<1x16x512xf32>
    %66 = arith.mulf %62, %65 : vector<1x16x512xf32>
    %67 = arith.addf %56, %66 : vector<1x16x512xf32>
    %c7_32 = arith.constant 7 : index
    %c0_33 = arith.constant 0 : index
    %c0_34 = arith.constant 0 : index
    %68 = vector.load %arg3[%c7_32, %c0_33, %c0_34] : memref<9x16x512xf32, #tpu.memory_space<vmem>>, vector<1x16x512xf32>
    %69 = vector.shape_cast %68 : vector<1x16x512xf32> to vector<16x512xf32>
    %70 = vector.shape_cast %69 : vector<16x512xf32> to vector<1x16x512xf32>
    %71 = arith.mulf %62, %70 : vector<1x16x512xf32>
    %72 = arith.addf %61, %71 : vector<1x16x512xf32>
    %73 = vector.extract_strided_slice %0 {offsets = [0, 2, 0, 0], sizes = [1, 1, 18, 512], strides = [1, 1, 1, 1]} : vector<1x3x18x512xf32> to vector<1x1x18x512xf32>
    %74 = vector.shape_cast %73 : vector<1x1x18x512xf32> to vector<1x18x512xf32>
    %75 = vector.extract_strided_slice %74 {offsets = [0, 0, 0], sizes = [1, 16, 512], strides = [1, 1, 1]} : vector<1x18x512xf32> to vector<1x16x512xf32>
    %c2 = arith.constant 2 : index
    %c0_35 = arith.constant 0 : index
    %c0_36 = arith.constant 0 : index
    %76 = vector.load %arg2[%c2, %c0_35, %c0_36] : memref<9x16x512xf32, #tpu.memory_space<vmem>>, vector<1x16x512xf32>
    %77 = vector.shape_cast %76 : vector<1x16x512xf32> to vector<16x512xf32>
    %78 = vector.shape_cast %77 : vector<16x512xf32> to vector<1x16x512xf32>
    %79 = arith.mulf %75, %78 : vector<1x16x512xf32>
    %80 = arith.addf %67, %79 : vector<1x16x512xf32>
    %c2_37 = arith.constant 2 : index
    %c0_38 = arith.constant 0 : index
    %c0_39 = arith.constant 0 : index
    %81 = vector.load %arg3[%c2_37, %c0_38, %c0_39] : memref<9x16x512xf32, #tpu.memory_space<vmem>>, vector<1x16x512xf32>
    %82 = vector.shape_cast %81 : vector<1x16x512xf32> to vector<16x512xf32>
    %83 = vector.shape_cast %82 : vector<16x512xf32> to vector<1x16x512xf32>
    %84 = arith.mulf %75, %83 : vector<1x16x512xf32>
    %85 = arith.addf %72, %84 : vector<1x16x512xf32>
    %86 = vector.extract_strided_slice %74 {offsets = [0, 1, 0], sizes = [1, 16, 512], strides = [1, 1, 1]} : vector<1x18x512xf32> to vector<1x16x512xf32>
    %c5 = arith.constant 5 : index
    %c0_40 = arith.constant 0 : index
    %c0_41 = arith.constant 0 : index
    %87 = vector.load %arg2[%c5, %c0_40, %c0_41] : memref<9x16x512xf32, #tpu.memory_space<vmem>>, vector<1x16x512xf32>
    %88 = vector.shape_cast %87 : vector<1x16x512xf32> to vector<16x512xf32>
    %89 = vector.shape_cast %88 : vector<16x512xf32> to vector<1x16x512xf32>
    %90 = arith.mulf %86, %89 : vector<1x16x512xf32>
    %91 = arith.addf %80, %90 : vector<1x16x512xf32>
    %c5_42 = arith.constant 5 : index
    %c0_43 = arith.constant 0 : index
    %c0_44 = arith.constant 0 : index
    %92 = vector.load %arg3[%c5_42, %c0_43, %c0_44] : memref<9x16x512xf32, #tpu.memory_space<vmem>>, vector<1x16x512xf32>
    %93 = vector.shape_cast %92 : vector<1x16x512xf32> to vector<16x512xf32>
    %94 = vector.shape_cast %93 : vector<16x512xf32> to vector<1x16x512xf32>
    %95 = arith.mulf %86, %94 : vector<1x16x512xf32>
    %96 = arith.addf %85, %95 : vector<1x16x512xf32>
    %97 = vector.extract_strided_slice %74 {offsets = [0, 2, 0], sizes = [1, 16, 512], strides = [1, 1, 1]} : vector<1x18x512xf32> to vector<1x16x512xf32>
    %c8 = arith.constant 8 : index
    %c0_45 = arith.constant 0 : index
    %c0_46 = arith.constant 0 : index
    %98 = vector.load %arg2[%c8, %c0_45, %c0_46] : memref<9x16x512xf32, #tpu.memory_space<vmem>>, vector<1x16x512xf32>
    %99 = vector.shape_cast %98 : vector<1x16x512xf32> to vector<16x512xf32>
    %100 = vector.shape_cast %99 : vector<16x512xf32> to vector<1x16x512xf32>
    %101 = arith.mulf %97, %100 : vector<1x16x512xf32>
    %102 = arith.addf %91, %101 : vector<1x16x512xf32>
    %c8_47 = arith.constant 8 : index
    %c0_48 = arith.constant 0 : index
    %c0_49 = arith.constant 0 : index
    %103 = vector.load %arg3[%c8_47, %c0_48, %c0_49] : memref<9x16x512xf32, #tpu.memory_space<vmem>>, vector<1x16x512xf32>
    %104 = vector.shape_cast %103 : vector<1x16x512xf32> to vector<16x512xf32>
    %105 = vector.shape_cast %104 : vector<16x512xf32> to vector<1x16x512xf32>
    %106 = arith.mulf %97, %105 : vector<1x16x512xf32>
    %107 = arith.addf %96, %106 : vector<1x16x512xf32>
    %108 = vector.extract_strided_slice %0 {offsets = [0, 1, 1, 0], sizes = [1, 1, 16, 512], strides = [1, 1, 1, 1]} : vector<1x3x18x512xf32> to vector<1x1x16x512xf32>
    %109 = vector.shape_cast %108 : vector<1x1x16x512xf32> to vector<1x16x512xf32>
    %cst_50 = arith.constant 0.000000e+00 : f32
    %110 = vector.broadcast %cst_50 : f32 to vector<1x16x512xf32>
    %111 = arith.maximumf %107, %110 : vector<1x16x512xf32>
    %112 = vector.shape_cast %102 : vector<1x16x512xf32> to vector<16x512xf32>
    %c0_51 = arith.constant 0 : index
    %c0_52 = arith.constant 0 : index
    %113 = vector.load %arg4[%c0_51, %c0_52] : memref<512x128xf32, #tpu.memory_space<vmem>>, vector<512x128xf32>
    %cst_53 = arith.constant dense<0.000000e+00> : vector<16x128xf32>
    %114 = tpu.matmul %112, %113, %cst_53 {dimension_numbers = #tpu.dot_dimension_numbers<[1], [0], [0], [1], [0, 0, 1, 1], [], []>} : vector<16x512xf32>, vector<512x128xf32>, vector<16x128xf32> -> vector<16x128xf32>
    %cst_54 = arith.constant 0.000000e+00 : f32
    %115 = vector.broadcast %cst_54 : f32 to vector<16x128xf32>
    %116 = arith.maximumf %114, %115 : vector<16x128xf32>
    %c0_55 = arith.constant 0 : index
    %c0_56 = arith.constant 0 : index
    %117 = vector.load %arg5[%c0_55, %c0_56] : memref<128x512xf32, #tpu.memory_space<vmem>>, vector<128x512xf32>
    %cst_57 = arith.constant dense<0.000000e+00> : vector<16x512xf32>
    %118 = tpu.matmul %116, %117, %cst_57 {dimension_numbers = #tpu.dot_dimension_numbers<[1], [0], [0], [1], [0, 0, 1, 1], [], []>} : vector<16x128xf32>, vector<128x512xf32>, vector<16x512xf32> -> vector<16x512xf32>
    %cst_58 = arith.constant 0.000000e+00 : f32
    %119 = vector.broadcast %cst_58 : f32 to vector<16x512xf32>
    %120 = arith.subf %119, %118 : vector<16x512xf32>
    %121 = math.exp %120 : vector<16x512xf32>
    %cst_59 = arith.constant 1.000000e+00 : f32
    %122 = vector.broadcast %cst_59 : f32 to vector<16x512xf32>
    %123 = arith.addf %122, %121 : vector<16x512xf32>
    %124 = tpu.reciprocal %123 {approx = true} : vector<16x512xf32> -> vector<16x512xf32>
    %125 = vector.shape_cast %124 : vector<16x512xf32> to vector<1x16x512xf32>
    %cst_60 = arith.constant dense<0.000000e+00> : vector<1x512xf32>
    %126 = vector.multi_reduction <add>, %109, %cst_60 [1] : vector<1x16x512xf32> to vector<1x512xf32>
    %cst_61 = arith.constant 3.906250e-03 : f32
    %127 = vector.broadcast %cst_61 : f32 to vector<1x512xf32>
    %128 = arith.mulf %126, %127 : vector<1x512xf32>
    %c0_62 = arith.constant 0 : index
    %c0_63 = arith.constant 0 : index
    %129 = vector.load %arg6[%c0_62, %c0_63] : memref<512x4xf32, #tpu.memory_space<vmem>>, vector<512x4xf32>
    %cst_64 = arith.constant dense<0.000000e+00> : vector<1x4xf32>
    %130 = tpu.matmul %128, %129, %cst_64 {dimension_numbers = #tpu.dot_dimension_numbers<[1], [0], [0], [1], [0, 0, 1, 1], [], []>} : vector<1x512xf32>, vector<512x4xf32>, vector<1x4xf32> -> vector<1x4xf32>
    %cst_65 = arith.constant 0.000000e+00 : f32
    %131 = vector.broadcast %cst_65 : f32 to vector<1x4xf32>
    %132 = arith.maximumf %130, %131 : vector<1x4xf32>
    %c0_66 = arith.constant 0 : index
    %c0_67 = arith.constant 0 : index
    %133 = vector.load %arg7[%c0_66, %c0_67] : memref<4x512xf32, #tpu.memory_space<vmem>>, vector<4x512xf32>
    %cst_68 = arith.constant dense<0.000000e+00> : vector<1x512xf32>
    %134 = tpu.matmul %132, %133, %cst_68 {dimension_numbers = #tpu.dot_dimension_numbers<[1], [0], [0], [1], [0, 0, 1, 1], [], []>} : vector<1x4xf32>, vector<4x512xf32>, vector<1x512xf32> -> vector<1x512xf32>
    %cst_69 = arith.constant 0.000000e+00 : f32
    %135 = vector.broadcast %cst_69 : f32 to vector<1x512xf32>
    %136 = arith.subf %135, %134 : vector<1x512xf32>
    %137 = math.exp %136 : vector<1x512xf32>
    %cst_70 = arith.constant 1.000000e+00 : f32
    %138 = vector.broadcast %cst_70 : f32 to vector<1x512xf32>
    %139 = arith.addf %138, %137 : vector<1x512xf32>
    %140 = tpu.reciprocal %139 {approx = true} : vector<1x512xf32> -> vector<1x512xf32>
    %141 = vector.shape_cast %140 : vector<1x512xf32> to vector<1x1x512xf32>
    %142 = arith.mulf %109, %125 : vector<1x16x512xf32>
    %143 = arith.subf %142, %111 : vector<1x16x512xf32>
    %cst_71 = arith.constant 1.000000e+00 : f32
    %144 = vector.broadcast %cst_71 : f32 to vector<1x16x512xf32>
    %145 = arith.subf %144, %125 : vector<1x16x512xf32>
    %146 = vector.broadcast %141 : vector<1x1x512xf32> to vector<1x16x512xf32>
    %147 = arith.mulf %145, %146 : vector<1x16x512xf32>
    %148 = arith.addf %143, %147 : vector<1x16x512xf32>
    %c0_72 = arith.constant 0 : index
    %c0_73 = arith.constant 0 : index
    %c0_74 = arith.constant 0 : index
    %149 = vector.load %arg8[%c0_72, %c0_73, %c0_74] : memref<1x16x512xf32, #tpu.memory_space<vmem>>, vector<1x16x512xf32>
    tpu.vector_store %arg8[%c0_72, %c0_73, %c0_74], %148 {strides = array<i32>} : memref<1x16x512xf32, #tpu.memory_space<vmem>>, vector<1x16x512xf32>,
    return
  }
  func.func @transform_0(%arg0: i32) -> (i32, i32, i32, i32) {
    %c0_i32 = arith.constant 0 : i32
    %c0_i32_0 = arith.constant 0 : i32
    %c0_i32_1 = arith.constant 0 : i32
    %c0_i32_2 = arith.constant 0 : i32
    return %arg0, %c0_i32, %c0_i32_0, %c0_i32_1 : i32, i32, i32, i32
  }
  func.func @transform_1(%arg0: i32) -> (i32, i32, i32) {
    %c0_i32 = arith.constant 0 : i32
    %c0_i32_0 = arith.constant 0 : i32
    %c0_i32_1 = arith.constant 0 : i32
    %c0_i32_2 = arith.constant 0 : i32
    return %c0_i32, %c0_i32_0, %c0_i32_1 : i32, i32, i32
  }
  func.func @transform_2(%arg0: i32) -> (i32, i32, i32) {
    %c0_i32 = arith.constant 0 : i32
    %c0_i32_0 = arith.constant 0 : i32
    %c0_i32_1 = arith.constant 0 : i32
    %c0_i32_2 = arith.constant 0 : i32
    return %c0_i32, %c0_i32_0, %c0_i32_1 : i32, i32, i32
  }
  func.func @transform_3(%arg0: i32) -> (i32, i32) {
    %c0_i32 = arith.constant 0 : i32
    %c0_i32_0 = arith.constant 0 : i32
    %c0_i32_1 = arith.constant 0 : i32
    return %c0_i32, %c0_i32_0 : i32, i32
  }
  func.func @transform_4(%arg0: i32) -> (i32, i32) {
    %c0_i32 = arith.constant 0 : i32
    %c0_i32_0 = arith.constant 0 : i32
    %c0_i32_1 = arith.constant 0 : i32
    return %c0_i32, %c0_i32_0 : i32, i32
  }
  func.func @transform_5(%arg0: i32) -> (i32, i32) {
    %c0_i32 = arith.constant 0 : i32
    %c0_i32_0 = arith.constant 0 : i32
    %c0_i32_1 = arith.constant 0 : i32
    return %c0_i32, %c0_i32_0 : i32, i32
  }
  func.func @transform_6(%arg0: i32) -> (i32, i32) {
    %c0_i32 = arith.constant 0 : i32
    %c0_i32_0 = arith.constant 0 : i32
    %c0_i32_1 = arith.constant 0 : i32
    return %c0_i32, %c0_i32_0 : i32, i32
  }
  func.func @transform_7(%arg0: i32) -> (i32, i32, i32) {
    %c0_i32 = arith.constant 0 : i32
    %c0_i32_0 = arith.constant 0 : i32
    %c0_i32_1 = arith.constant 0 : i32
    return %arg0, %c0_i32, %c0_i32_0 : i32, i32, i32
  }
}

</mosaic_0001>

<bundles_post_ra>
// kernel: tpu_custom_call.1
= control target key start
LH: loop header
LB: loop body
LE: loop exit
PB: predicated region body
PF: predicated region fallthrough
CT: control target
= control target key end

     0   :  { %12 = vsyncpa [#allocation3], 0  ;;  %s5847_s0 = inlined_call_operand.vmem [shape: f32[2,3,18,512], index: 0, kind: input, shape index: {}]   ;;  %s5848_s1 = inlined_call_operand.vmem [shape: f32[9,16,512], index: 1, kind: input, shape index: {}]   ;;  %s5849_s2 = inlined_call_operand.vmem [shape: f32[9,16,512], index: 2, kind: input, shape index: {}]   ;;  %s5850_s3 = inlined_call_operand.hbm [shape: f32[512,128], index: 3, kind: input, shape index: {}]   ;;  %s5851_s4 = inlined_call_operand.hbm [shape: f32[128,512], index: 4, kind: input, shape index: {}]   ;;  %s5852_s5 = inlined_call_operand.vmem [shape: f32[512,4], index: 5, kind: input, shape index: {}]   ;;  %s5853_s6 = inlined_call_operand.vmem [shape: f32[4,512], index: 6, kind: input, shape index: {}]   ;;  %s5854_s7 = inlined_call_operand.hbm [shape: f32[2,16,512], index: 7, kind: output, shape index: {}]  }
   0x1   :  { %13 = vsyncpa [#allocation6], 0 }
   0x2   :  { %14 = vsyncpa [#allocation4], 0 }
   0x3   :  { %16 = vsyncpa [#allocation4 + $0x1], 0  ;;  %s3766_s24 = smov 0   ;;  %s3768_s25 = smov 0  }
   0x4   :  { %s3770_s26 = smov 0   ;;  %s3772_s27 = smov 0  }
   0x5 LB: > { %s3787_s28 = sadd.s32 4294967295, %s3714_s27   ;;  %s2957_s29 = sadd.s32 4294967294, %s3714_s27   ;;  %s3714_s27 = sphi %s3772_s27, %s6153_s27   ;;  %s3710_s26 = sphi %s3770_s26, %s6152_s26   ;;  %s3706_s25 = sphi %s3768_s25, %s6151_s25   ;;  %s3702_s24 = sphi %s3766_s24, %s6150_s24  }
   0x6   : > { %s3791_s30 = sadd.s32 1, %s3714_s27   ;;  %s181_s8 = sadd.s32 1, %s3710_s26 }
   0x7   : > { %s178_s9 = ssub.s32 %s3714_s27, %s3791_s30  ;;  %p191_p0 = scmp.ne.s32.totalorder %s3710_s26, %s3706_s25 }
   0x8   : > { %p179_p1 = scmp.eq.s32.totalorder %s178_s9, 0  ;;  %p192_p2 = scmp.eq.s32.totalorder %s3787_s28, 1 }
   0x9   : > { %p197_p3 = scmp.ne.s32.totalorder %s3706_s25, %s3702_s24  ;;  %p198_p4 = scmp.eq.s32.totalorder %s2957_s29, 1 }
   0xa   : > { %s3802_s10 = scalar_select %p179_p1, %s3710_s26, %s181_s8  }
   0xb   : > { %p3804_p5 = por %p192_p2, %p191_p0  ;;  %p3808_p6 = por %p198_p4, %p197_p3 }
   0xc   : > { %5979 = sst [smem:[#allocation11_spill]] %s3802_s10  ;;  %p2958_p7 = scmp.ge.s32.totalorder %s3714_s27, 1 }
   0xd   : > { %s5980_s11 = scalar_select %p3804_p5, 1, 0 }
   0xe   : > { %s5981_s12 = scalar_select %p3808_p6, 1, 0 }
   0xf   : > { %p205_p8 = scmp.lt.s32.totalorder %s3714_s27, 3  ;;  %p5855_p9 = scmp.eq.s32.totalorder %s3787_s28, 0 }
  0x10   : > { %s3716_s14 = smov [#allocation2]   ;;  %s3717_s17 = smov [#allocation5]  }
  0x11   : > { %p3815_p10 = pnand %p2958_p7, %p205_p8  ;;  %s223_s15 = sshll.u32 %s3716_s14, 4  ;;  %s224_s15 = int_to_ptr.vmem [resolvable:$true] %s223_s15 }
  0x12   : > { %s236_s18 = sshll.u32 %s3717_s17, 4  ;;  %s3588_s21 = scalar_lea.hbm %s5850_s3, 8192  ;;  %s3827_s18 = int_to_ptr.vmem [resolvable:$true] %s236_s18 }
  0x13   : > { %s5982_s13 = scalar_select %p3815_p10, 1, 0 }
  0x14   : > { %p3456_p11 = pneg %p3815_p10  ;;  %p3589_p13 = scmp.ne.s32.totalorder %s5850_s3, %s3588_s21 }
  0x15   : > { %p3595_p3 = scmp.lt.u32.totalorder %s3588_s21, %s5850_s3 }
  0x16   : > { %p3823_p12 = pnand %p5855_p9, %p3456_p11 }
  0x18   : > { %p3590_p0 = pneg %p3823_p12 }
  0x1a   : > { %p3591_p1 = pnand %p3590_p0, %p3589_p13 }
  0x1c   : > { %p3592_p2 = pneg %p3591_p1 }
  0x1e   : > { %p3597_p4 = pnand %p3595_p3, %p3592_p2 }
  0x20   : > { %3600 = shalt.err (!%p3597_p4)
}
  0x21   : > { %s3601_s9 = scalar_lea.vmem %s224_s15, 8192  ;;  %p3609_p9 = scmp.lt.s32.totalorder %s224_s15, %s224_s15 }
  0x22   : > { %p3602_p7 = scmp.ne.s32.totalorder %s224_s15, %s3601_s9  ;;  %p3610_p6 = scmp.lt.s32.totalorder %s3601_s9, %s3601_s9 }
  0x24   : > { %p3604_p8 = pnand %p3602_p7, %p3590_p0  ;;  %p3611_p5 = por %p3610_p6, %p3609_p9 }
  0x26   : > { %p3605_p11 = pneg %p3604_p8 }
  0x28   : > { %p3612_p10 = pnand %p3611_p5, %p3605_p11 }
  0x2a   : > { %3615 = shalt.err (!%p3612_p10)
}
  0x2b   : > { %s3718_s14 = smov 128   ;;  %s3719_s17 = smov 8  }
  0x2c   : > { %3459 = dma.hbm_to_vmem [thread:$0]  (!%p3823_p12), %s5850_s3, 8192, %s224_s15, [#allocation3], %s3718_s14, %s3718_s14, %s3719_s17  }
  0x2d   : > { %s3616_s23 = scalar_lea.hbm %s5851_s4, 8192 }
  0x2e   : > { %p3617_p13 = scmp.ne.s32.totalorder %s5851_s4, %s3616_s23  ;;  %p3623_p9 = scmp.lt.u32.totalorder %s3616_s23, %s5851_s4 }
  0x30   : > { %p3619_p5 = pnand %p3617_p13, %p3590_p0 }
  0x32   : > { %p3620_p6 = pneg %p3619_p5 }
  0x34   : > { %p3625_p10 = pnand %p3623_p9, %p3620_p6 }
  0x36   : > { %3628 = shalt.err (!%p3625_p10)
}
  0x37   : > { %s3629_s15 = scalar_lea.vmem %s3827_s18, 8192  ;;  %p3637_p4 = scmp.lt.s32.totalorder %s3827_s18, %s3827_s18 }
  0x38   : > { %p3630_p1 = scmp.ne.s32.totalorder %s3827_s18, %s3629_s15  ;;  %p3638_p7 = scmp.lt.s32.totalorder %s3629_s15, %s3629_s15 }
  0x3a   : > { %p3632_p2 = pnand %p3630_p1, %p3590_p0  ;;  %p3639_p8 = por %p3638_p7, %p3637_p4 }
  0x3c   : > { %p3633_p3 = pneg %p3632_p2 }
  0x3e   : > { %p3640_p11 = pnand %p3639_p8, %p3633_p3 }
  0x40   : > { %3643 = shalt.err (!%p3640_p11)
}
  0x41   : > { %s3720_s10 = smov 512   ;;  %s3721_s14 = smov 32  }
  0x42   : > { %3462 = dma.hbm_to_vmem [thread:$0]  (!%p3823_p12), %s5851_s4, 8192, %s3827_s18, [#allocation6], %s3720_s10, %s3720_s10, %s3721_s14  }
  0x43   : > { %p5984_p13 = scmp.ne.s32.totalorder %s5982_s13, 0 }
  0x45   : > { %266 = sbr.rel (%p5984_p13) target bundleno = 1008 (0x3f0), region = 48 }
  0x4c   : > { %p5985_p0 = scmp.eq.s32.totalorder %s3787_s28, 0 }
  0x4e   : > { %3689 = dma.done.wait (%p5985_p0), [#allocation3], 8192   ;;  %p5986_p5 = pmov %p5985_p0 }
  0x4f   : > { %p5987_p6 = pmov %p5985_p0 }
  0x50   : > { %3691 = vsyncadd (%p5986_p5), [#allocation3], 4294959104 }
  0x51   : > { %3693 = dma.done.wait (%p5987_p6), [#allocation6], 8192   ;;  %p5988_p9 = pmov %p5985_p0 }
  0x52   : > { %v1731_v0 = vld [vmem:[#allocation2 + $0x80] sm:$0xff]  ;;  %v1732_v1 = vld [vmem:[#allocation2 + $0x88] sm:$0xff]  ;;  %v1733_v11 = vld [vmem:[#allocation2 + $0x90] sm:$0xff]  ;;  %p302_p12 = scmp.lt.s32.totalorder %s3787_s28, 1  ;;  %vm408_vm0 = vcmask 1040384   ;;  %vm457_vm1 = vcmask 1046528  }
  0x53   : > { %3695 = vsyncadd (%p5988_p9), [#allocation6], 4294959104  ;;  %v1763_v2 = vld [vmem:[#allocation2 + $0x180] sm:$0xff]  ;;  %v3253_v3 = vpack.c.bf16 %v1732_v1, %v1731_v0  ;;  %v1764_v4 = vld [vmem:[#allocation2 + $0x188] sm:$0xff]  ;;  %vm612_vm2 = vcmask 1041408   ;;  %vm661_vm3 = vcmask 1045504  }
  0x54   : > { %v1715_v5 = vld [vmem:[#allocation2] sm:$0xff]  ;;  %v1716_v6 = vld [vmem:[#allocation2 + $0x8] sm:$0xff]  ;;  %v3285_v7 = vpack.c.bf16 %v1764_v4, %v1763_v2  ;;  %v1734_v13 = vld [vmem:[#allocation2 + $0x98] sm:$0xff]  ;;  %s3890_s13 = scalar_select %p302_p12, %s3787_s28, 1  ;;  %vm2476_vm4 = vcmask 1043456   ;;  %vm2472_vm5 = vcmask 31744  }
  0x55   : > { %v3255_v8 = vpack.c.bf16 %v1716_v6, %v1715_v5  ;;  %v1747_v9 = vld [vmem:[#allocation2 + $0x100] sm:$0xff]  ;;  %v1748_v10 = vld [vmem:[#allocation2 + $0x108] sm:$0xff]  ;;  %3254 = vmatprep.subr.bf16.mxu0 %v3253_v3  ;;  %v1765_v14 = vld [vmem:[#allocation2 + $0x190] sm:$0xff]  ;;  %v3257_v16 = vpack.c.bf16 %v1734_v13, %v1733_v11  ;;  %s3106_s29 = sshll.u32 %s3787_s28, 10  ;;  %p6147_p1 = scmp.ne.s32.totalorder %s5980_s11, 0 }
  0x56   : > { %v3287_v12 = vpack.c.bf16 %v1748_v10, %v1747_v9  ;;  %v1766_v15 = vld [vmem:[#allocation2 + $0x198] sm:$0xff]  ;;  %3286 = vmatprep.subr.bf16.mxu1 %v3285_v7  ;;  %v1717_v18 = vld [vmem:[#allocation2 + $0x10] sm:$0xff]  ;;  %v1735_v23 = vld [vmem:[#allocation2 + $0xa0] sm:$0xff]  ;;  %s3445_s16 = smul.u32 288, %s3890_s13  ;;  %s5798_s28 = scalar_lea.hbm %s5854_s7, %s3106_s29 }
  0x57   : > { %3256 = vmatpush3.bf16.msra.mxu0 %v3255_v8  ;;  %v3289_v17 = vpack.c.bf16 %v1766_v15, %v1765_v14  ;;  %v1718_v19 = vld [vmem:[#allocation2 + $0x18] sm:$0xff]  ;;  %v1749_v20 = vld [vmem:[#allocation2 + $0x110] sm:$0xff]  ;;  %v1736_v24 = vld [vmem:[#allocation2 + $0xa8] sm:$0xff]  ;;  %s3723_s17 = smov [#allocation7]  }
  0x58   : > { %3288 = vmatpush3.bf16.msra.mxu1 %v3287_v12  ;;  %v3259_v21 = vpack.c.bf16 %v1718_v19, %v1717_v18  ;;  %v1750_v22 = vld [vmem:[#allocation2 + $0x118] sm:$0xff]  ;;  %3258 = vmatprep.subr.bf16.mxu0 %v3257_v16  ;;  %v3261_v26 = vpack.c.bf16 %v1736_v24, %v1735_v23  ;;  %v1767_v27 = vld [vmem:[#allocation2 + $0x1a0] sm:$0xff]  ;;  %v1768_v28 = vld [vmem:[#allocation2 + $0x1a8] sm:$0xff]  ;;  %s3900_s21 = scalar_lea.vmem %s5847_s0, %s3445_s16  ;;  %s3648_s19 = sshll.u32 %s3723_s17, 4  ;;  %s3649_s19 = int_to_ptr.vmem [resolvable:$false] %s3648_s19 }
  0x59   : > { %3290 = vmatprep.subr.bf16.mxu1 %v3289_v17  ;;  %v3291_v25 = vpack.c.bf16 %v1750_v22, %v1749_v20  ;;  %v1719_v29 = vld [vmem:[#allocation2 + $0x20] sm:$0xff]  ;;  %v3293_v30 = vpack.c.bf16 %v1768_v28, %v1767_v27  ;;  %v1720_v31 = vld [vmem:[#allocation2 + $0x28] sm:$0xff]  ;;  %v1737_v35 = vld [vmem:[#allocation2 + $0xb0] sm:$0xff]  ;;  %s3650_s13 = scalar_lea.vmem %s3649_s19, 2048 }
  0x5a   : > { %v1751_v32 = vld [vmem:[#allocation2 + $0x120] sm:$0xff]  ;;  %v1752_v33 = vld [vmem:[#allocation2 + $0x128] sm:$0xff]  ;;  %v3263_v34 = vpack.c.bf16 %v1720_v31, %v1719_v29  ;;  %v1738_v36 = vld [vmem:[#allocation2 + $0xb8] sm:$0xff] }
  0x5b   : > { %3260 = vmatpush3.bf16.msra.mxu0 %v3259_v21  ;;  %v1769_v37 = vld [vmem:[#allocation2 + $0x1b0] sm:$0xff]  ;;  %v3295_v38 = vpack.c.bf16 %v1752_v33, %v1751_v32  ;;  %v3265_v39 = vpack.c.bf16 %v1738_v36, %v1737_v35  ;;  %v1770_v40 = vld [vmem:[#allocation2 + $0x1b8] sm:$0xff]  ;;  %v1739_v46 = vld [vmem:[#allocation2 + $0xc0] sm:$0xff] }
  0x5c   : > { %3292 = vmatpush3.bf16.msra.mxu1 %v3291_v25  ;;  %3262 = vmatprep.subr.bf16.mxu0 %v3261_v26  ;;  %v1721_v41 = vld [vmem:[#allocation2 + $0x30] sm:$0xff]  ;;  %v1722_v42 = vld [vmem:[#allocation2 + $0x38] sm:$0xff]  ;;  %v3297_v43 = vpack.c.bf16 %v1770_v40, %v1769_v37  ;;  %v1740_v47 = vld [vmem:[#allocation2 + $0xc8] sm:$0xff] }
  0x5d   : > { %3294 = vmatprep.subr.bf16.mxu1 %v3293_v30  ;;  %v1753_v44 = vld [vmem:[#allocation2 + $0x130] sm:$0xff]  ;;  %v1754_v45 = vld [vmem:[#allocation2 + $0x138] sm:$0xff]  ;;  %v1771_v48 = vld [vmem:[#allocation2 + $0x1c0] sm:$0xff]  ;;  %v3267_v50 = vpack.c.bf16 %v1722_v42, %v1721_v41  ;;  %v3269_v52 = vpack.c.bf16 %v1740_v47, %v1739_v46 }
  0x5e   : > { %v1772_v49 = vld [vmem:[#allocation2 + $0x1c8] sm:$0xff]  ;;  %v3299_v51 = vpack.c.bf16 %v1754_v45, %v1753_v44  ;;  %v1723_v53 = vld [vmem:[#allocation2 + $0x40] sm:$0xff]  ;;  %v1741_v58 = vld [vmem:[#allocation2 + $0xd0] sm:$0xff] }
  0x5f   : > { %3264 = vmatpush3.bf16.msra.mxu0 %v3263_v34  ;;  %v1724_v54 = vld [vmem:[#allocation2 + $0x48] sm:$0xff]  ;;  %v1755_v55 = vld [vmem:[#allocation2 + $0x140] sm:$0xff]  ;;  %v3301_v56 = vpack.c.bf16 %v1772_v49, %v1771_v48  ;;  %v1742_v59 = vld [vmem:[#allocation2 + $0xd8] sm:$0xff] }
  0x60   : > { %3296 = vmatpush3.bf16.msra.mxu1 %v3295_v38  ;;  %3266 = vmatprep.subr.bf16.mxu0 %v3265_v39  ;;  %v1756_v57 = vld [vmem:[#allocation2 + $0x148] sm:$0xff]  ;;  %v1773_v60 = vld [vmem:[#allocation2 + $0x1d0] sm:$0xff]  ;;  %v1774_v61 = vld [vmem:[#allocation2 + $0x1d8] sm:$0xff]  ;;  %v3271_v62 = vpack.c.bf16 %v1724_v54, %v1723_v53  ;;  %v3273_v3 = vpack.c.bf16 %v1742_v59, %v1741_v58 }
  0x61   : > { %3298 = vmatprep.subr.bf16.mxu1 %v3297_v43  ;;  %v1725_v63 = vld [vmem:[#allocation2 + $0x50] sm:$0xff]  ;;  %v1726_v0 = vld [vmem:[#allocation2 + $0x58] sm:$0xff]  ;;  %v3303_v2 = vpack.c.bf16 %v1756_v57, %v1755_v55  ;;  %v1743_v5 = vld [vmem:[#allocation2 + $0xe0] sm:$0xff]  ;;  %v3305_v7 = vpack.c.bf16 %v1774_v61, %v1773_v60 }
  0x62   : > { %v1757_v1 = vld [vmem:[#allocation2 + $0x150] sm:$0xff]  ;;  %v1758_v4 = vld [vmem:[#allocation2 + $0x158] sm:$0xff]  ;;  %v1744_v6 = vld [vmem:[#allocation2 + $0xe8] sm:$0xff]  ;;  %v3275_v14 = vpack.c.bf16 %v1726_v0, %v1725_v63 }
  0x63   : > { %3268 = vmatpush3.bf16.msra.mxu0 %v3267_v50  ;;  %v1775_v8 = vld [vmem:[#allocation2 + $0x1e0] sm:$0xff]  ;;  %v1776_v9 = vld [vmem:[#allocation2 + $0x1e8] sm:$0xff]  ;;  %v1745_v15 = vld [vmem:[#allocation2 + $0xf0] sm:$0xff]  ;;  %v3307_v18 = vpack.c.bf16 %v1758_v4, %v1757_v1  ;;  %v3277_v19 = vpack.c.bf16 %v1744_v6, %v1743_v5 }
  0x64   : > { %3300 = vmatpush3.bf16.msra.mxu1 %v3299_v51  ;;  %3270 = vmatprep.subr.bf16.mxu0 %v3269_v52  ;;  %v1727_v10 = vld [vmem:[#allocation2 + $0x60] sm:$0xff]  ;;  %v1728_v11 = vld [vmem:[#allocation2 + $0x68] sm:$0xff]  ;;  %v1746_v16 = vld [vmem:[#allocation2 + $0xf8] sm:$0xff]  ;;  %v3309_v23 = vpack.c.bf16 %v1776_v9, %v1775_v8 }
  0x65   : > { %3302 = vmatprep.subr.bf16.mxu1 %v3301_v56  ;;  %v3893_v12 = vld [vmem:[#allocation2 + $0x160] sm:$0xff]  ;;  %v1760_v13 = vld [vmem:[#allocation2 + $0x168] sm:$0xff]  ;;  %v3895_v17 = vld [vmem:[#allocation2 + $0x1f0] sm:$0xff]  ;;  %v3279_v26 = vpack.c.bf16 %v1728_v11, %v1727_v10  ;;  %v3281_v31 = vpack.c.bf16 %v1746_v16, %v1745_v15 }
  0x66   : > { %v1778_v20 = vld [vmem:[#allocation2 + $0x1f8] sm:$0xff]  ;;  %v3902_v21 = vld [vmem:[#allocation2 + $0x70] sm:$0xff]  ;;  %v308_v27 = vld [vmem:[%s3900_s21 + $0x8] sm:$0xff]  ;;  %v3311_v30 = vpack.c.bf16 %v1760_v13, %v3893_v12 }
  0x67   : > { %3272 = vmatpush3.bf16.msra.mxu0 %v3271_v62  ;;  %v3904_v22 = vld [vmem:[#allocation2 + $0x78] sm:$0xff]  ;;  %v3906_v24 = vld [vmem:[#allocation2 + $0x170] sm:$0xff]  ;;  %v344_v28 = vld [vmem:[%s5848_s1 + $0x8] sm:$0xff]  ;;  %v3313_v32 = vpack.c.bf16 %v1778_v20, %v3895_v17 }
  0x68   : > { %3304 = vmatpush3.bf16.msra.mxu1 %v3303_v2  ;;  %3274 = vmatprep.subr.bf16.mxu0 %v3273_v3  ;;  %v3908_v25 = vld [vmem:[#allocation2 + $0x178] sm:$0xff]  ;;  %v368_v29 = vld [vmem:[%s5849_s2 + $0x8] sm:$0xff]  ;;  %v3283_v33 = vpack.c.bf16 %v3904_v22, %v3902_v21  ;;  %v352_v38 = vmul.f32 %v344_v28, %v308_v27 }
  0x69   : > { %3306 = vmatprep.subr.bf16.mxu1 %v3305_v7  ;;  %v3922_v34 = vld [vmem:[%s3900_s21 + $0x28] sm:$0xff]  ;;  %v3315_v37 = vpack.c.bf16 %v3908_v25, %v3906_v24  ;;  %v376_v44 = vmul.f32 %v368_v29, %v308_v27 }
  0x6a   : > { %v2968_v35 = vld [vmem:[%s5848_s1 + $0xc8] sm:$0xff] }
  0x6b   : > { %3276 = vmatpush3.bf16.msra.mxu0 %v3275_v14  ;;  %v3930_v36 = vld [vmem:[%s5848_s1 + $0xe8] sm:$0xff]  ;;  %v410_v39 = vrot.slane %v2968_v35, 7 }
  0x6c   : > { %3308 = vmatpush3.bf16.msra.mxu1 %v3307_v18  ;;  %3278 = vmatprep.subr.bf16.mxu0 %v3277_v19  ;;  %v5891_v40 = vrot.slane %v3930_v36, 7  ;;  %v2976_v41 = vld [vmem:[%s5849_s2 + $0xc8] sm:$0xff] }
  0x6d   : > { %v3941_v42 = vld [vmem:[%s5849_s2 + $0xe8] sm:$0xff]  ;;  %3310 = vmatprep.subr.bf16.mxu1 %v3309_v23  ;;  %v512_v45 = vrot.slane %v2976_v41, 7  ;;  %v434_v52 = vmul.f32 %v410_v39, %v308_v27 }
  0x6e   : > { %v2984_v43 = vld [vmem:[%s5848_s1 + $0x188] sm:$0xff]  ;;  %v5890_v46 = vrot.slane %v3941_v42, 7  ;;  %v416_v51 = vsel %vm408_vm0, %v410_v39, %v5891_v40 }
  0x6f   : > { %v3950_v47 = vld [vmem:[%s5848_s1 + $0x1a8] sm:$0xff]  ;;  %v614_v48 = vrot.slane %v2984_v43, 6  ;;  %3280 = vmatpush3.bf16.msra.mxu0 %v3279_v26  ;;  %v3968_v56 = vmul.f32 %v416_v51, %v3922_v34  ;;  %v536_v58 = vmul.f32 %v512_v45, %v308_v27  ;;  %v461_v61 = vrot.slane %v434_v52, 1 }
  0x70   : > { %v2992_v49 = vld [vmem:[%s5849_s2 + $0x188] sm:$0xff]  ;;  %v5887_v53 = vrot.slane %v3950_v47, 6  ;;  %v518_v57 = vsel %vm408_vm0, %v512_v45, %v5890_v46  ;;  %3312 = vmatpush3.bf16.msra.mxu1 %v3311_v30  ;;  %3282 = vmatprep.subr.bf16.mxu0 %v3281_v31 }
  0x71   : > { %v3958_v50 = vld [vmem:[%s5849_s2 + $0x1a8] sm:$0xff]  ;;  %v716_v54 = vrot.slane %v2992_v49, 6  ;;  %v638_v59 = vmul.f32 %v614_v48, %v308_v27  ;;  %v3977_v62 = vmul.f32 %v518_v57, %v3922_v34  ;;  %3314 = vmatprep.subr.bf16.mxu1 %v3313_v32  ;;  %v5881_v2 = vrot.slane %v3968_v56, 1 }
  0x72   : > { %v3965_v55 = vld [vmem:[%s3900_s21 + $0x68] sm:$0xff]  ;;  %v620_v63 = vsel %vm612_vm2, %v614_v48, %v5887_v53  ;;  %v5882_v0 = vrot.slane %v3958_v50, 6  ;;  %v562_v3 = vrot.slane %v536_v58, 1 }
  0x73   : > { %v3000_v60 = vld [vmem:[%s5848_s1 + $0x48] sm:$0xff]  ;;  %v3988_v4 = vmul.f32 %v620_v63, %v3922_v34  ;;  %v665_v5 = vrot.slane %v638_v59, 2  ;;  %v5877_v7 = vrot.slane %v3977_v62, 1  ;;  %v740_v9 = vmul.f32 %v716_v54, %v308_v27  ;;  %3284 = vmatpush3.bf16.msra.mxu0 %v3283_v33 }
  0x74   : > { %v3008_v1 = vld [vmem:[%s5849_s2 + $0x48] sm:$0xff]  ;;  %v722_v8 = vsel %vm612_vm2, %v716_v54, %v5882_v0  ;;  %v809_v10 = vmul.f32 %v3000_v60, %v3965_v55  ;;  %v463_v12 = vsel %vm457_vm1, %v461_v61, %v5881_v2  ;;  %3316 = vmatpush3.bf16.msra.mxu1 %v3315_v37 }
  0x75   : > { %v3016_v6 = vld [vmem:[%s5848_s1 + $0x108] sm:$0xff]  ;;  %v5875_v13 = vrot.slane %v3988_v4, 2  ;;  %v4008_v14 = vmul.f32 %v722_v8, %v3922_v34  ;;  %v834_v15 = vmul.f32 %v3008_v1, %v3965_v55  ;;  %v487_v18 = vadd.f32 %v463_v12, %v352_v38 }
  0x76   : > { %v4001_v11 = vld [vmem:[%s5848_s1 + $0x128] sm:$0xff]  ;;  %v564_v19 = vsel %vm457_vm1, %v562_v3, %v5877_v7  ;;  %v766_v20 = vrot.slane %v740_v9, 2  ;;  %v867_v21 = vrot.slane %v3016_v6, 7 }
  0x77   : > { %v3024_v16 = vld [vmem:[%s5849_s2 + $0x108] sm:$0xff]  ;;  %v588_v25 = vadd.f32 %v564_v19, %v376_v44  ;;  %v667_v26 = vsel %vm661_vm3, %v665_v5, %v5875_v13  ;;  %v5872_v27 = vrot.slane %v4008_v14, 2  ;;  %v5878_v28 = vrot.slane %v4001_v11, 7 }
  0x78   : > { %v4017_v17 = vld [vmem:[%s5849_s2 + $0x128] sm:$0xff]  ;;  %v691_v29 = vadd.f32 %v667_v26, %v487_v18  ;;  %v891_v30 = vmul.f32 %v867_v21, %v3965_v55  ;;  %v968_v31 = vrot.slane %v3024_v16, 7 }
  0x79   : > { %v3032_v22 = vld [vmem:[%s5848_s1 + $0x1c8] sm:$0xff]  ;;  %v5876_v32 = vrot.slane %v4017_v17, 7  ;;  %v768_v33 = vsel %vm661_vm3, %v766_v20, %v5872_v27  ;;  %v873_v35 = vsel %vm408_vm0, %v867_v21, %v5878_v28 }
  0x7a   : > { %v4028_v23 = vld [vmem:[%s5848_s1 + $0x1e8] sm:$0xff]  ;;  %v1069_v37 = vrot.slane %v3032_v22, 6  ;;  %v792_v39 = vadd.f32 %v768_v33, %v588_v25  ;;  %v817_v41 = vadd.f32 %v809_v10, %v691_v29  ;;  %v917_v44 = vrot.slane %v891_v30, 1 }
  0x7b   : > { %v4031_v24 = vld [vmem:[%s3900_s21 + $0x88] sm:$0xff]  ;;  %v5869_v38 = vrot.slane %v4028_v23, 6  ;;  %v974_v49 = vsel %vm408_vm0, %v968_v31, %v5876_v32  ;;  %v992_v51 = vmul.f32 %v968_v31, %v3965_v55 }
  0x7c   : > { %v4048_v43 = vmul.f32 %v873_v35, %v4031_v24  ;;  %v3040_v45 = vld [vmem:[%s5849_s2 + $0x1c8] sm:$0xff]  ;;  %v1093_v54 = vmul.f32 %v1069_v37, %v3965_v55  ;;  %v842_v57 = vadd.f32 %v834_v15, %v792_v39  ;;  %v4068_v59 = vmul.f32 %v974_v49, %v4031_v24 }
  0x7d   : > { %v4056_v48 = vld [vmem:[%s5849_s2 + $0x1e8] sm:$0xff]  ;;  %v1075_v52 = vsel %vm612_vm2, %v1069_v37, %v5869_v38  ;;  %v1018_v61 = vrot.slane %v992_v51, 1  ;;  %v1170_v1 = vrot.slane %v3040_v45, 6 }
  0x7e   : > { %v5867_v58 = vrot.slane %v4048_v43, 1  ;;  %v4071_v60 = vmul.f32 %v1075_v52, %v4031_v24  ;;  %v1119_v63 = vrot.slane %v1093_v54, 2  ;;  %v5868_v3 = vrot.slane %v4056_v48, 6  ;;  %v332_v5 = vld [vmem:[%s3900_s21 + $0xc8] sm:$0xff] }
  0x7f   : > { %v5865_v8 = vrot.slane %v4068_v59, 1  ;;  %v3048_v10 = vld [vmem:[%s5848_s1 + $0x88] sm:$0xff]  ;;  %v1194_v18 = vmul.f32 %v1170_v1, %v3965_v55 }
  0x80   : > { %v919_v6 = vsel %vm457_vm1, %v917_v44, %v5867_v58  ;;  %v5859_v9 = vrot.slane %v4071_v60, 2  ;;  %v3064_v12 = vld [vmem:[%s5848_s1 + $0x148] sm:$0xff]  ;;  %v1176_v16 = vsel %vm612_vm2, %v1170_v1, %v5868_v3  ;;  %v1263_v31 = vmul.f32 %v3048_v10, %v332_v5  ;;  %v346_v10 = vld [vmem:[%s5848_s1 + $0x18] sm:$0xff] }
  0x81   : > { %v943_v15 = vadd.f32 %v919_v6, %v817_v41  ;;  %v4093_v19 = vld [vmem:[%s5848_s1 + $0x168] sm:$0xff]  ;;  %v1020_v21 = vsel %vm457_vm1, %v1018_v61, %v5865_v8  ;;  %v4105_v25 = vmul.f32 %v1176_v16, %v4031_v24  ;;  %v1220_v30 = vrot.slane %v1194_v18, 2 }
  0x82   : > { %v3080_v20 = vld [vmem:[%s5848_s1 + $0x208] sm:$0xff]  ;;  %v1121_v22 = vsel %vm661_vm3, %v1119_v63, %v5859_v9  ;;  %v1044_v29 = vadd.f32 %v1020_v21, %v842_v57  ;;  %v1321_v33 = vrot.slane %v3064_v12, 7  ;;  %v5866_v41 = vrot.slane %v4093_v19, 7  ;;  %v370_v12 = vld [vmem:[%s5849_s2 + $0x18] sm:$0xff] }
  0x83   : > { %v3056_v55 = vld [vmem:[%s5849_s2 + $0x88] sm:$0xff]  ;;  %v1145_v37 = vadd.f32 %v1121_v22, %v943_v15  ;;  %v5858_v39 = vrot.slane %v4105_v25, 2  ;;  %v1523_v44 = vrot.slane %v3080_v20, 6  ;;  %v4148_v20 = vld [vmem:[%s5848_s1 + $0xf8] sm:$0xff] }
  0x84   : > { %v4113_v26 = vld [vmem:[%s5848_s1 + $0x228] sm:$0xff]  ;;  %v1288_v45 = vmul.f32 %v3056_v55, %v332_v5  ;;  %v1345_v49 = vmul.f32 %v1321_v33, %v332_v5  ;;  %v1327_v54 = vsel %vm408_vm0, %v1321_v33, %v5866_v41  ;;  %v2978_v21 = vld [vmem:[%s5849_s2 + $0xd8] sm:$0xff] }
  0x85   : > { %v4116_v35 = vld [vmem:[%s3900_s21 + $0xe8] sm:$0xff]  ;;  %v5862_v51 = vrot.slane %v4113_v26, 6  ;;  %v1222_v52 = vsel %vm661_vm3, %v1220_v30, %v5858_v39  ;;  %v1547_v57 = vmul.f32 %v1523_v44, %v332_v5  ;;  %v2970_v5 = vld [vmem:[%s5848_s1 + $0xd8] sm:$0xff]  ;;  %v1271_v15 = vadd.f32 %v1263_v31, %v1145_v37 }
  0x86   : > { %v1246_v61 = vadd.f32 %v1222_v52, %v1044_v29  ;;  %v4128_v63 = vmul.f32 %v1327_v54, %v4116_v35  ;;  %v1371_v1 = vrot.slane %v1345_v49, 1  ;;  %v4156_v22 = vld [vmem:[%s5849_s2 + $0xf8] sm:$0xff]  ;;  %v412_v49 = vrot.slane %v2970_v5, 7 }
  0x87   : > { %v1529_v6 = vsel %vm612_vm2, %v1523_v44, %v5862_v51  ;;  %v1573_v18 = vrot.slane %v1547_v57, 2  ;;  %v310_v30 = vld [vmem:[%s3900_s21 + $0x18] sm:$0xff]  ;;  %v5864_v57 = vrot.slane %v4148_v20, 7 }
  0x88   : > { %v4143_v16 = vmul.f32 %v1529_v6, %v4116_v35  ;;  %v4158_v55 = vadd.f32 %v1288_v45, %v1246_v61  ;;  %v5860_v29 = vrot.slane %v4128_v63, 1  ;;  %v2986_v31 = vld [vmem:[%s5848_s1 + $0x198] sm:$0xff]  ;;  %v354_v37 = vmul.f32 %v346_v10, %v310_v30 }
  0x89   : > { %v378_v44 = vmul.f32 %v370_v12, %v310_v30  ;;  %v4169_v52 = vld [vmem:[%s5848_s1 + $0x1b8] sm:$0xff]  ;;  %v514_v61 = vrot.slane %v2978_v21, 7  ;;  %v5863_v6 = vrot.slane %v4156_v22, 7  ;;  %v436_v5 = vmul.f32 %v412_v49, %v310_v30 }
  0x8a   : > { %5989 = vst [vmem:[#allocation12_spill] sm:$0xff] %v4158_v55  ;;  %v5861_v33 = vrot.slane %v4143_v16, 2  ;;  %v1373_v45 = vsel %vm457_vm1, %v1371_v1, %v5860_v29  ;;  %v4175_v54 = vld [vmem:[%s3900_s21 + $0x38] sm:$0xff]  ;;  %v616_v39 = vrot.slane %v2986_v31, 6  ;;  %v420_v1 = vsel %vm408_vm0, %v412_v49, %v5864_v57 }
  0x8b   : > { %v1397_v10 = vadd.f32 %v1373_v45, %v1271_v15  ;;  %v2994_v9 = vld [vmem:[%s5849_s2 + $0x198] sm:$0xff]  ;;  %v522_v21 = vsel %vm408_vm0, %v514_v61, %v5863_v6  ;;  %v538_v29 = vmul.f32 %v514_v61, %v310_v30  ;;  %v5870_v15 = vrot.slane %v4169_v52, 6 }
  0x8c   : > { %v1575_v12 = vsel %vm661_vm3, %v1573_v18, %v5861_v33  ;;  %v4195_v18 = vld [vmem:[%s5849_s2 + $0x1b8] sm:$0xff]  ;;  %v4201_v33 = vmul.f32 %v420_v1, %v4175_v54  ;;  %v467_v51 = vrot.slane %v436_v5, 1  ;;  %v4204_v49 = vmul.f32 %v522_v21, %v4175_v54 }
  0x8d   : > { %v1599_v31 = vadd.f32 %v1575_v12, %v1397_v10  ;;  %v4198_v45 = vld [vmem:[%s3900_s21 + $0x78] sm:$0xff]  ;;  %v568_v57 = vrot.slane %v538_v29, 1  ;;  %v624_v10 = vsel %vm612_vm2, %v616_v39, %v5870_v15  ;;  %v640_v12 = vmul.f32 %v616_v39, %v310_v30 }
  0x8e   : > { %v3002_v61 = vld [vmem:[%s5848_s1 + $0x58] sm:$0xff]  ;;  %v718_v1 = vrot.slane %v2994_v9, 6  ;;  %v5871_v5 = vrot.slane %v4201_v33, 1  ;;  %v5873_v21 = vrot.slane %v4204_v49, 1  ;;  %v4218_v8 = vmul.f32 %v624_v10, %v4175_v54 }
  0x8f   : > { %v3010_v6 = vld [vmem:[%s5849_s2 + $0x58] sm:$0xff]  ;;  %1843 = vmatprep.mubr.f32.mxu0 %v1599_v31  ;;  %v5874_v41 = vrot.slane %v4195_v18, 6  ;;  %v671_v58 = vrot.slane %v640_v12, 2  ;;  %v811_v29 = vmul.f32 %v3002_v61, %v4198_v45 }
  0x90   : > { %v742_v3 = vmul.f32 %v718_v1, %v310_v30  ;;  %v836_v38 = vmul.f32 %v3010_v6, %v4198_v45  ;;  %v3018_v9 = vld [vmem:[%s5848_s1 + $0x118] sm:$0xff]  ;;  %v469_v30 = vsel %vm457_vm1, %v467_v51, %v5871_v5  ;;  %v570_v6 = vsel %vm457_vm1, %v568_v57, %v5873_v21 }
  0x91   : > { %v4229_v39 = vld [vmem:[%s5848_s1 + $0x138] sm:$0xff]  ;;  %v5879_v61 = vrot.slane %v4218_v8, 2  ;;  %v726_v10 = vsel %vm612_vm2, %v718_v1, %v5874_v41  ;;  %v489_v51 = vadd.f32 %v469_v30, %v354_v37  ;;  %v590_v5 = vadd.f32 %v570_v6, %v378_v44 }
  0x92   : > { %v3026_v31 = vld [vmem:[%s5849_s2 + $0x118] sm:$0xff]  ;;  %v4253_v27 = vmul.f32 %v726_v10, %v4175_v54  ;;  %v772_v57 = vrot.slane %v742_v3, 2  ;;  %v869_v13 = vrot.slane %v3018_v9, 7  ;;  %v5880_v32 = vrot.slane %v4229_v39, 7 }
  0x93   : > { %v4247_v12 = vld [vmem:[%s5849_s2 + $0x138] sm:$0xff]  ;;  %v673_v41 = vsel %vm661_vm3, %v671_v58, %v5879_v61  ;;  %v970_v37 = vrot.slane %v3026_v31, 7 }
  0x94   : > { %v3034_v15 = vld [vmem:[%s5848_s1 + $0x1d8] sm:$0xff]  ;;  %v693_v44 = vadd.f32 %v673_v41, %v489_v51  ;;  %v5883_v30 = vrot.slane %v4253_v27, 2  ;;  %v5884_v3 = vrot.slane %v4247_v12, 7  ;;  %v877_v10 = vsel %vm408_vm0, %v869_v13, %v5880_v32 }
  0x95   : > { %v4258_v21 = vld [vmem:[%s5848_s1 + $0x1f8] sm:$0xff]  ;;  %v1071_v6 = vrot.slane %v3034_v15, 6  ;;  %v893_v7 = vmul.f32 %v869_v13, %v4198_v45  ;;  %v994_v28 = vmul.f32 %v970_v37, %v4198_v45 }
  0x96   : > { %v4261_v1 = vld [vmem:[%s3900_s21 + $0x98] sm:$0xff]  ;;  %v5885_v58 = vrot.slane %v4258_v21, 6  ;;  %v774_v9 = vsel %vm661_vm3, %v772_v57, %v5883_v30  ;;  %v819_v15 = vadd.f32 %v811_v29, %v693_v44  ;;  %v978_v13 = vsel %vm408_vm0, %v970_v37, %v5884_v3 }
  0x97   : > { %v3042_v41 = vld [vmem:[%s5849_s2 + $0x1d8] sm:$0xff]  ;;  %v4282_v31 = vmul.f32 %v877_v10, %v4261_v1  ;;  %v794_v61 = vadd.f32 %v774_v9, %v590_v5  ;;  %v923_v32 = vrot.slane %v893_v7, 1  ;;  %v4293_v2 = vmul.f32 %v978_v13, %v4261_v1 }
  0x98   : > { %v4290_v51 = vld [vmem:[%s5849_s2 + $0x1f8] sm:$0xff]  ;;  %v1024_v0 = vrot.slane %v994_v28, 1  ;;  %v1079_v57 = vsel %vm612_vm2, %v1071_v6, %v5885_v58  ;;  %v1095_v44 = vmul.f32 %v1071_v6, %v4198_v45  ;;  %v1172_v37 = vrot.slane %v3042_v41, 6 }
  0x99   : > { %5990 = vst [vmem:[#allocation13_spill] sm:$0xff] %v4293_v2  ;;  %v5886_v29 = vrot.slane %v4282_v31, 1  ;;  %v334_v10 = vld [vmem:[%s3900_s21 + $0xd8] sm:$0xff]  ;;  %v844_v30 = vadd.f32 %v836_v38, %v794_v61  ;;  %v5888_v3 = vrot.slane %v4293_v2, 1  ;;  %v4303_v5 = vmul.f32 %v1079_v57, %v4261_v1 }
  0x9a   : > { %v5889_v7 = vrot.slane %v4290_v51, 6  ;;  %v3050_v28 = vld [vmem:[%s5848_s1 + $0x98] sm:$0xff]  ;;  %v1125_v6 = vrot.slane %v1095_v44, 2  ;;  %v1196_v41 = vmul.f32 %v1172_v37, %v4198_v45 }
  0x9b   : > { %5991 = vst [vmem:[#allocation14_spill] sm:$0xff] %v4303_v5  ;;  %v925_v9 = vsel %vm457_vm1, %v923_v32, %v5886_v29  ;;  %v3066_v38 = vld [vmem:[%s5848_s1 + $0x158] sm:$0xff]  ;;  %v1026_v57 = vsel %vm457_vm1, %v1024_v0, %v5888_v3  ;;  %v5893_v58 = vrot.slane %v4303_v5, 2  ;;  %v1265_v53 = vmul.f32 %v3050_v28, %v334_v10 }
  0x9c   : > { %v4319_v61 = vld [vmem:[%s5848_s1 + $0x178] sm:$0xff]  ;;  %v945_v13 = vadd.f32 %v925_v9, %v819_v15  ;;  %v1180_v32 = vsel %vm612_vm2, %v1172_v37, %v5889_v7  ;;  %v1226_v29 = vrot.slane %v1196_v41, 2  ;;  %v1046_v37 = vadd.f32 %v1026_v57, %v844_v30 }
  0x9d   : > { %v3082_v45 = vld [vmem:[%s5848_s1 + $0x218] sm:$0xff]  ;;  %v4332_v44 = vmul.f32 %v1180_v32, %v4261_v1  ;;  %v1127_v3 = vsel %vm661_vm3, %v1125_v6, %v5893_v58  ;;  %v1323_v32 = vrot.slane %v3066_v38, 7  ;;  %v5896_v41 = vrot.slane %v4319_v61, 7 }
  0x9e   : > { %v3058_v15 = vld [vmem:[%s5849_s2 + $0x98] sm:$0xff]  ;;  %v1147_v28 = vadd.f32 %v1127_v3, %v945_v13  ;;  %v1525_v46 = vrot.slane %v3082_v45, 6 }
  0x9f   : > { %5992 = vst [vmem:[#allocation15_spill] sm:$0xff] %v4332_v44  ;;  %v4340_v0 = vld [vmem:[%s5848_s1 + $0x238] sm:$0xff]  ;;  %v5894_v7 = vrot.slane %v4332_v44, 2  ;;  %v1290_v40 = vmul.f32 %v3058_v15, %v334_v10  ;;  %v1331_v55 = vsel %vm408_vm0, %v1323_v32, %v5896_v41  ;;  %v1347_v2 = vmul.f32 %v1323_v32, %v334_v10  ;;  %v2967_v32 = vld [vmem:[%s5848_s1 + $0xc0] sm:$0xff] }
  0xa0   : > { %5993 = vst [vmem:[#allocation16_spill] sm:$0xff] %v4340_v0  ;;  %v4343_v9 = vld [vmem:[%s3900_s21 + $0xf8] sm:$0xff]  ;;  %v5895_v30 = vrot.slane %v4340_v0, 6  ;;  %v1273_v38 = vadd.f32 %v1265_v53, %v1147_v28  ;;  %v1549_v15 = vmul.f32 %v1525_v46, %v334_v10  ;;  %v4373_v53 = vld [vmem:[%s5848_s1 + $0xe0] sm:$0xff] }
  0xa1   : > { %v1228_v6 = vsel %vm661_vm3, %v1226_v29, %v5894_v7  ;;  %v4358_v57 = vmul.f32 %v1331_v55, %v4343_v9  ;;  %v1377_v13 = vrot.slane %v1347_v2, 1  ;;  %5996 = vst [vmem:[#allocation19_spill] sm:$0xff] %v4373_v53  ;;  %v2983_v2 = vld [vmem:[%s5848_s1 + $0x180] sm:$0xff] }
  0xa2   : > { %v1248_v3 = vadd.f32 %v1228_v6, %v1046_v37  ;;  %v1533_v45 = vsel %vm612_vm2, %v1525_v46, %v5895_v30  ;;  %v1579_v46 = vrot.slane %v1549_v15, 2  ;;  %v307_v10 = vld [vmem:[%s3900_s21] sm:$0xff] }
  0xa3   : > { %5994 = vst [vmem:[#allocation17_spill] sm:$0xff] %v4358_v57  ;;  %v5897_v58 = vrot.slane %v4358_v57, 1  ;;  %v4368_v29 = vmul.f32 %v1533_v45, %v4343_v9  ;;  %v4384_v37 = vld [vmem:[%s5848_s1 + $0x1a0] sm:$0xff]  ;;  %v409_v45 = vrot.slane %v2967_v32, 7 }
  0xa4   : > { %v4378_v55 = vadd.f32 %v1290_v40, %v1248_v3  ;;  %5998 = vst [vmem:[#allocation21_spill] sm:$0xff] %v4384_v37  ;;  %v4391_v30 = vld [vmem:[%s3900_s21 + $0x20] sm:$0xff]  ;;  %v5899_v40 = vrot.slane %v4373_v53, 7  ;;  %v613_v3 = vrot.slane %v2983_v2, 6 }
  0xa5   : > { %5995 = vst [vmem:[#allocation18_spill] sm:$0xff] %v4368_v29  ;;  %v1379_v28 = vsel %vm457_vm1, %v1377_v13, %v5897_v58  ;;  %v5898_v6 = vrot.slane %v4368_v29, 2  ;;  %5999 = vst [vmem:[#allocation22_spill] sm:$0xff] %v4391_v30  ;;  %v343_v41 = vld [vmem:[%s5848_s1] sm:$0xff]  ;;  %v5901_v13 = vrot.slane %v4384_v37, 6 }
  0xa6   : > { %5997 = vst [vmem:[#allocation20_spill] sm:$0xff] %v4378_v55  ;;  %v1399_v7 = vadd.f32 %v1379_v28, %v1273_v38  ;;  %v433_v55 = vmul.f32 %v409_v45, %v307_v10  ;;  %v414_v38 = vsel %vm408_vm0, %v409_v45, %v5899_v40  ;;  %v637_v32 = vmul.f32 %v613_v3, %v307_v10  ;;  %v3015_v2 = vld [vmem:[%s5848_s1 + $0x100] sm:$0xff] }
  0xa7   : > { %v1581_v15 = vsel %vm661_vm3, %v1579_v46, %v5898_v6  ;;  %v4410_v46 = vld [vmem:[%s5848_s1 + $0x120] sm:$0xff]  ;;  %v4413_v28 = vmul.f32 %v414_v38, %v4391_v30  ;;  %v351_v53 = vmul.f32 %v343_v41, %v307_v10  ;;  %v866_v29 = vrot.slane %v3015_v2, 7 }
  0xa8   : > { %v1601_v58 = vadd.f32 %v1581_v15, %v1399_v7  ;;  %6000 = vst [vmem:[#allocation23_spill] sm:$0xff] %v4410_v46  ;;  %v458_v6 = vrot.slane %v433_v55, 1  ;;  %v618_v7 = vsel %vm612_vm2, %v613_v3, %v5901_v13  ;;  %v3031_v45 = vld [vmem:[%s5848_s1 + $0x1c0] sm:$0xff]  ;;  %v662_v55 = vrot.slane %v637_v32, 2 }
  0xa9   : > { %6001 = vst [vmem:[#allocation24_spill] sm:$0xff] %v4413_v28  ;;  %v4424_v15 = vld [vmem:[%s5848_s1 + $0x1e0] sm:$0xff]  ;;  %v4428_v38 = vmul.f32 %v618_v7, %v4391_v30  ;;  %v5912_v37 = vrot.slane %v4413_v28, 1  ;;  %v5911_v57 = vrot.slane %v4410_v46, 7  ;;  %v1068_v44 = vrot.slane %v3031_v45, 6 }
  0xaa   : > { %6002 = vst [vmem:[#allocation25_spill] sm:$0xff] %v4424_v15  ;;  %1918 = vmatprep.mubr.f32.mxu1 %v1601_v58  ;;  %v319_v40 = vld [vmem:[%s3900_s21 + $0x60] sm:$0xff] }
  0xab   : > { %6003 = vst [vmem:[#allocation26_spill] sm:$0xff] %v4428_v38  ;;  %v2999_v3 = vld [vmem:[%s5848_s1 + $0x40] sm:$0xff]  ;;  %v460_v32 = vsel %vm457_vm1, %v458_v6, %v5912_v37  ;;  %v871_v2 = vsel %vm408_vm0, %v866_v29, %v5911_v57  ;;  %v890_v30 = vmul.f32 %v866_v29, %v319_v40  ;;  %v6006_v0 = vrot.slane %v4428_v38, 2 }
  0xac   : > { %v4434_v13 = vld [vmem:[%s3900_s21 + $0x80] sm:$0xff]  ;;  %v808_v7 = vmul.f32 %v2999_v3, %v319_v40  ;;  %v486_v58 = vadd.f32 %v460_v32, %v351_v53  ;;  %v6008_v6 = vrot.slane %v4424_v15, 6  ;;  %v1092_v37 = vmul.f32 %v1068_v44, %v319_v40 }
  0xad   : > { %6004 = vst [vmem:[#allocation27_spill] sm:$0xff] %v4434_v13  ;;  %v3063_v10 = vld [vmem:[%s5848_s1 + $0x140] sm:$0xff]  ;;  %v664_v28 = vsel %vm661_vm3, %v662_v55, %v6006_v0  ;;  %v4459_v5 = vmul.f32 %v871_v2, %v4434_v13  ;;  %v914_v57 = vrot.slane %v890_v30, 1 }
  0xae   : > { %v4452_v45 = vld [vmem:[%s5848_s1 + $0x160] sm:$0xff]  ;;  %v1073_v3 = vsel %vm612_vm2, %v1068_v44, %v6008_v6  ;;  %v1320_v53 = vrot.slane %v3063_v10, 7  ;;  %v690_v0 = vadd.f32 %v664_v28, %v486_v58  ;;  %v1116_v15 = vrot.slane %v1092_v37, 2 }
  0xaf   : > { %6005 = vst [vmem:[#allocation28_spill] sm:$0xff] %v4452_v45  ;;  %v331_v41 = vld [vmem:[%s3900_s21 + $0xc0] sm:$0xff]  ;;  %6007 = vst [vmem:[#allocation29_spill] sm:$0xff] %v4459_v5  ;;  %v4468_v46 = vmul.f32 %v1073_v3, %v4434_v13  ;;  %v5922_v55 = vrot.slane %v4459_v5, 1  ;;  %v5919_v2 = vrot.slane %v4452_v45, 7 }
  0xb0   : > { %v3079_v29 = vld [vmem:[%s5848_s1 + $0x200] sm:$0xff]  ;;  %v1344_v40 = vmul.f32 %v1320_v53, %v331_v41  ;;  %v816_v3 = vadd.f32 %v808_v7, %v690_v0 }
  0xb1   : > { %6009 = vst [vmem:[#allocation30_spill] sm:$0xff] %v4468_v46  ;;  %v4471_v32 = vld [vmem:[%s3900_s21 + $0xe0] sm:$0xff]  ;;  %v5921_v30 = vrot.slane %v4468_v46, 2  ;;  %v1522_v10 = vrot.slane %v3079_v29, 6  ;;  %v916_v28 = vsel %vm457_vm1, %v914_v57, %v5922_v55  ;;  %v1325_v58 = vsel %vm408_vm0, %v1320_v53, %v5919_v2  ;;  %v2969_v57 = vld [vmem:[%s5848_s1 + $0xd0] sm:$0xff] }
  0xb2   : > { %6010 = vst [vmem:[#allocation31_spill] sm:$0xff] %v4471_v32  ;;  %v4478_v6 = vld [vmem:[%s5848_s1 + $0x220] sm:$0xff]  ;;  %v4494_v13 = vmul.f32 %v1325_v58, %v4471_v32  ;;  %v1368_v38 = vrot.slane %v1344_v40, 1  ;;  %v942_v29 = vadd.f32 %v916_v28, %v816_v3  ;;  %v4503_v53 = vld [vmem:[%s5848_s1 + $0xf0] sm:$0xff] }
  0xb3   : > { %6011 = vst [vmem:[#allocation32_spill] sm:$0xff] %v4478_v6  ;;  %v3047_v44 = vld [vmem:[%s5848_s1 + $0x80] sm:$0xff]  ;;  %v1118_v37 = vsel %vm661_vm3, %v1116_v15, %v5921_v30  ;;  %v5920_v7 = vrot.slane %v4478_v6, 6  ;;  %v1546_v5 = vmul.f32 %v1522_v10, %v331_v41  ;;  %6013 = vst [vmem:[#allocation34_spill] sm:$0xff] %v4503_v53  ;;  %v309_v2 = vld [vmem:[%s3900_s21 + $0x10] sm:$0xff]  ;;  %v411_v30 = vrot.slane %v2969_v57, 7 }
  0xb4   : > { %6012 = vst [vmem:[#allocation33_spill] sm:$0xff] %v4494_v13  ;;  %v1262_v0 = vmul.f32 %v3047_v44, %v331_v41  ;;  %v5925_v15 = vrot.slane %v4494_v13, 1  ;;  %v2985_v44 = vld [vmem:[%s5848_s1 + $0x190] sm:$0xff]  ;;  %v1144_v3 = vadd.f32 %v1118_v37, %v942_v29  ;;  %v5927_v55 = vrot.slane %v4503_v53, 7 }
  0xb5   : > { %v1527_v40 = vsel %vm612_vm2, %v1522_v10, %v5920_v7  ;;  %v4515_v41 = vld [vmem:[%s5848_s1 + $0x1b0] sm:$0xff]  ;;  %v1570_v58 = vrot.slane %v1546_v5, 2  ;;  %v615_v29 = vrot.slane %v2985_v44, 6 }
  0xb6   : > { %6014 = vst [vmem:[#allocation35_spill] sm:$0xff] %v4515_v41  ;;  %v4518_v28 = vmul.f32 %v1527_v40, %v4471_v32  ;;  %v1370_v10 = vsel %vm457_vm1, %v1368_v38, %v5925_v15  ;;  %v4525_v7 = vld [vmem:[%s3900_s21 + $0x30] sm:$0xff]  ;;  %v1270_v6 = vadd.f32 %v1262_v0, %v1144_v3  ;;  %v5928_v5 = vrot.slane %v4515_v41, 6 }
  0xb7   : > { %6016 = vst [vmem:[#allocation37_spill] sm:$0xff] %v4525_v7  ;;  %v345_v37 = vld [vmem:[%s5848_s1 + $0x10] sm:$0xff]  ;;  %v418_v40 = vsel %vm408_vm0, %v411_v30, %v5927_v55  ;;  %v435_v38 = vmul.f32 %v411_v30, %v309_v2 }
  0xb8   : > { %6015 = vst [vmem:[#allocation36_spill] sm:$0xff] %v4518_v28  ;;  %v5929_v45 = vrot.slane %v4518_v28, 2  ;;  %v1396_v15 = vadd.f32 %v1370_v10, %v1270_v6  ;;  %v321_v57 = vld [vmem:[%s3900_s21 + $0x70] sm:$0xff]  ;;  %v4541_v3 = vmul.f32 %v418_v40, %v4525_v7  ;;  %v622_v44 = vsel %vm612_vm2, %v615_v29, %v5928_v5 }
  0xb9   : > { %v3017_v53 = vld [vmem:[%s5848_s1 + $0x110] sm:$0xff]  ;;  %v353_v30 = vmul.f32 %v345_v37, %v309_v2  ;;  %v464_v10 = vrot.slane %v435_v38, 1  ;;  %v4555_v55 = vmul.f32 %v622_v44, %v4525_v7 }
  0xba   : > { %v1572_v0 = vsel %vm661_vm3, %v1570_v58, %v5929_v45  ;;  %6017 = vst [vmem:[#allocation38_spill] sm:$0xff] %v4541_v3  ;;  %v4552_v6 = vld [vmem:[%s5848_s1 + $0x130] sm:$0xff]  ;;  %v639_v58 = vmul.f32 %v615_v29, %v309_v2  ;;  %v5940_v37 = vrot.slane %v4541_v3, 1  ;;  %v868_v44 = vrot.slane %v3017_v53, 7 }
  0xbb   : > { %6018 = vst [vmem:[#allocation39_spill] sm:$0xff] %v4552_v6  ;;  %6019 = vst [vmem:[#allocation40_spill] sm:$0xff] %v4555_v55  ;;  %v3001_v40 = vld [vmem:[%s5848_s1 + $0x50] sm:$0xff]  ;;  %v1598_v41 = vadd.f32 %v1572_v0, %v1396_v15  ;;  %v5939_v38 = vrot.slane %v4555_v55, 2  ;;  %v5938_v7 = vrot.slane %v4552_v6, 7 }
  0xbc   : > { %v3033_v5 = vld [vmem:[%s5848_s1 + $0x1d0] sm:$0xff]  ;;  %v668_v29 = vrot.slane %v639_v58, 2  ;;  %v466_v28 = vsel %vm457_vm1, %v464_v10, %v5940_v37  ;;  %v810_v13 = vmul.f32 %v3001_v40, %v321_v57  ;;  %v892_v46 = vmul.f32 %v868_v44, %v321_v57 }
  0xbd   : > { %v4566_v45 = vld [vmem:[%s5848_s1 + $0x1f0] sm:$0xff]  ;;  %1844 = vmatmul.mubr.f32.vlgmr.msra.gmra.mrb[0].mxu0 %v1598_v41  ;;  %v1070_v32 = vrot.slane %v3033_v5, 6  ;;  %v488_v0 = vadd.f32 %v466_v28, %v353_v30  ;;  %v875_v53 = vsel %vm408_vm0, %v868_v44, %v5938_v7 }
  0xbe   : > { %6020 = vst [vmem:[#allocation41_spill] sm:$0xff] %v4566_v45  ;;  %v4570_v2 = vld [vmem:[%s3900_s21 + $0x90] sm:$0xff]  ;;  %v5941_v15 = vrot.slane %v4566_v45, 6  ;;  %v670_v58 = vsel %vm661_vm3, %v668_v29, %v5939_v38  ;;  %v920_v7 = vrot.slane %v892_v46, 1 }
  0xbf   : > { %6021 = vst [vmem:[#allocation42_spill] sm:$0xff] %v4570_v2  ;;  %v3065_v41 = vld [vmem:[%s5848_s1 + $0x150] sm:$0xff]  ;;  %v4593_v28 = vmul.f32 %v875_v53, %v4570_v2  ;;  %v1094_v10 = vmul.f32 %v1070_v32, %v321_v57  ;;  %v692_v44 = vadd.f32 %v670_v58, %v488_v0 }
  0xc0   : > { %v4590_v5 = vld [vmem:[%s5848_s1 + $0x170] sm:$0xff]  ;;  %v1077_v30 = vsel %vm612_vm2, %v1070_v32, %v5941_v15  ;;  %v1322_v0 = vrot.slane %v3065_v41, 7  ;;  %v372_v41 = vld [vmem:[%s5849_s2 + $0x28] sm:$0xff] }
  0xc1   : > { %6022 = vst [vmem:[#allocation43_spill] sm:$0xff] %v4590_v5  ;;  %v3081_v40 = vld [vmem:[%s5848_s1 + $0x210] sm:$0xff]  ;;  %v4603_v38 = vmul.f32 %v1077_v30, %v4570_v2  ;;  %v5949_v15 = vrot.slane %v4593_v28, 1  ;;  %v1122_v32 = vrot.slane %v1094_v10, 2  ;;  %v5948_v46 = vrot.slane %v4590_v5, 7 }
  0xc2   : > { %v333_v29 = vld [vmem:[%s3900_s21 + $0xd0] sm:$0xff]  ;;  %v818_v58 = vadd.f32 %v810_v13, %v692_v44  ;;  %v1524_v45 = vrot.slane %v3081_v40, 6 }
  0xc3   : > { %6023 = vst [vmem:[#allocation44_spill] sm:$0xff] %v4603_v38  ;;  %v4608_v53 = vld [vmem:[%s5848_s1 + $0x230] sm:$0xff]  ;;  %v5951_v30 = vrot.slane %v4603_v38, 2  ;;  %v922_v6 = vsel %vm457_vm1, %v920_v7, %v5949_v15  ;;  %v1329_v10 = vsel %vm408_vm0, %v1322_v0, %v5948_v46  ;;  %v1346_v55 = vmul.f32 %v1322_v0, %v333_v29  ;;  %v316_v7 = vld [vmem:[%s3900_s21 + $0x48] sm:$0x3] }
  0xc4   : > { %6024 = vst [vmem:[#allocation45_spill] sm:$0xff] %v4608_v53  ;;  %v4611_v37 = vld [vmem:[%s3900_s21 + $0xf0] sm:$0xff]  ;;  %v5954_v3 = vrot.slane %v4608_v53, 6  ;;  %v944_v2 = vadd.f32 %v922_v6, %v818_v58  ;;  %v348_v0 = vld [vmem:[%s5848_s1 + $0x28] sm:$0xff]  ;;  %v1548_v6 = vmul.f32 %v1524_v45, %v333_v29  ;;  %v6026_v53 = vrot.slane %v3930_v36, 7 }
  0xc5   : > { %v3049_v57 = vld [vmem:[%s5848_s1 + $0x90] sm:$0xff]  ;;  %v1124_v13 = vsel %vm661_vm3, %v1122_v32, %v5951_v30  ;;  %v4633_v44 = vmul.f32 %v1329_v10, %v4611_v37  ;;  %v1374_v46 = vrot.slane %v1346_v55, 1  ;;  %v380_v10 = vmul.f32 %v372_v41, %v3922_v34 }
  0xc6   : > { %v1264_v40 = vmul.f32 %v3049_v57, %v333_v29  ;;  %v1531_v15 = vsel %vm612_vm2, %v1524_v45, %v5954_v3  ;;  %v1146_v58 = vadd.f32 %v1124_v13, %v944_v2  ;;  %v3004_v57 = vld [vmem:[%s5848_s1 + $0x68] sm:$0xff]  ;;  %v1576_v30 = vrot.slane %v1548_v6, 2 }
  0xc7   : > { %6025 = vst [vmem:[#allocation46_spill] sm:$0xff] %v4633_v44  ;;  %v5955_v5 = vrot.slane %v4633_v44, 1  ;;  %v4644_v32 = vmul.f32 %v1531_v15, %v4611_v37  ;;  %v356_v55 = vmul.f32 %v348_v0, %v3922_v34  ;;  %v442_v38 = vmul.f32 %v6026_v53, %v316_v7  ;;  %v3012_v45 = vld [vmem:[%s5849_s2 + $0x68] sm:$0xff] }
  0xc8   : > { %v1272_v2 = vadd.f32 %v1264_v40, %v1146_v58  ;;  %v328_v13 = vld [vmem:[%s3900_s21 + $0xa8] sm:$0x3]  ;;  %v6027_v41 = vrot.slane %v3941_v42, 7  ;;  %v6028_v36 = vrot.slane %v3950_v47, 6  ;;  %v6029_v0 = vrot.slane %v3958_v50, 6 }
  0xc9   : > { %v1376_v15 = vsel %vm457_vm1, %v1374_v46, %v5955_v5  ;;  %v1577_v29 = vrot.slane %v4644_v32, 2  ;;  %v472_v34 = vrot.slane %v442_v38, 1  ;;  %v813_v40 = vmul.f32 %v3004_v57, %v4031_v24  ;;  %v1954_v32 = vld [vmem:[#allocation5 + $0xb8] sm:$0xff] }
  0xca   : > { %v544_v6 = vmul.f32 %v6027_v41, %v316_v7  ;;  %v646_v53 = vmul.f32 %v6028_v36, %v316_v7  ;;  %v748_v3 = vmul.f32 %v6029_v0, %v316_v7  ;;  %v1398_v58 = vadd.f32 %v1376_v15, %v1272_v2  ;;  %v4680_v7 = vld [vmem:[%s5849_s2 + $0x148] sm:$0xff] }
  0xcb   : > { %v1578_v46 = vsel %vm661_vm3, %v1576_v30, %v1577_v29  ;;  %v838_v44 = vmul.f32 %v3012_v45, %v4031_v24  ;;  %v6030_v42 = vrot.slane %v3968_v56, 1  ;;  %v6031_v36 = vrot.slane %v4001_v11, 7  ;;  %v340_v2 = vld [vmem:[%s3900_s21 + $0x108] sm:$0x3] }
  0xcc   : > { %v573_v5 = vrot.slane %v544_v6, 1  ;;  %v676_v41 = vrot.slane %v646_v53, 2  ;;  %v777_v47 = vrot.slane %v748_v3, 2  ;;  %v1600_v57 = vadd.f32 %v1578_v46, %v1398_v58 }
  0xcd   : > { %v473_v38 = vsel %vm457_vm1, %v6030_v42, %v472_v34  ;;  %v899_v50 = vmul.f32 %v6031_v36, %v328_v13  ;;  %v6032_v15 = vrot.slane %v3977_v62, 1  ;;  %v6033_v56 = vrot.slane %v4017_v17, 7 }
  0xce   : > { %v491_v30 = vadd.f32 %v473_v38, %v356_v55  ;;  %v6034_v3 = vrot.slane %v3988_v4, 2  ;;  %v6035_v34 = vrot.slane %v4008_v14, 2  ;;  %1919 = vmatmul.mubr.f32.vlgmr.msra.gmra.mrb[0].mxu1 %v1600_v57  ;;  %v6036_v62 = vrot.slane %v4028_v23, 6  ;;  %v3076_v4 = vld [vmem:[%s5849_s2 + $0x168] sm:$0xff] }
  0xcf   : > { %v574_v24 = vsel %vm457_vm1, %v6032_v15, %v573_v5  ;;  %v1000_v45 = vmul.f32 %v6033_v56, %v328_v13  ;;  %v928_v0 = vrot.slane %v899_v50, 1  ;;  %v6037_v5 = vrot.slane %v4056_v48, 6  ;;  %v3060_v48 = vld [vmem:[%s5849_s2 + $0xa8] sm:$0xff] }
  0xd0   : > { %v592_v6 = vadd.f32 %v574_v24, %v380_v10  ;;  %v677_v11 = vsel %vm661_vm3, %v6034_v3, %v676_v41  ;;  %v778_v53 = vsel %vm661_vm3, %v6035_v34, %v777_v47  ;;  %v1101_v46 = vmul.f32 %v6036_v62, %v328_v13  ;;  %v3052_v41 = vld [vmem:[%s5848_s1 + $0xa8] sm:$0xff]  ;;  %v318_v62 = vld [vmem:[%s3900_s21 + $0x58] sm:$0x3] }
  0xd1   : > { %v695_v58 = vadd.f32 %v677_v11, %v491_v30  ;;  %v1029_v55 = vrot.slane %v1000_v45, 1  ;;  %v1202_v17 = vmul.f32 %v6037_v5, %v328_v13  ;;  %v5961_v10 = vrot.slane %v4680_v7, 7 }
  0xd2   : > { %v796_v42 = vadd.f32 %v778_v53, %v592_v6  ;;  %v6038_v14 = vrot.slane %v4048_v43, 1  ;;  %v6039_v23 = vrot.slane %v4093_v19, 7  ;;  %v6040_v36 = vrot.slane %v4068_v59, 1 }
  0xd3   : > { %v821_v13 = vadd.f32 %v813_v40, %v695_v58  ;;  %v1130_v57 = vrot.slane %v1101_v46, 2  ;;  %v1231_v43 = vrot.slane %v1202_v17, 2  ;;  %v1427_v24 = vrot.slane %v3076_v4, 7  ;;  %v350_v46 = vld [vmem:[%s5848_s1 + $0x38] sm:$0xff] }
  0xd4   : > { %v929_v38 = vsel %vm457_vm1, %v6038_v14, %v928_v0  ;;  %v1353_v47 = vmul.f32 %v6039_v23, %v340_v2  ;;  %v1030_v50 = vsel %vm457_vm1, %v6040_v36, %v1029_v55  ;;  %v846_v30 = vadd.f32 %v838_v44, %v796_v42  ;;  %v374_v44 = vld [vmem:[%s5849_s2 + $0x38] sm:$0xff] }
  0xd5   : > { %v6041_v56 = vrot.slane %v4113_v26, 6  ;;  %v947_v19 = vadd.f32 %v929_v38, %v821_v13  ;;  %v6042_v6 = vrot.slane %v4071_v60, 2  ;;  %v6043_v40 = vrot.slane %v4105_v25, 2  ;;  %v3062_v26 = vld [vmem:[%s5849_s2 + $0xb8] sm:$0xff] }
  0xd6   : > { %v1382_v15 = vrot.slane %v1353_v47, 1  ;;  %v1267_v11 = vmul.f32 %v3052_v41, %v4116_v35  ;;  %v1292_v34 = vmul.f32 %v3060_v48, %v4116_v35  ;;  %v1048_v53 = vadd.f32 %v1030_v50, %v846_v30  ;;  %v3006_v50 = vld [vmem:[%s5848_s1 + $0x78] sm:$0xff] }
  0xd7   : > { %v1555_v45 = vmul.f32 %v6041_v56, %v340_v2  ;;  %v1131_v3 = vsel %vm661_vm3, %v6042_v6, %v1130_v57  ;;  %v1232_v59 = vsel %vm661_vm3, %v6043_v40, %v1231_v43  ;;  %v1428_v60 = vsel %vm408_vm0, %v5961_v10, %v1427_v24  ;;  %v330_v30 = vld [vmem:[%s3900_s21 + $0xb8] sm:$0x3] }
  0xd8   : > { %v1454_v25 = vmul.f32 %v1427_v24, %v340_v2  ;;  %v1149_v0 = vadd.f32 %v1131_v3, %v947_v19  ;;  %v4736_v58 = vmul.f32 %v1428_v60, %v4116_v35  ;;  %v1250_v5 = vadd.f32 %v1232_v59, %v1048_v53  ;;  %v4752_v35 = vld [vmem:[%s5849_s2 + $0x158] sm:$0xff] }
  0xd9   : > { %v1584_v55 = vrot.slane %v1555_v45, 2  ;;  %v6044_v17 = vrot.slane %v4128_v63, 1  ;;  %v382_v14 = vmul.f32 %v374_v44, %v4175_v54  ;;  %v4747_v2 = vmul.f32 %v3062_v26, %v4343_v9 }
  0xda   : > { %v1483_v42 = vrot.slane %v1454_v25, 1  ;;  %v1275_v38 = vadd.f32 %v1267_v11, %v1149_v0  ;;  %v5958_v41 = vrot.slane %v4736_v58, 1  ;;  %v1300_v23 = vadd.f32 %v1292_v34, %v1250_v5  ;;  %v342_v25 = vld [vmem:[%s3900_s21 + $0x118] sm:$0x3] }
  0xdb   : > { %v1383_v4 = vsel %vm457_vm1, %v6044_v17, %v1382_v15  ;;  %v6045_v47 = vrot.slane %v4143_v16, 2  ;;  %v358_v48 = vmul.f32 %v350_v46, %v4175_v54  ;;  %v6046_v13 = vrot.slane %v4148_v20, 7  ;;  %v3014_v20 = vld [vmem:[%s5849_s2 + $0x78] sm:$0xff] }
  0xdc   : > { %v1401_v57 = vadd.f32 %v1383_v4, %v1275_v38  ;;  %v1484_v43 = vsel %vm457_vm1, %v5958_v41, %v1483_v42  ;;  %v6047_v15 = vrot.slane %v4156_v22, 7  ;;  %v6048_v24 = vrot.slane %v4169_v52, 6 }
  0xdd   : > { %v1585_v63 = vsel %vm661_vm3, %v6045_v47, %v1584_v55  ;;  %v444_v36 = vmul.f32 %v6046_v13, %v318_v62  ;;  %v5959_v54 = vrot.slane %v4752_v35, 7  ;;  %v4776_v45 = vadd.f32 %v1484_v43, %v1300_v23  ;;  %v6060_v43 = vld [vmem:[#allocation13_spill] sm:$0xff] }
  0xde   : > { %v546_v16 = vmul.f32 %v6047_v15, %v318_v62  ;;  %v648_v56 = vmul.f32 %v6048_v24, %v318_v62  ;;  %v6049_v6 = vrot.slane %v4195_v18, 6  ;;  %v1603_v40 = vadd.f32 %v1585_v63, %v1401_v57  ;;  %v3054_v18 = vld [vmem:[%s5848_s1 + $0xb8] sm:$0xff] }
  0xdf   : > { %v476_v19 = vrot.slane %v444_v36, 1  ;;  %v815_v11 = vmul.f32 %v3006_v50, %v4261_v1  ;;  %v6050_v52 = vrot.slane %v4201_v33, 1  ;;  %v840_v26 = vmul.f32 %v3014_v20, %v4261_v1 }
  0xe0   : > { %v750_v3 = vmul.f32 %v6049_v6, %v318_v62  ;;  %v577_v59 = vrot.slane %v546_v16, 1  ;;  %v680_v22 = vrot.slane %v648_v56, 2  ;;  %v6051_v53 = vrot.slane %v4229_v39, 7  ;;  %1848 = vmatprep.mubr.f32.mxu0 %v1603_v40  ;;  %v6062_v56 = vld [vmem:[#allocation14_spill] sm:$0xff]  ;;  %v6064_v6 = vld [vmem:[#allocation16_spill] sm:$0xff] }
  0xe1   : > { %v477_v34 = vsel %vm457_vm1, %v6050_v52, %v476_v19  ;;  %v6052_v55 = vrot.slane %v4204_v49, 1  ;;  %v6053_v33 = vrot.slane %v4218_v8, 2  ;;  %v6054_v1 = vrot.slane %v4247_v12, 7  ;;  %v3078_v49 = vld [vmem:[%s5849_s2 + $0x178] sm:$0xff] }
  0xe2   : > { %v781_v44 = vrot.slane %v750_v3, 2  ;;  %v901_v60 = vmul.f32 %v6051_v53, %v330_v30  ;;  %v493_v0 = vadd.f32 %v477_v34, %v358_v48  ;;  %v6055_v17 = vrot.slane %v4253_v27, 2  ;;  %v6068_v53 = vld [vmem:[#allocation17_spill] sm:$0xff] }
  0xe3   : > { %v578_v62 = vsel %vm457_vm1, %v6052_v55, %v577_v59  ;;  %v681_v46 = vsel %vm661_vm3, %v6053_v33, %v680_v22  ;;  %v1002_v5 = vmul.f32 %v6054_v1, %v330_v30  ;;  %v6056_v38 = vrot.slane %v4258_v21, 6  ;;  %v6066_v22 = vld [vmem:[#allocation15_spill] sm:$0xff]  ;;  %v347_v1 = vld [vmem:[%s5848_s1 + $0x20] sm:$0xff] }
  0xe4   : > { %v594_v39 = vadd.f32 %v578_v62, %v382_v14  ;;  %v782_v4 = vsel %vm661_vm3, %v6055_v17, %v781_v44  ;;  %v932_v42 = vrot.slane %v901_v60, 1  ;;  %v697_v47 = vadd.f32 %v681_v46, %v493_v0  ;;  %v315_v62 = vld [vmem:[%s3900_s21 + $0x40] sm:$0x3] }
  0xe5   : > { %v1103_v23 = vmul.f32 %v6056_v38, %v330_v30  ;;  %v1033_v8 = vrot.slane %v1002_v5, 1  ;;  %v6057_v63 = vrot.slane %v4290_v51, 6  ;;  %v1269_v12 = vmul.f32 %v3054_v18, %v4343_v9  ;;  %v4855_v38 = vld [vmem:[%s5849_s2 + $0x180] sm:$0xff] }
  0xe6   : > { %v798_v14 = vadd.f32 %v782_v4, %v594_v39  ;;  %v6058_v27 = vrot.slane %v4282_v31, 1  ;;  %v6059_v21 = vrot.slane %v4319_v61, 7  ;;  %v823_v57 = vadd.f32 %v815_v11, %v697_v47  ;;  %v4826_v61 = vld [vmem:[%s5849_s2 + $0xc0] sm:$0xff]  ;;  %v6070_v4 = vld [vmem:[#allocation18_spill] sm:$0xff] }
  0xe7   : > { %v1204_v48 = vmul.f32 %v6057_v63, %v330_v30  ;;  %v1134_v36 = vrot.slane %v1103_v23, 2  ;;  %v6061_v15 = vrot.slane %v6060_v43, 1  ;;  %v1431_v51 = vrot.slane %v3078_v49, 7  ;;  %v6072_v49 = vld [vmem:[#allocation19_spill] sm:$0xff] }
  0xe8   : > { %v933_v13 = vsel %vm457_vm1, %v6058_v27, %v932_v42  ;;  %v1355_v50 = vmul.f32 %v6059_v21, %v342_v25  ;;  %v848_v30 = vadd.f32 %v840_v26, %v798_v14  ;;  %v6063_v20 = vrot.slane %v6062_v56, 2  ;;  %v6074_v14 = vld [vmem:[#allocation22_spill] sm:$0xff]  ;;  %v371_v21 = vld [vmem:[%s5849_s2 + $0x20] sm:$0xff] }
  0xe9   : > { %v1034_v16 = vsel %vm457_vm1, %v6061_v15, %v1033_v8  ;;  %v1235_v24 = vrot.slane %v1204_v48, 2  ;;  %v6065_v3 = vrot.slane %v6064_v6, 6  ;;  %v949_v59 = vadd.f32 %v933_v13, %v823_v57  ;;  %v3011_v56 = vld [vmem:[%s5849_s2 + $0x60] sm:$0xff] }
  0xea   : > { %v1135_v19 = vsel %vm661_vm3, %v6063_v20, %v1134_v36  ;;  %v1386_v31 = vrot.slane %v1355_v50, 1  ;;  %v6067_v11 = vrot.slane %v6066_v22, 2  ;;  %v1432_v34 = vsel %vm408_vm0, %v5959_v54, %v1431_v51 }
  0xeb   : > { %v1557_v40 = vmul.f32 %v6065_v3, %v342_v25  ;;  %v1456_v44 = vmul.f32 %v1431_v51, %v342_v25  ;;  %v1050_v26 = vadd.f32 %v1034_v16, %v848_v30  ;;  %v6069_v60 = vrot.slane %v6068_v53, 1  ;;  %v2979_v25 = vld [vmem:[%s5849_s2 + $0xe0] sm:$0xff] }
  0xec   : > { %v1236_v52 = vsel %vm661_vm3, %v6067_v11, %v1235_v24  ;;  %v4838_v0 = vmul.f32 %v1432_v34, %v4343_v9  ;;  %v1151_v33 = vadd.f32 %v1135_v19, %v949_v59  ;;  %v511_v5 = vrot.slane %v4826_v61, 7  ;;  %v3003_v30 = vld [vmem:[%s5848_s1 + $0x60] sm:$0xff] }
  0xed   : > { %v1387_v18 = vsel %vm457_vm1, %v6069_v60, %v1386_v31  ;;  %v1588_v55 = vrot.slane %v1557_v40, 2  ;;  %v1487_v46 = vrot.slane %v1456_v44, 1  ;;  %v1252_v39 = vadd.f32 %v1236_v52, %v1050_v26  ;;  %v4885_v19 = vld [vmem:[%s3900_s21 + $0xa0] sm:$0x3]  ;;  %v6079_v60 = vld [vmem:[#allocation26_spill] sm:$0xff] }
  0xee   : > { %v5957_v17 = vrot.slane %v4838_v0, 1  ;;  %v6071_v9 = vrot.slane %v6070_v4, 2  ;;  %v1277_v23 = vadd.f32 %v1269_v12, %v1151_v33  ;;  %v6073_v47 = vrot.slane %v6072_v49, 7  ;;  %v6075_v12 = vld [vmem:[#allocation21_spill] sm:$0xff]  ;;  %v6077_v31 = vld [vmem:[#allocation24_spill] sm:$0xff]  ;;  %v6081_v33 = vld [vmem:[#allocation27_spill] sm:$0xff] }
  0xef   : > { %v1302_v63 = vadd.f32 %v4747_v2, %v1252_v39  ;;  %v355_v27 = vmul.f32 %v347_v1, %v6074_v14  ;;  %v515_v13 = vrot.slane %v2979_v25, 7  ;;  %v6076_v57 = vrot.slane %v6075_v12, 6  ;;  %v2995_v2 = vld [vmem:[%s5849_s2 + $0x1a0] sm:$0xff] }
  0xf0   : > { %v1589_v42 = vsel %vm661_vm3, %v6071_v9, %v1588_v55  ;;  %v441_v8 = vmul.f32 %v6073_v47, %v315_v62  ;;  %v1488_v48 = vsel %vm457_vm1, %v5957_v17, %v1487_v46  ;;  %v1403_v36 = vadd.f32 %v1387_v18, %v1277_v23  ;;  %v4897_v44 = vld [vmem:[%s5849_s2 + $0x100] sm:$0xff]  ;;  %v6082_v9 = vld [vmem:[#allocation23_spill] sm:$0xff] }
  0xf1   : > { %v645_v43 = vmul.f32 %v6076_v57, %v315_v62  ;;  %v715_v15 = vrot.slane %v4855_v38, 6  ;;  %v4873_v16 = vadd.f32 %v1488_v48, %v1302_v63  ;;  %v516_v24 = vsel %vm408_vm0, %v511_v5, %v515_v13  ;;  %v3027_v26 = vld [vmem:[%s5849_s2 + $0x120] sm:$0xff]  ;;  %v6084_v57 = vld [vmem:[#allocation25_spill] sm:$0xff] }
  0xf2   : > { %v470_v50 = vrot.slane %v441_v8, 1  ;;  %v543_v51 = vmul.f32 %v515_v13, %v315_v62  ;;  %v1605_v20 = vadd.f32 %v1589_v42, %v1403_v36  ;;  %v6078_v6 = vrot.slane %v6077_v31, 1  ;;  %v4924_v48 = vld [vmem:[%s5849_s2 + $0x1c0] sm:$0xff] }
  0xf3   : > { %v4891_v40 = vmul.f32 %v516_v24, %v6074_v14  ;;  %v674_v59 = vrot.slane %v645_v43, 2  ;;  %v379_v22 = vmul.f32 %v371_v21, %v6074_v14  ;;  %v719_v34 = vrot.slane %v2995_v2, 6  ;;  %v4940_v24 = vld [vmem:[%s5849_s2 + $0x140] sm:$0xff] }
  0xf4   : > { %v471_v3 = vsel %vm457_vm1, %v6078_v6, %v470_v50  ;;  %v571_v52 = vrot.slane %v543_v51, 1  ;;  %1923 = vmatprep.mubr.f32.mxu1 %v1605_v20  ;;  %v6080_v18 = vrot.slane %v6079_v60, 2  ;;  %v812_v46 = vmul.f32 %v3003_v30, %v6081_v33  ;;  %v6086_v51 = vld [vmem:[#allocation29_spill] sm:$0xff] }
  0xf5   : > { %v490_v11 = vadd.f32 %v471_v3, %v355_v27  ;;  %v5976_v53 = vrot.slane %v4891_v40, 1  ;;  %v837_v1 = vmul.f32 %v3011_v56, %v6081_v33  ;;  %v720_v39 = vsel %vm612_vm2, %v715_v15, %v719_v34  ;;  %v3051_v3 = vld [vmem:[%s5848_s1 + $0xa0] sm:$0xff] }
  0xf6   : > { %v675_v55 = vsel %vm661_vm3, %v6080_v18, %v674_v59  ;;  %v747_v4 = vmul.f32 %v719_v34, %v315_v62  ;;  %v6083_v42 = vrot.slane %v6082_v9, 7  ;;  %v4918_v47 = vmul.f32 %v720_v39, %v6074_v14  ;;  %v3043_v62 = vld [vmem:[%s5849_s2 + $0x1e0] sm:$0xff]  ;;  %v6088_v39 = vld [vmem:[#allocation30_spill] sm:$0xff] }
  0xf7   : > { %v694_v25 = vadd.f32 %v675_v55, %v490_v11  ;;  %v572_v49 = vsel %vm457_vm1, %v5976_v53, %v571_v52  ;;  %v5973_v8 = vrot.slane %v4897_v44, 7  ;;  %v971_v63 = vrot.slane %v3027_v26, 7  ;;  %v339_v34 = vld [vmem:[%s3900_s21 + $0x100] sm:$0x3]  ;;  %v1946_v53 = vld [vmem:[#allocation5 + $0x78] sm:$0xff] }
  0xf8   : > { %v898_v23 = vmul.f32 %v6083_v42, %v4885_v19  ;;  %v591_v27 = vadd.f32 %v572_v49, %v379_v22  ;;  %v775_v13 = vrot.slane %v747_v4, 2  ;;  %v5975_v14 = vrot.slane %v4918_v47, 2 }
  0xf9   : > { %v820_v36 = vadd.f32 %v812_v46, %v694_v25  ;;  %v972_v50 = vsel %vm408_vm0, %v5973_v8, %v971_v63  ;;  %v999_v12 = vmul.f32 %v971_v63, %v4885_v19  ;;  %v6085_v43 = vrot.slane %v6084_v57, 6  ;;  %v3075_v46 = vld [vmem:[%s5849_s2 + $0x160] sm:$0xff] }
  0xfa   : > { %v926_v21 = vrot.slane %v898_v23, 1  ;;  %v6087_v30 = vrot.slane %v6086_v51, 1  ;;  %v4946_v20 = vmul.f32 %v972_v50, %v6081_v33  ;;  %v5971_v31 = vrot.slane %v4924_v48, 6  ;;  %v6090_v23 = vld [vmem:[#allocation31_spill] sm:$0xff]  ;;  %v3059_v63 = vld [vmem:[%s5849_s2 + $0xa0] sm:$0xff] }
  0xfb   : > { %v1100_v2 = vmul.f32 %v6085_v43, %v4885_v19  ;;  %v1173_v6 = vrot.slane %v3043_v62, 6  ;;  %v776_v59 = vsel %vm661_vm3, %v5975_v14, %v775_v13  ;;  %v1027_v11 = vrot.slane %v999_v12, 1  ;;  %v6091_v50 = vld [vmem:[#allocation28_spill] sm:$0xff]  ;;  %v1944_v14 = vld [vmem:[#allocation5 + $0x68] sm:$0xff] }
  0xfc   : > { %v927_v56 = vsel %vm457_vm1, %v6087_v30, %v926_v21  ;;  %v795_v26 = vadd.f32 %v776_v59, %v591_v27  ;;  %v5970_v60 = vrot.slane %v4946_v20, 1  ;;  %v5974_v25 = vrot.slane %v4940_v24, 7  ;;  %v6093_v43 = vld [vmem:[#allocation32_spill] sm:$0xff] }
  0xfd   : > { %v946_v22 = vadd.f32 %v927_v56, %v820_v36  ;;  %v1128_v52 = vrot.slane %v1100_v2, 2  ;;  %v1174_v18 = vsel %vm612_vm2, %v5971_v31, %v1173_v6  ;;  %v1201_v55 = vmul.f32 %v1173_v6, %v4885_v19  ;;  %v6120_v31 = vld [vmem:[#allocation46_spill] sm:$0xff] }
  0xfe   : > { %v6089_v4 = vrot.slane %v6088_v39, 2  ;;  %v4969_v42 = vmul.f32 %v1174_v18, %v6081_v33  ;;  %v1266_v49 = vmul.f32 %v3051_v3, %v6090_v23  ;;  %v845_v62 = vadd.f32 %v837_v1, %v795_v26  ;;  %v4986_v1 = vld [vmem:[%s5849_s2 + $0xd0] sm:$0xff] }
  0xff   : > { %v1028_v27 = vsel %vm457_vm1, %v5970_v60, %v1027_v11  ;;  %v1229_v36 = vrot.slane %v1201_v55, 2  ;;  %v6092_v12 = vrot.slane %v6091_v50, 7  ;;  %v1425_v57 = vrot.slane %v3075_v46, 7  ;;  %v317_v46 = vld [vmem:[%s3900_s21 + $0x50] sm:$0x3]  ;;  %v1935_v60 = vld [vmem:[#allocation5 + $0x20] sm:$0xff] }
 0x100   : > { %v1129_v9 = vsel %vm661_vm3, %v6089_v4, %v1128_v52  ;;  %v5969_v21 = vrot.slane %v4969_v42, 2  ;;  %v6094_v2 = vrot.slane %v6093_v43, 6  ;;  %v1047_v30 = vadd.f32 %v1028_v27, %v845_v62  ;;  %v4998_v52 = vld [vmem:[%s5849_s2 + $0x190] sm:$0xff] }
 0x101   : > { %v1148_v13 = vadd.f32 %v1129_v9, %v946_v22  ;;  %v1352_v33 = vmul.f32 %v6092_v12, %v339_v34  ;;  %v1291_v6 = vmul.f32 %v3059_v63, %v6090_v23  ;;  %v1426_v22 = vsel %vm408_vm0, %v5974_v25, %v1425_v57  ;;  %v349_v39 = vld [vmem:[%s5848_s1 + $0x30] sm:$0xff]  ;;  %v6095_v9 = vld [vmem:[#allocation33_spill] sm:$0xff] }
 0x102   : > { %v1554_v51 = vmul.f32 %v6094_v2, %v339_v34  ;;  %v1230_v3 = vsel %vm661_vm3, %v5969_v21, %v1229_v36  ;;  %v1453_v11 = vmul.f32 %v1425_v57, %v339_v34  ;;  %v5001_v18 = vmul.f32 %v1426_v22, %v6090_v23  ;;  %v2981_v62 = vld [vmem:[%s5849_s2 + $0xf0] sm:$0xff]  ;;  %v6097_v36 = vld [vmem:[#allocation36_spill] sm:$0xff]  ;;  %v6099_v2 = vld [vmem:[#allocation37_spill] sm:$0xff] }
 0x103   : > { %v1274_v56 = vadd.f32 %v1266_v49, %v1148_v13  ;;  %v1380_v59 = vrot.slane %v1352_v33, 1  ;;  %v1249_v26 = vadd.f32 %v1230_v3, %v1047_v30  ;;  %v5963_v4 = vrot.slane %v4986_v1, 7  ;;  %v373_v33 = vld [vmem:[%s5849_s2 + $0x30] sm:$0xff] }
 0x104   : > { %v1582_v55 = vrot.slane %v1554_v51, 2  ;;  %v6096_v49 = vrot.slane %v6095_v9, 1  ;;  %v1481_v63 = vrot.slane %v1453_v11, 1  ;;  %v5964_v13 = vrot.slane %v5001_v18, 1  ;;  %v2997_v57 = vld [vmem:[%s5849_s2 + $0x1b0] sm:$0xff] }
 0x105   : > { %v1299_v27 = vadd.f32 %v1291_v6, %v1249_v26  ;;  %v6098_v50 = vrot.slane %v6097_v36, 2  ;;  %v5962_v43 = vrot.slane %v4998_v52, 6  ;;  %v357_v51 = vmul.f32 %v349_v39, %v6099_v2  ;;  %v6100_v30 = vld [vmem:[#allocation34_spill] sm:$0xff]  ;;  %v6102_v26 = vld [vmem:[#allocation35_spill] sm:$0xff] }
 0x106   : > { %v1381_v34 = vsel %vm457_vm1, %v6096_v49, %v1380_v59  ;;  %v3005_v3 = vld [vmem:[%s5848_s1 + $0x70] sm:$0xff]  ;;  %v1482_v59 = vsel %vm457_vm1, %v5964_v13, %v1481_v63  ;;  %v519_v11 = vrot.slane %v2981_v62, 7  ;;  %v381_v39 = vmul.f32 %v373_v33, %v6099_v2 }
 0x107   : > { %v1400_v23 = vadd.f32 %v1381_v34, %v1274_v56  ;;  %v1583_v12 = vsel %vm661_vm3, %v6098_v50, %v1582_v55  ;;  %v6101_v56 = vrot.slane %v6100_v30, 7  ;;  %v6103_v55 = vrot.slane %v6102_v26, 6  ;;  %v5040_v50 = vld [vmem:[%s3900_s21 + $0xb0] sm:$0x3] }
 0x108   : > { %v5036_v49 = vadd.f32 %v1482_v59, %v1299_v27  ;;  %v723_v36 = vrot.slane %v2997_v57, 6  ;;  %v520_v30 = vsel %vm408_vm0, %v5963_v4, %v519_v11  ;;  %v3013_v27 = vld [vmem:[%s5849_s2 + $0x70] sm:$0xff] }
 0x109   : > { %v443_v6 = vmul.f32 %v6101_v56, %v317_v46  ;;  %v1602_v22 = vadd.f32 %v1583_v12, %v1400_v23  ;;  %v647_v9 = vmul.f32 %v6103_v55, %v317_v46  ;;  %v545_v56 = vmul.f32 %v519_v11, %v317_v46  ;;  %v6104_v23 = vld [vmem:[#allocation42_spill] sm:$0xff] }
 0x10a   : > { %v814_v62 = vmul.f32 %v3005_v3, %v6104_v23  ;;  %v6105_v12 = vld [vmem:[#allocation38_spill] sm:$0xff]  ;;  %v5053_v57 = vmul.f32 %v520_v30, %v6099_v2  ;;  %v839_v17 = vmul.f32 %v3013_v27, %v6104_v23 }
 0x10b   : > { %v474_v34 = vrot.slane %v443_v6, 1  ;;  %1849 = vmatmul.mubr.f32.gmra.mrb[2].mxu0 %v1602_v22  ;;  %v678_v63 = vrot.slane %v647_v9, 2  ;;  %v6106_v59 = vrot.slane %v6105_v12, 1  ;;  %v724_v6 = vsel %vm612_vm2, %v5962_v43, %v723_v36  ;;  %v5061_v3 = vld [vmem:[%s5849_s2 + $0x110] sm:$0xff]  ;;  %v6107_v9 = vld [vmem:[#allocation40_spill] sm:$0xff] }
 0x10c   : > { %v749_v22 = vmul.f32 %v723_v36, %v317_v46  ;;  %v3029_v11 = vld [vmem:[%s5849_s2 + $0x130] sm:$0xff]  ;;  %v575_v55 = vrot.slane %v545_v56, 1  ;;  %v5070_v12 = vmul.f32 %v724_v6, %v6099_v2  ;;  %v5960_v36 = vrot.slane %v5053_v57, 1 }
 0x10d   : > { %v475_v33 = vsel %vm457_vm1, %v6106_v59, %v474_v34  ;;  %v6108_v34 = vrot.slane %v6107_v9, 2  ;;  %v5075_v46 = vld [vmem:[%s5849_s2 + $0x1d0] sm:$0xff]  ;;  %v5965_v2 = vrot.slane %v5061_v3, 7  ;;  %v975_v6 = vrot.slane %v3029_v11, 7 }
 0x10e   : > { %v492_v26 = vadd.f32 %v475_v33, %v357_v51  ;;  %v779_v59 = vrot.slane %v749_v22, 2  ;;  %v6109_v51 = vld [vmem:[#allocation39_spill] sm:$0xff]  ;;  %v6111_v22 = vld [vmem:[#allocation41_spill] sm:$0xff]  ;;  %v3053_v11 = vld [vmem:[%s5848_s1 + $0xb0] sm:$0xff] }
 0x10f   : > { %v679_v30 = vsel %vm661_vm3, %v6108_v34, %v678_v63  ;;  %v6110_v56 = vrot.slane %v6109_v51, 7  ;;  %v5966_v63 = vrot.slane %v5070_v12, 2  ;;  %v576_v34 = vsel %vm457_vm1, %v5960_v36, %v575_v55  ;;  %v3045_v51 = vld [vmem:[%s5849_s2 + $0x1f0] sm:$0xff] }
 0x110   : > { %v696_v9 = vadd.f32 %v679_v30, %v492_v26  ;;  %v6112_v54 = vrot.slane %v6111_v22, 6  ;;  %v5968_v26 = vrot.slane %v5075_v46, 6  ;;  %v5100_v30 = vld [vmem:[%s5849_s2 + $0x150] sm:$0xff]  ;;  %v593_v55 = vadd.f32 %v576_v34, %v381_v39 }
 0x111   : > { %v900_v33 = vmul.f32 %v6110_v56, %v5040_v50  ;;  %v6113_v22 = vrot.slane %v4593_v28, 1  ;;  %v1001_v43 = vmul.f32 %v975_v6, %v5040_v50  ;;  %v5116_v39 = vld [vmem:[%s3900_s21 + $0x110] sm:$0x3]  ;;  %v5972_v28 = vrot.slane %v5100_v30, 7 }
 0x112   : > { %v1102_v27 = vmul.f32 %v6112_v54, %v5040_v50  ;;  %v780_v54 = vsel %vm661_vm3, %v5966_v63, %v779_v59  ;;  %v822_v56 = vadd.f32 %v814_v62, %v696_v9  ;;  %v1177_v59 = vrot.slane %v3045_v51, 6  ;;  %v3077_v9 = vld [vmem:[%s5849_s2 + $0x170] sm:$0xff] }
 0x113   : > { %v930_v41 = vrot.slane %v900_v33, 1  ;;  %v976_v33 = vsel %vm408_vm0, %v5965_v2, %v975_v6  ;;  %v797_v34 = vadd.f32 %v780_v54, %v593_v55  ;;  %v1268_v62 = vmul.f32 %v3053_v11, %v4611_v37  ;;  %v1932_v54 = vld [vmem:[#allocation5 + $0x8] sm:$0xff] }
 0x114   : > { %v5112_v10 = vmul.f32 %v976_v33, %v6104_v23  ;;  %v1132_v4 = vrot.slane %v1102_v27, 2  ;;  %v1031_v33 = vrot.slane %v1001_v43, 1  ;;  %v1203_v51 = vmul.f32 %v1177_v59, %v5040_v50  ;;  %v3061_v43 = vld [vmem:[%s5849_s2 + $0xb0] sm:$0xff] }
 0x115   : > { %v931_v36 = vsel %vm457_vm1, %v6113_v22, %v930_v41  ;;  %v6114_v22 = vld [vmem:[#allocation44_spill] sm:$0xff]  ;;  %v847_v27 = vadd.f32 %v839_v17, %v797_v34  ;;  %v6116_v17 = vld [vmem:[#allocation43_spill] sm:$0xff] }
 0x116   : > { %v948_v13 = vadd.f32 %v931_v36, %v822_v56  ;;  %v5967_v41 = vrot.slane %v5112_v10, 1  ;;  %v6115_v2 = vrot.slane %v6114_v22, 2  ;;  %v1178_v36 = vsel %vm612_vm2, %v5968_v26, %v1177_v59  ;;  %v1936_v56 = vld [vmem:[#allocation5 + $0x28] sm:$0xff] }
 0x117   : > { %v5135_v55 = vmul.f32 %v1178_v36, %v6104_v23  ;;  %v1233_v59 = vrot.slane %v1203_v51, 2  ;;  %v1934_v23 = vld [vmem:[#allocation5 + $0x18] sm:$0xff]  ;;  %v3317_v51 = vpack.c.bf16 %v1936_v56, %v1932_v54  ;;  %v1939_v56 = vld [vmem:[#allocation5 + $0x40] sm:$0xff] }
 0x118   : > { %v1133_v6 = vsel %vm661_vm3, %v6115_v2, %v1132_v4  ;;  %v1032_v11 = vsel %vm457_vm1, %v5967_v41, %v1031_v33  ;;  %v6117_v4 = vrot.slane %v6116_v17, 7  ;;  %v1429_v2 = vrot.slane %v3077_v9, 7  ;;  %v1938_v36 = vld [vmem:[#allocation5 + $0x38] sm:$0xff] }
 0x119   : > { %v1150_v63 = vadd.f32 %v1133_v6, %v948_v13  ;;  %v1049_v34 = vadd.f32 %v1032_v11, %v847_v27  ;;  %v6118_v6 = vld [vmem:[#allocation45_spill] sm:$0xff]  ;;  %v5977_v26 = vrot.slane %v5135_v55, 2  ;;  %v1293_v27 = vmul.f32 %v3061_v43, %v4611_v37  ;;  %v1933_v11 = vld [vmem:[#allocation5 + $0x10] sm:$0xff]  ;;  %v1942_v43 = vld [vmem:[#allocation5 + $0x58] sm:$0xff]  ;;  %3318 = vmatprep.subr.bf16.mxu0 %v3317_v51 }
 0x11a   : > { %v1354_v13 = vmul.f32 %v6117_v4, %v5116_v39  ;;  %v6119_v33 = vrot.slane %v6118_v6, 6  ;;  %v1430_v17 = vsel %vm408_vm0, %v5972_v28, %v1429_v2  ;;  %v1455_v9 = vmul.f32 %v1429_v2, %v5116_v39  ;;  %v1931_v4 = vld [vmem:[#allocation5] sm:$0xff]  ;;  %v1937_v6 = vld [vmem:[#allocation5 + $0x30] sm:$0xff] }
 0x11b   : > { %v1276_v22 = vadd.f32 %v1268_v62, %v1150_v63  ;;  %v5153_v63 = vmul.f32 %v1430_v17, %v4611_v37  ;;  %v6121_v28 = vrot.slane %v6120_v31, 1  ;;  %v3349_v25 = vpack.c.bf16 %v1938_v36, %v1934_v23  ;;  %v1948_v23 = vld [vmem:[#allocation5 + $0x88] sm:$0xff] }
 0x11c   : > { %v1556_v41 = vmul.f32 %v6119_v33, %v5116_v39  ;;  %v1384_v21 = vrot.slane %v1354_v13, 1  ;;  %v1940_v33 = vld [vmem:[#allocation5 + $0x48] sm:$0xff]  ;;  %v1234_v13 = vsel %vm661_vm3, %v5977_v26, %v1233_v59  ;;  %v1485_v8 = vrot.slane %v1455_v9, 1  ;;  %v1943_v59 = vld [vmem:[#allocation5 + $0x60] sm:$0xff]  ;;  %v1941_v26 = vld [vmem:[#allocation5 + $0x50] sm:$0xff] }
 0x11d   : > { %v1251_v37 = vadd.f32 %v1234_v13, %v1049_v34  ;;  %3350 = vmatprep.subr.bf16.mxu1 %v3349_v25  ;;  %v3319_v31 = vpack.c.bf16 %v1935_v60, %v1931_v4  ;;  %v1952_v36 = vld [vmem:[#allocation5 + $0xa8] sm:$0xff]  ;;  %v1950_v13 = vld [vmem:[#allocation5 + $0x98] sm:$0xff]  ;;  %v3323_v51 = vpack.c.bf16 %v1943_v59, %v1939_v56  ;;  %v1951_v25 = vld [vmem:[#allocation5 + $0xa0] sm:$0xff] }
 0x11e   : > { %v1586_v62 = vrot.slane %v1556_v41, 2  ;;  %v1385_v2 = vsel %vm457_vm1, %v6121_v28, %v1384_v21  ;;  %v5978_v41 = vrot.slane %v5153_v63, 1  ;;  %v3351_v21 = vpack.c.bf16 %v1937_v6, %v1933_v11  ;;  %v1945_v28 = vld [vmem:[#allocation5 + $0x70] sm:$0xff] }
 0x11f   : > { %v1402_v17 = vadd.f32 %v1385_v2, %v1276_v22  ;;  %v1301_v9 = vadd.f32 %v1293_v27, %v1251_v37  ;;  %3320 = vmatpush1.bf16.msra.mxu0 %v3319_v31  ;;  %v1947_v2 = vld [vmem:[#allocation5 + $0x80] sm:$0xff]  ;;  %v3355_v4 = vpack.c.bf16 %v1945_v28, %v1941_v26  ;;  %v3325_v11 = vpack.c.bf16 %v1952_v36, %v1948_v23  ;;  %v1949_v27 = vld [vmem:[#allocation5 + $0x90] sm:$0xff]  ;;  %v1956_v37 = vld [vmem:[#allocation5 + $0xc8] sm:$0xff] }
 0x120   : > { %v1587_v54 = vsel %vm661_vm3, %v1577_v29, %v1586_v62  ;;  %v1486_v34 = vsel %vm457_vm1, %v5978_v41, %v1485_v8  ;;  %3352 = vmatpush1.bf16.msra.mxu1 %v3351_v21  ;;  %v3321_v29 = vpack.c.bf16 %v1944_v14, %v1940_v33  ;;  %v3353_v62 = vpack.c.bf16 %v1946_v53, %v1942_v43  ;;  %v1953_v6 = vld [vmem:[#allocation5 + $0xb0] sm:$0xff]  ;;  %v1962_v31 = vld [vmem:[#allocation5 + $0xf8] sm:$0xff]  ;;  %v1955_v33 = vld [vmem:[#allocation5 + $0xc0] sm:$0xff] }
 0x121   : > { %v1604_v22 = vadd.f32 %v1587_v54, %v1402_v17  ;;  %v5168_v60 = vadd.f32 %v1486_v34, %v1301_v9  ;;  %v3357_v8 = vpack.c.bf16 %v1954_v32, %v1950_v13  ;;  %v1960_v17 = vld [vmem:[#allocation5 + $0xe8] sm:$0xff]  ;;  %v1958_v54 = vld [vmem:[#allocation5 + $0xd8] sm:$0xff]  ;;  %v3327_v53 = vpack.c.bf16 %v1951_v25, %v1947_v2  ;;  %v1959_v43 = vld [vmem:[#allocation5 + $0xe0] sm:$0xff] }
 0x122   : > { %3322 = vmatprep.subr.bf16.mxu0 %v3321_v29  ;;  %3354 = vmatprep.subr.bf16.mxu1 %v3353_v62  ;;  %v3359_v14 = vpack.c.bf16 %v1953_v6, %v1949_v27  ;;  %v3329_v56 = vpack.c.bf16 %v1960_v17, %v1956_v37  ;;  %v3361_v26 = vpack.c.bf16 %v1962_v31, %v1958_v54  ;;  %v1957_v59 = vld [vmem:[#allocation5 + $0xd0] sm:$0xff]  ;;  %v1964_v28 = vld [vmem:[#allocation5 + $0x108] sm:$0xff]  ;;  %v1966_v36 = vld [vmem:[#allocation5 + $0x118] sm:$0xff] }
 0x123   : > { %1924 = vmatmul.mubr.f32.gmra.mrb[2].mxu1 %v1604_v22  ;;  %3324 = vmatpush1.bf16.msra.mxu0 %v3323_v51  ;;  %v1961_v21 = vld [vmem:[#allocation5 + $0xf0] sm:$0xff]  ;;  %v1968_v23 = vld [vmem:[#allocation5 + $0x128] sm:$0xff]  ;;  %v1970_v9 = vld [vmem:[#allocation5 + $0x138] sm:$0xff]  ;;  %v3331_v34 = vpack.c.bf16 %v1959_v43, %v1955_v33 }
 0x124   : > { %3356 = vmatpush1.bf16.msra.mxu1 %v3355_v4  ;;  %3326 = vmatprep.subr.bf16.mxu0 %v3325_v11  ;;  %v3363_v22 = vpack.c.bf16 %v1961_v21, %v1957_v59  ;;  %v1963_v13 = vld [vmem:[#allocation5 + $0x100] sm:$0xff]  ;;  %v3333_v29 = vpack.c.bf16 %v1968_v23, %v1964_v28  ;;  %v3365_v62 = vpack.c.bf16 %v1970_v9, %v1966_v36  ;;  %v1965_v51 = vld [vmem:[#allocation5 + $0x110] sm:$0xff]  ;;  %v1972_v25 = vld [vmem:[#allocation5 + $0x148] sm:$0xff] }
 0x125   : > { %3358 = vmatprep.subr.bf16.mxu1 %v3357_v8  ;;  %v1967_v32 = vld [vmem:[#allocation5 + $0x120] sm:$0xff]  ;;  %v1969_v2 = vld [vmem:[#allocation5 + $0x130] sm:$0xff]  ;;  %v1976_v4 = vld [vmem:[#allocation5 + $0x168] sm:$0xff] }
 0x126   : > { %v1974_v11 = vld [vmem:[#allocation5 + $0x158] sm:$0xff]  ;;  %v3335_v6 = vpack.c.bf16 %v1967_v32, %v1963_v13  ;;  %v3367_v37 = vpack.c.bf16 %v1969_v2, %v1965_v51  ;;  %v1971_v8 = vld [vmem:[#allocation5 + $0x140] sm:$0xff]  ;;  %v3337_v54 = vpack.c.bf16 %v1976_v4, %v1972_v25  ;;  %v1980_v33 = vld [vmem:[#allocation5 + $0x188] sm:$0xff] }
 0x127   : > { %3328 = vmatpush1.bf16.msra.mxu0 %v3327_v53  ;;  %v1978_v27 = vld [vmem:[#allocation5 + $0x178] sm:$0xff]  ;;  %v1975_v17 = vld [vmem:[#allocation5 + $0x160] sm:$0xff]  ;;  %v1973_v53 = vld [vmem:[#allocation5 + $0x150] sm:$0xff] }
 0x128   : > { %3360 = vmatpush1.bf16.msra.mxu1 %v3359_v14  ;;  %3330 = vmatprep.subr.bf16.mxu0 %v3329_v56  ;;  %v3369_v31 = vpack.c.bf16 %v1978_v27, %v1974_v11  ;;  %v1977_v14 = vld [vmem:[#allocation5 + $0x170] sm:$0xff]  ;;  %v1984_v43 = vld [vmem:[#allocation5 + $0x1a8] sm:$0xff]  ;;  %v1982_v56 = vld [vmem:[#allocation5 + $0x198] sm:$0xff]  ;;  %v3339_v59 = vpack.c.bf16 %v1975_v17, %v1971_v8 }
 0x129   : > { %3362 = vmatprep.subr.bf16.mxu1 %v3361_v26  ;;  %v1986_v26 = vld [vmem:[#allocation5 + $0x1b8] sm:$0xff]  ;;  %v3371_v21 = vpack.c.bf16 %v1977_v14, %v1973_v53  ;;  %v1979_v28 = vld [vmem:[#allocation5 + $0x180] sm:$0xff]  ;;  %v3341_v23 = vpack.c.bf16 %v1984_v43, %v1980_v33  ;;  %v1993_v8 = vld [vmem:[#allocation5 + $0x1f0] sm:$0xff] }
 0x12a   : > { %v3373_v36 = vpack.c.bf16 %v1986_v26, %v1982_v56  ;;  %v1983_v9 = vld [vmem:[#allocation5 + $0x1a0] sm:$0xff]  ;;  %v1990_v51 = vld [vmem:[#allocation5 + $0x1d8] sm:$0xff]  ;;  %v2310_v33 = vld [vmem:[%s5852_s5 + $0x188] sm:$0xff]  ;;  %v3722_v56 = vmov 0.0  }
 0x12b   : > { %3332 = vmatpush1.bf16.msra.mxu0 %v3331_v34  ;;  %v1981_v34 = vld [vmem:[#allocation5 + $0x190] sm:$0xff]  ;;  %v3343_v13 = vpack.c.bf16 %v1983_v9, %v1979_v28  ;;  %v1994_v25 = vld [vmem:[#allocation5 + $0x1f8] sm:$0xff]  ;;  %v1987_v11 = vld [vmem:[#allocation5 + $0x1c0] sm:$0xff]  ;;  %2059 = vmatprep.mubr.f32.mxu0 %v3722_v56 }
 0x12c   : > { %3364 = vmatpush1.bf16.msra.mxu1 %v3363_v22  ;;  %3334 = vmatprep.subr.bf16.mxu0 %v3333_v29  ;;  %v1985_v22 = vld [vmem:[#allocation5 + $0x1b0] sm:$0xff]  ;;  %v1988_v29 = vld [vmem:[#allocation5 + $0x1c8] sm:$0xff]  ;;  %v3377_v4 = vpack.c.bf16 %v1994_v25, %v1990_v51  ;;  %v1991_v27 = vld [vmem:[#allocation5 + $0x1e0] sm:$0xff] }
 0x12d   : > { %3366 = vmatprep.subr.bf16.mxu1 %v3365_v62  ;;  %v3375_v32 = vpack.c.bf16 %v1985_v22, %v1981_v34  ;;  %v1992_v62 = vld [vmem:[#allocation5 + $0x1e8] sm:$0xff]  ;;  %v2309_v53 = vld [vmem:[%s5852_s5 + $0x180] sm:$0xff]  ;;  %2136 = vmatprep.mubr.f32.mxu1 %v3722_v56 }
 0x12e   : > { %v3345_v2 = vpack.c.bf16 %v1992_v62, %v1988_v29  ;;  %v3413_v43 = vpack.c.bf16 %v2310_v33, %v2309_v53  ;;  %v3563_v26 = vld [vmem:[%s3900_s21] sm:$0xff]  ;;  %v6123_v62 = vrot.slane %v4918_v47, 2 }
 0x12f   : > { %3336 = vmatpush1.bf16.msra.mxu0 %v3335_v6  ;;  %v1989_v6 = vld [vmem:[#allocation5 + $0x1d0] sm:$0xff]  ;;  %v5198_v9 = vld [vmem:[%s5849_s2 + $0x220] sm:$0xff] }
 0x130   : > { %3368 = vmatpush1.bf16.msra.mxu1 %v3367_v37  ;;  %3338 = vmatprep.subr.bf16.mxu0 %v3337_v54  ;;  %v3347_v37 = vpack.c.bf16 %v1991_v27, %v1987_v11  ;;  %v3379_v17 = vpack.c.bf16 %v1993_v8, %v1989_v6  ;;  %v2277_v54 = vld [vmem:[%s5852_s5 + $0x80] sm:$0xff]  ;;  %v1627_v22 = vrot.slane %v5198_v9, 6  ;;  %v6125_v6 = vrot.slane %v4897_v44, 7  ;;  %v3093_v9 = vld [vmem:[%s5849_s2 + $0x230] sm:$0xff] }
 0x131   : > { %3370 = vmatprep.subr.bf16.mxu1 %v3369_v31  ;;  %v2278_v31 = vld [vmem:[%s5852_s5 + $0x88] sm:$0xff]  ;;  %v6126_v8 = vrot.slane %v4924_v48, 6  ;;  %v3055_v47 = vld [vmem:[%s5849_s2 + $0x80] sm:$0xff]  ;;  %v6127_v44 = vrot.slane %v4946_v20, 1 }
 0x132   : > { %v3381_v14 = vpack.c.bf16 %v2278_v31, %v2277_v54  ;;  %v3566_v31 = vld [vmem:[%s3900_s21 + $0xe0] sm:$0xff] }
 0x133   : > { %3340 = vmatpush1.bf16.msra.mxu0 %v3339_v59  ;;  %v535_v59 = vmul.f32 %v3563_v26, %v511_v5 }
 0x134   : > { %3372 = vmatpush1.bf16.msra.mxu1 %v3371_v21  ;;  %3342 = vmatprep.subr.bf16.mxu0 %v3341_v23  ;;  %v367_v21 = vld [vmem:[%s5849_s2] sm:$0xff]  ;;  %v739_v23 = vmul.f32 %v3563_v26, %v715_v15 }
 0x135   : > { %3374 = vmatprep.subr.bf16.mxu1 %v3373_v36  ;;  %v559_v28 = vrot.slane %v535_v59, 1  ;;  %v3087_v36 = vld [vmem:[%s5849_s2 + $0x200] sm:$0xff]  ;;  %v375_v61 = vmul.f32 %v3563_v26, %v367_v21  ;;  %v6128_v21 = vrot.slane %v4969_v42, 2 }
 0x136   : > { %v763_v5 = vrot.slane %v739_v23, 2  ;;  %v1623_v34 = vrot.slane %v3087_v36, 6 }
 0x137   : > { %3344 = vmatpush1.bf16.msra.mxu0 %v3343_v13  ;;  %v6122_v13 = vrot.slane %v4891_v40, 1  ;;  %v3565_v40 = vld [vmem:[%s3900_s21 + $0xc0] sm:$0xff] }
 0x138   : > { %3376 = vmatpush1.bf16.msra.mxu1 %v3375_v32  ;;  %3346 = vmatprep.subr.bf16.mxu0 %v3345_v2  ;;  %v3007_v32 = vld [vmem:[%s5849_s2 + $0x40] sm:$0xff]  ;;  %v1628_v29 = vsel %vm612_vm2, %v1623_v34, %v1627_v22  ;;  %v765_v51 = vsel %vm661_vm3, %v763_v5, %v6123_v62  ;;  %v1647_v54 = vmul.f32 %v3565_v40, %v1623_v34  ;;  %v6129_v5 = vrot.slane %v5001_v18, 1 }
 0x139   : > { %3378 = vmatprep.subr.bf16.mxu1 %v3377_v4  ;;  %v561_v38 = vsel %vm457_vm1, %v559_v28, %v6122_v13  ;;  %v5214_v2 = vld [vmem:[%s3900_s21 + $0x60] sm:$0xff]  ;;  %v6124_v4 = vrot.slane %v4940_v24, 7  ;;  %v5230_v53 = vmul.f32 %v3566_v31, %v1628_v29  ;;  %v1287_v59 = vmul.f32 %v3565_v40, %v3055_v47  ;;  %v2263_v31 = vld [vmem:[%s5852_s5 + $0x10] sm:$0xff] }
 0x13a   : > { %v587_v15 = vadd.f32 %v561_v38, %v375_v61  ;;  %v833_v25 = vmul.f32 %v5214_v2, %v3007_v32  ;;  %v1671_v36 = vrot.slane %v1647_v54, 2 }
 0x13b   : > { %3348 = vmatpush1.bf16.msra.mxu0 %v3347_v37  ;;  %v1445_v11 = vmul.f32 %v3565_v40, %v6124_v4  ;;  %v991_v37 = vmul.f32 %v5214_v2, %v6125_v6  ;;  %v1672_v23 = vrot.slane %v5230_v53, 2  ;;  %v2262_v40 = vld [vmem:[%s5852_s5 + $0x8] sm:$0xff]  ;;  %v2293_v4 = vld [vmem:[%s5852_s5 + $0x100] sm:$0xff]  ;;  %v6141_v53 = vrot.slane %v4838_v0, 1 }
 0x13c   : > { %3380 = vmatpush1.bf16.msra.mxu1 %v3379_v17  ;;  %3382 = vmatprep.subr.bf16.mxu0 %v3381_v14  ;;  %v791_v27 = vadd.f32 %v765_v51, %v587_v15  ;;  %v1193_v17 = vmul.f32 %v5214_v2, %v6126_v8  ;;  %v2311_v8 = vld [vmem:[%s5852_s5 + $0x190] sm:$0xff] }
 0x13d   : > { %3414 = vmatprep.subr.bf16.mxu1 %v3413_v43  ;;  %v1015_v24 = vrot.slane %v991_v37, 1  ;;  %v1469_v43 = vrot.slane %v1445_v11, 1  ;;  %v1673_v20 = vsel %vm661_vm3, %v1671_v36, %v1672_v23  ;;  %v2294_v11 = vld [vmem:[%s5852_s5 + $0x108] sm:$0xff]  ;;  %v2280_v37 = vld [vmem:[%s5852_s5 + $0x98] sm:$0xff] }
 0x13e   : > { %v841_v14 = vadd.f32 %v833_v25, %v791_v27  ;;  %v1217_v33 = vrot.slane %v1193_v17, 2  ;;  %v2261_v25 = vld [vmem:[%s5852_s5] sm:$0xff]  ;;  %v2279_v27 = vld [vmem:[%s5852_s5 + $0x90] sm:$0xff]  ;;  %v2312_v17 = vld [vmem:[%s5852_s5 + $0x198] sm:$0xff]  ;;  %v3415_v54 = vpack.c.bf16 %v2294_v11, %v2293_v4 }
 0x13f   : > { %v1017_v26 = vsel %vm457_vm1, %v1015_v24, %v6127_v44  ;;  %v1471_v34 = vsel %vm457_vm1, %v1469_v43, %v6129_v5  ;;  %v3383_v47 = vpack.c.bf16 %v2262_v40, %v2261_v25  ;;  %v2296_v43 = vld [vmem:[%s5852_s5 + $0x118] sm:$0xff]  ;;  %v2281_v44 = vld [vmem:[%s5852_s5 + $0xa0] sm:$0xff]  ;;  %v2267_v40 = vld [vmem:[%s5852_s5 + $0x30] sm:$0xff] }
 0x140   : > { %v1043_v48 = vadd.f32 %v1017_v26, %v841_v14  ;;  %v1219_v28 = vsel %vm661_vm3, %v1217_v33, %v6128_v21  ;;  %v2264_v14 = vld [vmem:[%s5852_s5 + $0x18] sm:$0xff]  ;;  %v2295_v33 = vld [vmem:[%s5852_s5 + $0x110] sm:$0xff]  ;;  %v3385_v26 = vpack.c.bf16 %v2280_v37, %v2279_v27  ;;  %v2313_v21 = vld [vmem:[%s5852_s5 + $0x1a0] sm:$0xff] }
 0x141   : > { %v3387_v36 = vpack.c.bf16 %v2264_v14, %v2263_v31  ;;  %v2265_v5 = vld [vmem:[%s5852_s5 + $0x20] sm:$0xff]  ;;  %v2268_v4 = vld [vmem:[%s5852_s5 + $0x38] sm:$0xff] }
 0x142   : > { %v1245_v61 = vadd.f32 %v1219_v28, %v1043_v48  ;;  %v2282_v48 = vld [vmem:[%s5852_s5 + $0xa8] sm:$0xff]  ;;  %v2300_v37 = vld [vmem:[%s5852_s5 + $0x138] sm:$0xff]  ;;  %v3395_v31 = vpack.c.bf16 %v2268_v4, %v2267_v40  ;;  %v2273_v4 = vld [vmem:[%s5852_s5 + $0x60] sm:$0xff] }
 0x143   : > { %v2314_v28 = vld [vmem:[%s5852_s5 + $0x1a8] sm:$0xff] }
 0x144   : > { %v1295_v13 = vadd.f32 %v1287_v59, %v1245_v61  ;;  %v3417_v59 = vpack.c.bf16 %v2312_v17, %v2311_v8  ;;  %v3419_v61 = vpack.c.bf16 %v2296_v43, %v2295_v33  ;;  %v2285_v8 = vld [vmem:[%s5852_s5 + $0xc0] sm:$0xff]  ;;  %v2286_v17 = vld [vmem:[%s5852_s5 + $0xc8] sm:$0xff] }
 0x145   : > { %v2270_v33 = vld [vmem:[%s5852_s5 + $0x48] sm:$0xff]  ;;  %v3397_v43 = vpack.c.bf16 %v2286_v17, %v2285_v8  ;;  %v2291_v17 = vld [vmem:[%s5852_s5 + $0xf0] sm:$0xff] }
 0x146   : > { %v1497_v38 = vadd.f32 %v1471_v34, %v1295_v13  ;;  %v2266_v34 = vld [vmem:[%s5852_s5 + $0x28] sm:$0xff]  ;;  %v3389_v13 = vpack.c.bf16 %v2282_v48, %v2281_v44  ;;  %v2287_v48 = vld [vmem:[%s5852_s5 + $0xd0] sm:$0xff] }
 0x147   : > { %v3391_v25 = vpack.c.bf16 %v2266_v34, %v2265_v5  ;;  %v2271_v34 = vld [vmem:[%s5852_s5 + $0x50] sm:$0xff]  ;;  %v2306_v8 = vld [vmem:[%s5852_s5 + $0x168] sm:$0xff] }
 0x148   : > { %v5245_v15 = vadd.f32 %v1673_v20, %v1497_v38  ;;  %v3421_v20 = vpack.c.bf16 %v2314_v28, %v2313_v21  ;;  %v2297_v38 = vld [vmem:[%s5852_s5 + $0x120] sm:$0xff]  ;;  %v2288_v21 = vld [vmem:[%s5852_s5 + $0xd8] sm:$0xff]  ;;  %v2319_v28 = vld [vmem:[%s5852_s5 + $0x1d0] sm:$0xff] }
 0x190   : > { %v3139_v32 = vpop.f32.mrb[0].mxu0 }
 0x191   : > { %v3140_v42 = vpop.f32.mrb[1].mxu0 }
 0x192   : > { %v3141_v29 = vadd.f32 %v3140_v42, %v3139_v32  ;;  %v2298_v32 = vld [vmem:[%s5852_s5 + $0x128] sm:$0xff]  ;;  %v2283_v42 = vld [vmem:[%s5852_s5 + $0xb0] sm:$0xff] }
 0x1a1   : > { %v3177_v62 = vpop.f32.mrb[0].mxu1 }
 0x1a2   : > { %v3178_v51 = vpop.f32.mrb[1].mxu1 }
 0x1a3   : > { %v3179_v18 = vadd.f32 %v3178_v51, %v3177_v62  ;;  %v2315_v62 = vld [vmem:[%s5852_s5 + $0x1b0] sm:$0xff]  ;;  %v2316_v51 = vld [vmem:[%s5852_s5 + $0x1b8] sm:$0xff] }
 0x1a4   : > { %v3425_v27 = vpack.c.bf16 %v2316_v51, %v2315_v62  ;;  %v2290_v62 = vld [vmem:[%s5852_s5 + $0xe8] sm:$0xff]  ;;  %v2321_v51 = vld [vmem:[%s5852_s5 + $0x1e0] sm:$0xff] }
 0x1a5   : > { %v1921_v6 = vadd.f32 %v3179_v18, %v3141_v29  ;;  %v2284_v29 = vld [vmem:[%s5852_s5 + $0xb8] sm:$0xff]  ;;  %v3423_v18 = vpack.c.bf16 %v2298_v32, %v2297_v38  ;;  %v2303_v32 = vld [vmem:[%s5852_s5 + $0x150] sm:$0xff] }
 0x1a6   : > { %v3393_v11 = vpack.c.bf16 %v2284_v29, %v2283_v42  ;;  %v2304_v42 = vld [vmem:[%s5852_s5 + $0x158] sm:$0xff]  ;;  %v2289_v29 = vld [vmem:[%s5852_s5 + $0xe0] sm:$0xff] }
 0x1a7   : > { %v1929_v24 = vmax.f32 %v1921_v6, 0.0  ;;  %v2299_v6 = vld [vmem:[%s5852_s5 + $0x130] sm:$0xff]  ;;  %v3435_v40 = vpack.c.bf16 %v2304_v42, %v2303_v32  ;;  %v5446_v42 = vld [vmem:[%s3900_s21 + $0x98] sm:$0xff] }
 0x1a8   : > { %v3427_v14 = vpack.c.bf16 %v2300_v37, %v2299_v6  ;;  %v2305_v37 = vld [vmem:[%s5852_s5 + $0x160] sm:$0xff] }
 0x1a9   : > { %2060 = vmatmul.mubr.f32.vlgmr.msra.gmra.mrb[4].mxu0 %v1929_v24  ;;  %2137 = vmatmul.mubr.f32.vlgmr.msra.gmra.mrb[4].mxu1 %v1929_v24  ;;  %v2269_v24 = vld [vmem:[%s5852_s5 + $0x40] sm:$0xff] }
 0x1aa   : > { %3384 = vmatpush3.bf16.msra.mxu0 %v3383_v47  ;;  %3416 = vmatpush3.bf16.msra.mxu1 %v3415_v54  ;;  %v2317_v47 = vld [vmem:[%s5852_s5 + $0x1c0] sm:$0xff]  ;;  %v2318_v54 = vld [vmem:[%s5852_s5 + $0x1c8] sm:$0xff] }
 0x1ab   : > { %2065 = vmatprep.mubr.f32.mxu0 %v3722_v56  ;;  %2142 = vmatprep.mubr.f32.mxu1 %v3722_v56  ;;  %v3429_v44 = vpack.c.bf16 %v2318_v54, %v2317_v47  ;;  %v2292_v47 = vld [vmem:[%s5852_s5 + $0xf8] sm:$0xff]  ;;  %v2323_v54 = vld [vmem:[%s5852_s5 + $0x1f0] sm:$0xff] }
 0x1ac   : > { %3386 = vmatprep.subr.bf16.mxu0 %v3385_v26  ;;  %3418 = vmatprep.subr.bf16.mxu1 %v3417_v59  ;;  %v2301_v26 = vld [vmem:[%s5852_s5 + $0x140] sm:$0xff]  ;;  %v2302_v59 = vld [vmem:[%s5852_s5 + $0x148] sm:$0xff] }
 0x1ad   : > { %v3431_v5 = vpack.c.bf16 %v2302_v59, %v2301_v26  ;;  %v2276_v26 = vld [vmem:[%s5852_s5 + $0x78] sm:$0xff]  ;;  %v2307_v59 = vld [vmem:[%s5852_s5 + $0x170] sm:$0xff] }
 0x1ae   : > { %3388 = vmatpush3.bf16.msra.mxu0 %v3387_v36  ;;  %3420 = vmatpush3.bf16.msra.mxu1 %v3419_v61  ;;  %v2320_v36 = vld [vmem:[%s5852_s5 + $0x1d8] sm:$0xff]  ;;  %v3399_v61 = vpack.c.bf16 %v2270_v33, %v2269_v24  ;;  %v3439_v24 = vpack.c.bf16 %v2306_v8, %v2305_v37  ;;  %v2275_v33 = vld [vmem:[%s5852_s5 + $0x70] sm:$0xff]  ;;  %v2213_v37 = vrot.slane %v4885_v19, 1 }
 0x1af   : > { %3390 = vmatprep.subr.bf16.mxu0 %v3389_v13  ;;  %3422 = vmatprep.subr.bf16.mxu1 %v3421_v20  ;;  %v2272_v13 = vld [vmem:[%s5852_s5 + $0x58] sm:$0xff]  ;;  %v3401_v20 = vpack.c.bf16 %v2288_v21, %v2287_v48  ;;  %v3433_v38 = vpack.c.bf16 %v2320_v36, %v2319_v28  ;;  %v3411_v21 = vpack.c.bf16 %v2276_v26, %v2275_v33  ;;  %v5430_v36 = vld [vmem:[%s3900_s21 + $0x68] sm:$0xff]  ;;  %v5464_v8 = vld [vmem:[%s3900_s21 + $0x70] sm:$0xff] }
 0x1b0   : > { %v2308_v48 = vld [vmem:[%s5852_s5 + $0x178] sm:$0xff] }
 0x1b1   : > { %v3443_v28 = vpack.c.bf16 %v2308_v48, %v2307_v59 }
 0x1b2   : > { %3392 = vmatpush3.bf16.msra.mxu0 %v3391_v25  ;;  %3424 = vmatpush3.bf16.msra.mxu1 %v3423_v18  ;;  %v2322_v25 = vld [vmem:[%s5852_s5 + $0x1e8] sm:$0xff]  ;;  %v3403_v18 = vpack.c.bf16 %v2272_v13, %v2271_v34 }
 0x1b3   : > { %3394 = vmatprep.subr.bf16.mxu0 %v3393_v11  ;;  %3426 = vmatprep.subr.bf16.mxu1 %v3425_v27  ;;  %v2274_v11 = vld [vmem:[%s5852_s5 + $0x68] sm:$0xff]  ;;  %v3405_v27 = vpack.c.bf16 %v2290_v62, %v2289_v29  ;;  %v3437_v6 = vpack.c.bf16 %v2322_v25, %v2321_v51  ;;  %v2211_v29 = vrot.slane %v5446_v42, 1  ;;  %v5450_v62 = vld [vmem:[%s3900_s21 + $0xb8] sm:$0x3] }
 0x1b4   : > { %v5438_v13 = vld [vmem:[%s3900_s21 + $0xa8] sm:$0x3]  ;;  %v2219_v51 = vrot.slane %v5450_v62, 1 }
 0x1b6   : > { %3396 = vmatpush3.bf16.msra.mxu0 %v3395_v31  ;;  %3428 = vmatpush3.bf16.msra.mxu1 %v3427_v14  ;;  %v2324_v31 = vld [vmem:[%s5852_s5 + $0x1f8] sm:$0xff]  ;;  %v3407_v14 = vpack.c.bf16 %v2274_v11, %v2273_v4  ;;  %v2220_v4 = vsel %vm457_vm1, %v2211_v29, %v2219_v51  ;;  %v2201_v11 = vrot.slane %v5214_v2, 1 }
 0x1b7   : > { %3398 = vmatprep.subr.bf16.mxu0 %v3397_v43  ;;  %3430 = vmatprep.subr.bf16.mxu1 %v3429_v44  ;;  %v3409_v43 = vpack.c.bf16 %v2292_v47, %v2291_v17  ;;  %v3441_v44 = vpack.c.bf16 %v2324_v31, %v2323_v54  ;;  %v2207_v17 = vrot.slane %v5464_v8, 1  ;;  %v5468_v47 = vld [vmem:[%s3900_s21 + $0x90] sm:$0xff]  ;;  %v2217_v31 = vrot.slane %v5040_v50, 1 }
 0x1b8   : > { %v2208_v54 = vrot.slane %v5468_v47, 1 }
 0x1ba   : > { %3400 = vmatpush3.bf16.msra.mxu0 %v3399_v61  ;;  %3432 = vmatpush3.bf16.msra.mxu1 %v3431_v5  ;;  %v2204_v61 = vrot.slane %v5430_v36, 1  ;;  %v5434_v5 = vld [vmem:[%s3900_s21 + $0x88] sm:$0xff]  ;;  %v2218_v19 = vsel %vm457_vm1, %v2208_v54, %v2217_v31 }
 0x1bb   : > { %3402 = vmatprep.subr.bf16.mxu0 %v3401_v20  ;;  %3434 = vmatprep.subr.bf16.mxu1 %v3433_v38  ;;  %v2205_v34 = vrot.slane %v5434_v5, 1  ;;  %v2215_v20 = vrot.slane %v5438_v13, 1  ;;  %v5442_v38 = vld [vmem:[%s3900_s21 + $0x78] sm:$0xff] }
 0x1bc   : > { %v2210_v32 = vrot.slane %v5442_v38, 1 }
 0x1bd   : > { %v2206_v25 = vsel %vm457_vm1, %v2204_v61, %v2205_v34 }
 0x1be   : > { %3404 = vmatpush3.bf16.msra.mxu0 %v3403_v18  ;;  %3436 = vmatpush3.bf16.msra.mxu1 %v3435_v40  ;;  %v2216_v18 = vsel %vm457_vm1, %v2205_v34, %v2215_v20  ;;  %v2212_v40 = vsel %vm457_vm1, %v2210_v32, %v2211_v29 }
 0x1bf   : > { %3406 = vmatprep.subr.bf16.mxu0 %v3405_v27  ;;  %3438 = vmatprep.subr.bf16.mxu1 %v3437_v6  ;;  %v5459_v27 = vld [vmem:[%s3900_s21 + $0x80] sm:$0xff] }
 0x1c0   : > { %v2202_v6 = vrot.slane %v5459_v27, 1 }
 0x1c2   : > { %3408 = vmatpush3.bf16.msra.mxu0 %v3407_v14  ;;  %3440 = vmatpush3.bf16.msra.mxu1 %v3439_v24  ;;  %v2236_v14 = vadd.f32 %v2216_v18, %v2206_v25  ;;  %v2250_v24 = vadd.f32 %v2220_v4, %v2212_v40  ;;  %v2203_v33 = vsel %vm457_vm1, %v2201_v11, %v2202_v6 }
 0x1c3   : > { %3410 = vmatprep.subr.bf16.mxu0 %v3409_v43  ;;  %3442 = vmatprep.subr.bf16.mxu1 %v3441_v44  ;;  %v2214_v43 = vsel %vm457_vm1, %v2202_v6, %v2213_v37  ;;  %v2209_v44 = vsel %vm457_vm1, %v2207_v17, %v2208_v54 }
 0x1c4   : > { %v2229_v59 = vadd.f32 %v2214_v43, %v2203_v33  ;;  %v2243_v48 = vadd.f32 %v2218_v19, %v2209_v44  ;;  %v2251_v61 = vrot.slane %v2250_v24, 4 }
 0x1c6   : > { %3412 = vmatpush3.bf16.msra.mxu0 %v3411_v21  ;;  %3444 = vmatpush3.bf16.msra.mxu1 %v3443_v28  ;;  %v2237_v28 = vrot.slane %v2236_v14, 4  ;;  %v2230_v20 = vrot.slane %v2229_v59, 4  ;;  %v2244_v32 = vrot.slane %v2243_v48, 4  ;;  %v2252_v29 = vadd.f32 %v2251_v61, %v2250_v24 }
 0x1c8   : > { %v2238_v50 = vadd.f32 %v2237_v28, %v2236_v14  ;;  %v2231_v51 = vadd.f32 %v2230_v20, %v2229_v59  ;;  %v2245_v25 = vadd.f32 %v2244_v32, %v2243_v48  ;;  %v2253_v40 = vrot.slane %v2252_v29, 2 }
 0x1ca   : > { %v2239_v18 = vrot.slane %v2238_v50, 2  ;;  %v2232_v4 = vrot.slane %v2231_v51, 2  ;;  %v2246_v11 = vrot.slane %v2245_v25, 2  ;;  %v2254_v37 = vadd.f32 %v2253_v40, %v2252_v29  ;;  %v3090_v29 = vld [vmem:[%s5849_s2 + $0x218] sm:$0xff] }
 0x1cc   : > { %v2240_v6 = vadd.f32 %v2239_v18, %v2238_v50  ;;  %v2233_v17 = vadd.f32 %v2232_v4, %v2231_v51  ;;  %v2247_v54 = vadd.f32 %v2246_v11, %v2245_v25  ;;  %v2255_v33 = vrot.slane %v2254_v37, 1  ;;  %v5492_v51 = vld [vmem:[%s5849_s2 + $0x238] sm:$0xff]  ;;  %v3576_v11 = vld [vmem:[%s3900_s21 + $0x10] sm:$0xff] }
 0x1cd   : > { %v1626_v18 = vrot.slane %v3090_v29, 6  ;;  %v1633_v40 = vrot.slane %v5492_v51, 6 }
 0x1ce   : > { %v2241_v31 = vrot.slane %v2240_v6, 1  ;;  %v2234_v44 = vrot.slane %v2233_v17, 1  ;;  %v2248_v19 = vrot.slane %v2247_v54, 1  ;;  %v2256_v41 = vadd.f32 %v2255_v33, %v2254_v37  ;;  %v3577_v33 = vld [vmem:[%s3900_s21 + $0x100] sm:$0x3] }
 0x1d0   : > { %v2235_v59 = vadd.f32 %v2234_v44, %v2233_v17  ;;  %v2249_v48 = vadd.f32 %v2248_v19, %v2247_v54  ;;  %v2260_v61 = vmul.f32 0.00390625, %v2256_v41  ;;  %v3088_v41 = vld [vmem:[%s5849_s2 + $0x208] sm:$0xff]  ;;  %v6131_v17 = vrot.slane %v4998_v52, 6  ;;  %v3089_v52 = vld [vmem:[%s5849_s2 + $0x210] sm:$0xff] }
 0x1d1   : > { %v3578_v44 = vld [vmem:[%s3900_s21 + $0xc8] sm:$0xff]  ;;  %v6132_v19 = vrot.slane %v4680_v7, 7  ;;  %v6133_v7 = vrot.slane %v4752_v35, 7  ;;  %v6134_v35 = vrot.slane %v5100_v30, 7 }
 0x1d2   : > { %v2257_v32 = vmul.f32 0.00390625, %v2235_v59  ;;  %v2259_v50 = vmul.f32 0.00390625, %v2249_v48  ;;  %v741_v54 = vmul.f32 %v3576_v11, %v6131_v17 }
 0x1de   : > { %v3142_v26 = vpop.f32.mrb[2].mxu0 }
 0x1df   : > { %v3143_v21 = vpop.f32.mrb[3].mxu0 }
 0x1e0   : > { %v3144_v34 = vadd.f32 %v3143_v21, %v3142_v26  ;;  %v2242_v21 = vadd.f32 %v2241_v31, %v2240_v6  ;;  %v6130_v6 = vrot.slane %v4986_v1, 7  ;;  %v1634_v31 = vsel %vm612_vm2, %v1626_v18, %v1633_v40  ;;  %v369_v1 = vld [vmem:[%s5849_s2 + $0x10] sm:$0xff] }
 0x1e2   : > { %v2258_v28 = vmul.f32 0.00390625, %v2242_v21  ;;  %v537_v37 = vmul.f32 %v3576_v11, %v6130_v6 }
 0x1f6   : > { %v3180_v43 = vpop.f32.mrb[2].mxu1 }
 0x1f7   : > { %v3181_v26 = vpop.f32.mrb[3].mxu1 }
 0x1f8   : > { %v3182_v14 = vadd.f32 %v3181_v26, %v3180_v43  ;;  %v1655_v43 = vmul.f32 %v3577_v33, %v1627_v22  ;;  %v1446_v26 = vmul.f32 %v3578_v44, %v6132_v19  ;;  %v3580_v22 = vld [vmem:[%s3900_s21 + $0xd8] sm:$0xff]  ;;  %v3582_v19 = vld [vmem:[%s3900_s21 + $0xd0] sm:$0xff] }
 0x1f9   : > { %v1448_v59 = vmul.f32 %v3580_v22, %v6133_v7  ;;  %v1650_v48 = vmul.f32 %v3580_v22, %v1626_v18 }
 0x1fa   : > { %v1926_v24 = vadd.f32 %v3182_v14, %v3144_v34  ;;  %v5484_v34 = vld [vmem:[%s5849_s2 + $0x228] sm:$0xff]  ;;  %v1683_v29 = vrot.slane %v1655_v43, 2  ;;  %v3009_v43 = vld [vmem:[%s5849_s2 + $0x50] sm:$0xff] }
 0x1fb   : > { %v1629_v25 = vrot.slane %v5484_v34, 6  ;;  %v3579_v14 = vld [vmem:[%s3900_s21 + $0xe8] sm:$0xff]  ;;  %v1478_v33 = vrot.slane %v1448_v59, 1 }
 0x1fc   : > { %v1930_v20 = vmax.f32 %v1926_v24, 0.0 }
 0x1fe   : > { %2066 = vmatmul.mubr.f32.gmra.mrb[6].mxu0 %v1930_v20  ;;  %2143 = vmatmul.mubr.f32.gmra.mrb[6].mxu1 %v1930_v20  ;;  %v565_v20 = vrot.slane %v537_v37, 1 }
 0x1ff   : > { %2389 = vmatprep.mubr.f32.mxu0 %v2258_v28  ;;  %2459 = vmatprep.mubr.f32.mxu1 %v2260_v61  ;;  %v3581_v28 = vld [vmem:[%s3900_s21 + $0xf8] sm:$0xff] }
 0x200   : > { %v5529_v61 = vmul.f32 %v3581_v28, %v1634_v31  ;;  %v6135_v31 = vrot.slane %v5053_v57, 1  ;;  %v1684_v57 = vsel %vm661_vm3, %v1672_v23, %v1683_v29  ;;  %v6140_v28 = vld [vmem:[#allocation12_spill] sm:$0xff]  ;;  %v1480_v23 = vsel %vm457_vm1, %v1478_v33, %v6141_v53 }
 0x201   : > { %v1703_v0 = vadd.f32 %v1684_v57, %v5036_v49  ;;  %v3584_v57 = vld [vmem:[%s3900_s21 + $0x108] sm:$0x3] }
 0x202   : > { %2390 = vmatmul.mubr.f32.vlgmr.msra.gmra.mrb[8].mxu0 %v2257_v32  ;;  %2460 = vmatmul.mubr.f32.vlgmr.msra.gmra.mrb[8].mxu1 %v2259_v50  ;;  %v769_v32 = vrot.slane %v741_v54, 2  ;;  %v377_v50 = vmul.f32 %v3576_v11, %v369_v1  ;;  %v1681_v18 = vrot.slane %v5529_v61, 2  ;;  %v567_v37 = vsel %vm457_vm1, %v565_v20, %v6135_v31  ;;  %v3057_v20 = vld [vmem:[%s5849_s2 + $0x90] sm:$0xff] }
 0x203   : > { %2549 = vmatprep.mubr.f32.mxu0 %v3722_v56  ;;  %2620 = vmatprep.mubr.f32.mxu1 %v3722_v56  ;;  %v1624_v56 = vrot.slane %v3088_v41, 6  ;;  %v1625_v41 = vrot.slane %v3089_v52, 6  ;;  %v6136_v11 = vrot.slane %v5070_v12, 2 }
 0x204   : > { %v589_v52 = vadd.f32 %v567_v37, %v377_v50  ;;  %v6144_v37 = vrot.slane %v5135_v55, 2 }
 0x205   : > { %v1630_v4 = vsel %vm612_vm2, %v1624_v56, %v1629_v25  ;;  %v1648_v21 = vmul.f32 %v3578_v44, %v1624_v56  ;;  %v1631_v56 = vrot.slane %v3093_v9, 6  ;;  %v1680_v44 = vrot.slane %v1650_v48, 2 }
 0x206   : > { %v5520_v24 = vmul.f32 %v3579_v14, %v1630_v4  ;;  %v1472_v4 = vrot.slane %v1446_v26, 1  ;;  %v1447_v14 = vmul.f32 %v3582_v19, %v6134_v35  ;;  %v771_v54 = vsel %vm661_vm3, %v769_v32, %v6136_v11  ;;  %v3583_v32 = vld [vmem:[%s3900_s21 + $0xf0] sm:$0xff] }
 0x207   : > { %v1674_v6 = vrot.slane %v1648_v21, 2  ;;  %v6137_v26 = vrot.slane %v5061_v3, 7  ;;  %v6138_v21 = vrot.slane %v5075_v46, 6  ;;  %v1632_v12 = vsel %vm612_vm2, %v1625_v41, %v1631_v56 }
 0x208   : > { %v1675_v17 = vrot.slane %v5520_v24, 2  ;;  %v835_v24 = vmul.f32 %v5464_v8, %v3009_v43  ;;  %v6139_v3 = vrot.slane %v4736_v58, 1  ;;  %v1649_v46 = vmul.f32 %v3582_v19, %v1625_v41 }
 0x209   : > { %v993_v30 = vmul.f32 %v5464_v8, %v6137_v26  ;;  %v1195_v1 = vmul.f32 %v5464_v8, %v6138_v21  ;;  %v793_v48 = vadd.f32 %v771_v54, %v589_v52  ;;  %v1653_v50 = vmul.f32 %v3583_v32, %v1632_v12 }
 0x20a   : > { %v1474_v7 = vsel %vm457_vm1, %v1472_v4, %v6139_v3  ;;  %v1676_v59 = vsel %vm661_vm3, %v1674_v6, %v1675_v17  ;;  %v6142_v58 = vrot.slane %v5112_v10, 1  ;;  %v6143_v4 = vld [vmem:[#allocation20_spill] sm:$0xff]  ;;  %v1682_v41 = vsel %vm661_vm3, %v1680_v44, %v1681_v18 }
 0x20b   : > { %v1021_v9 = vrot.slane %v993_v30, 1  ;;  %v1223_v22 = vrot.slane %v1195_v1, 2  ;;  %v1498_v61 = vadd.f32 %v1474_v7, %v6140_v28  ;;  %v1500_v6 = vadd.f32 %v1480_v23, %v6143_v4 }
 0x20c   : > { %v843_v35 = vadd.f32 %v835_v24, %v793_v48  ;;  %v1475_v33 = vrot.slane %v1447_v14, 1  ;;  %v1289_v43 = vmul.f32 %v3582_v19, %v3057_v20  ;;  %v1678_v26 = vrot.slane %v1653_v50, 2  ;;  %v3585_v19 = vld [vmem:[%s3900_s21 + $0x118] sm:$0x3] }
 0x20d   : > { %v1023_v29 = vsel %vm457_vm1, %v1021_v9, %v6142_v58  ;;  %v1700_v31 = vadd.f32 %v1676_v59, %v1498_v61  ;;  %v1225_v11 = vsel %vm661_vm3, %v1223_v22, %v6144_v37  ;;  %v1702_v54 = vadd.f32 %v1682_v41, %v1500_v6 }
 0x20e   : > { %v1045_v10 = vadd.f32 %v1023_v29, %v843_v35  ;;  %v1677_v30 = vrot.slane %v1649_v46, 2  ;;  %v6145_v1 = vrot.slane %v5153_v63, 1  ;;  %v1657_v55 = vmul.f32 %v1631_v56, %v5116_v39 }
 0x20f   : > { %v1656_v24 = vmul.f32 %v3584_v57, %v1629_v25  ;;  %v1658_v9 = vmul.f32 %v3585_v19, %v1633_v40  ;;  %v1707_v48 = vmax.f32 %v5245_v15, 0.0  ;;  %v1711_v39 = vmax.f32 %v1703_v0, 0.0 }
 0x210   : > { %v1247_v21 = vadd.f32 %v1225_v11, %v1045_v10  ;;  %v1477_v44 = vsel %vm457_vm1, %v1475_v33, %v6145_v1  ;;  %v1679_v52 = vsel %vm661_vm3, %v1677_v30, %v1678_v26  ;;  %v1687_v22 = vrot.slane %v1657_v55, 2 }
 0x211   : > { %v1685_v3 = vrot.slane %v1656_v24, 2  ;;  %v1689_v63 = vrot.slane %v1658_v9, 2  ;;  %v1708_v25 = vmax.f32 %v1700_v31, 0.0  ;;  %v1710_v61 = vmax.f32 %v1702_v54, 0.0 }
 0x212   : > { %v1297_v12 = vadd.f32 %v1289_v43, %v1247_v21  ;;  %v1688_v7 = vsel %vm661_vm3, %v1678_v26, %v1687_v22  ;;  %v5595_v53 = vrot.slane %v1707_v48, 7  ;;  %v5597_v23 = vrot.slane %v1711_v39, 7 }
 0x213   : > { %v1686_v59 = vsel %vm661_vm3, %v1675_v17, %v1685_v3  ;;  %v1690_v46 = vsel %vm661_vm3, %v1681_v18, %v1689_v63  ;;  %v1705_v56 = vadd.f32 %v1688_v7, %v5168_v60  ;;  %v5601_v15 = vrot.slane %v1708_v25, 7  ;;  %v2466_v60 = vld [vmem:[%s5853_s6] sm:$0xff] }
 0x214   : > { %v1499_v49 = vadd.f32 %v1477_v44, %v1297_v12  ;;  %v1704_v51 = vadd.f32 %v1686_v59, %v4776_v45  ;;  %v1706_v40 = vadd.f32 %v1690_v46, %v4873_v16  ;;  %v2467_v45 = vld [vmem:[%s5853_s6 + $0x8] sm:$0xff]  ;;  %v5614_v16 = vsel %vm408_vm0, %v5595_v53, %v5597_v23 }
 0x215   : > { %v1713_v28 = vmax.f32 %v1705_v56, 0.0  ;;  %v2470_v58 = vcombine.high %v2466_v60, %v2466_v60  ;;  %v2471_v29 = vcombine.high %v2467_v45, %v2467_v45  ;;  %v5618_v4 = vrot.slane %v1710_v61, 7 }
 0x216   : > { %v1701_v14 = vadd.f32 %v1679_v52, %v1499_v49  ;;  %v1712_v17 = vmax.f32 %v1704_v51, 0.0  ;;  %v1714_v20 = vmax.f32 %v1706_v40, 0.0 }
 0x217   : > { %v5603_v32 = vrot.slane %v1713_v28, 7  ;;  %3095 = vmatprep.subr.msk.mxu0 %vm2476_vm4, %v2470_v58  ;;  %3098 = vmatprep.subr.msk.mxu1 %vm2476_vm4, %v2471_v29 }
 0x218   : > { %v1709_v34 = vmax.f32 %v1701_v14, 0.0  ;;  %v5616_v50 = vrot.slane %v1712_v17, 7  ;;  %v5625_v41 = vrot.slane %v1714_v20, 7  ;;  %3096 = vmatpush1.msk.msra.mxu0 %vm2476_vm4, %v2466_v60  ;;  %3099 = vmatpush1.msk.msra.mxu1 %vm2476_vm4, %v2467_v45 }
 0x21a   : > { %v5599_v18 = vrot.slane %v1709_v34, 7  ;;  %v5630_v35 = vsel %vm408_vm0, %v5601_v15, %v5616_v50  ;;  %v5635_v31 = vsel %vm408_vm0, %v5618_v4, %v5625_v41 }
 0x21c   : > { %v5623_v6 = vsel %vm408_vm0, %v5599_v18, %v5603_v32 }
 0x27c   : > { %v2061_v0 = vpop.f32.mrb[4].mxu0  ;;  %v2138_v33 = vpop.f32.mrb[4].mxu1 }
 0x27d   : > { %v2149_v37 = vsub.f32 0.0, %v2061_v0  ;;  %v2151_v11 = vsub.f32 0.0, %v2138_v33  ;;  %v2063_v54 = vpop.f32.mrb[5].mxu0  ;;  %v2140_v43 = vpop.f32.mrb[5].mxu1 }
 0x27e   : > { %v2150_v10 = vsub.f32 0.0, %v2063_v54  ;;  %v2152_v26 = vsub.f32 0.0, %v2140_v43 }
 0x27f   : > { %v2157_v30 = vmul.f32 1.442695, %v2149_v37  ;;  %v2161_v21 = vmul.f32 1.442695, %v2151_v11 }
 0x280   : > { %v2159_v1 = vmul.f32 1.442695, %v2150_v10  ;;  %v2163_v44 = vmul.f32 1.442695, %v2152_v26 }
 0x281   : > { %3515 = vpow2.f32 %v2157_v30 }
 0x282   : > { %3517 = vpow2.f32 %v2161_v21 }
 0x283   : > { %3519 = vpow2.f32 %v2159_v1 }
 0x284   : > { %3521 = vpow2.f32 %v2163_v44 }
 0x28b   : > { %v3516_v12 = vpop.eup %3515 }
 0x28c   : > { %v3518_v52 = vpop.eup %3517  ;;  %v2173_v49 = vadd.f32 1.0, %v3516_v12 }
 0x28d   : > { %v3520_v14 = vpop.eup %3519  ;;  %v2175_v55 = vadd.f32 1.0, %v3518_v52 }
 0x28e   : > { %v3522_v57 = vpop.eup %3521  ;;  %3523 = vrcp.f32 %v2173_v49  ;;  %v2174_v24 = vadd.f32 1.0, %v3520_v14 }
 0x28f   : > { %3525 = vrcp.f32 %v2175_v55  ;;  %v2176_v19 = vadd.f32 1.0, %v3522_v57 }
 0x290   : > { %3527 = vrcp.f32 %v2174_v24 }
 0x291   : > { %3529 = vrcp.f32 %v2176_v19 }
 0x298   : > { %v5637_v9 = vpop.eup %3523 }
 0x299   : > { %v5639_v22 = vpop.eup %3525  ;;  %v2655_v3 = vrot.slane %v5637_v9, 7 }
 0x29a   : > { %v5642_v63 = vpop.eup %3527  ;;  %v2657_v7 = vrot.slane %v5639_v22, 7 }
 0x29b   : > { %v5645_v59 = vpop.eup %3529  ;;  %v5648_v46 = vmul.f32 %v5214_v2, %v2655_v3  ;;  %v2656_v48 = vrot.slane %v5642_v63, 7 }
 0x29c   : > { %v5654_v39 = vmul.f32 %v5464_v8, %v2657_v7  ;;  %v2658_v56 = vrot.slane %v5645_v59, 7 }
 0x29d   : > { %v2723_v34 = vsub.f32 %v5648_v46, %v5595_v53  ;;  %v5662_v25 = vmul.f32 %v5430_v36, %v2656_v48 }
 0x29e   : > { %v2725_v2 = vsub.f32 %v5654_v39, %v5599_v18  ;;  %v5669_v28 = vmul.f32 %v5442_v38, %v2658_v56 }
 0x29f   : > { %v2724_v8 = vsub.f32 %v5662_v25, %v5601_v15 }
 0x2a0   : > { %v2726_v51 = vsub.f32 %v5669_v28, %v5618_v4 }
 0x2d1   : > { %v2067_v40 = vpop.f32.mrb[6].mxu0  ;;  %v2144_v61 = vpop.f32.mrb[6].mxu1 }
 0x2d2   : > { %v2153_v17 = vsub.f32 0.0, %v2067_v40  ;;  %v2155_v20 = vsub.f32 0.0, %v2144_v61  ;;  %v2069_v36 = vpop.f32.mrb[7].mxu0  ;;  %v2146_v60 = vpop.f32.mrb[7].mxu1 }
 0x2d3   : > { %v2154_v45 = vsub.f32 0.0, %v2069_v36  ;;  %v2156_v58 = vsub.f32 0.0, %v2146_v60  ;;  %v3586_v60 = vld [vmem:[%s3900_s21 + $0xa0] sm:$0x3] }
 0x2d4   : > { %v2165_v29 = vmul.f32 1.442695, %v2153_v17  ;;  %v2169_v0 = vmul.f32 1.442695, %v2155_v20 }
 0x2d5   : > { %v2167_v33 = vmul.f32 1.442695, %v2154_v45  ;;  %v2171_v37 = vmul.f32 1.442695, %v2156_v58  ;;  %v3215_v38 = vpop.f32.mrb[8].mxu0  ;;  %v3250_v11 = vpop.f32.mrb[8].mxu1 }
 0x2d6   : > { %3531 = vpow2.f32 %v2165_v29  ;;  %v3216_v54 = vpop.f32.mrb[9].mxu0  ;;  %v3251_v43 = vpop.f32.mrb[9].mxu1 }
 0x2d7   : > { %3533 = vpow2.f32 %v2169_v0  ;;  %v3217_v10 = vadd.f32 %v3216_v54, %v3215_v38  ;;  %v3252_v26 = vadd.f32 %v3251_v43, %v3250_v11 }
 0x2d8   : > { %3535 = vpow2.f32 %v2167_v33  ;;  %v3587_v33 = vld [vmem:[%s3900_s21 + $0xb0] sm:$0x3]  ;;  %s299_s21 = sand.u32 1, %s3706_s25  }
 0x2d9   : > { %3537 = vpow2.f32 %v2171_v37  ;;  %v2462_v30 = vadd.f32 %v3252_v26, %v3217_v10  ;;  %s2965_s22 = sshll.u32 %s299_s21, 6  ;;  %s5806_s10 = scalar_lea.sflag [#allocation4], %s299_s21 }
 0x2da   : > { %s301_s23 = scalar_lea.vmem [#allocation7], %s2965_s22 }
 0x2db   : > { %v2465_v21 = vmax.f32 %v2462_v30, 0.0  ;;  %s2873_s8 = sshll.u32 %s301_s23, 4  ;;  %s5800_s8 = int_to_ptr.vmem [resolvable:$true] %s2873_s8 }
 0x2dc   : > { %s3644_s14 = scalar_lea.vmem %s5800_s8, 1024  ;;  %p3651_p4 = scmp.lt.s32.totalorder %s5800_s8, %s3649_s19 }
 0x2dd   : > { %3097 = vmatmul.mubr.msk.f32.vlgmr.msra.gmra.mrb[10].mxu0 %vm2472_vm5, %v2465_v21  ;;  %3100 = vmatmul.mubr.msk.f32.vlgmr.msra.gmra.mrb[10].mxu1 %vm2472_vm5, %v2465_v21  ;;  %p3645_p10 = scmp.ne.s32.totalorder %s5800_s8, %s3644_s14  ;;  %p3652_p7 = scmp.lt.s32.totalorder %s3650_s13, %s3644_s14 }
 0x2df   : > { %p3646_p2 = pnand %p3645_p10, %p6147_p1  ;;  %p3653_p8 = por %p3652_p7, %p3651_p4 }
 0x2e0   : > { %v3532_v1 = vpop.eup %3531 }
 0x2e1   : > { %v3534_v44 = vpop.eup %3533  ;;  %v2177_v12 = vadd.f32 1.0, %v3532_v1  ;;  %p3647_p3 = pneg %p3646_p2 }
 0x2e2   : > { %v3536_v52 = vpop.eup %3535  ;;  %v2179_v49 = vadd.f32 1.0, %v3534_v44 }
 0x2e3   : > { %v3538_v14 = vpop.eup %3537  ;;  %3539 = vrcp.f32 %v2177_v12  ;;  %v2178_v55 = vadd.f32 1.0, %v3536_v52  ;;  %p3654_p11 = pnand %p3653_p8, %p3647_p3 }
 0x2e4   : > { %3541 = vrcp.f32 %v2179_v49  ;;  %v2180_v57 = vadd.f32 1.0, %v3538_v14 }
 0x2e5   : > { %3543 = vrcp.f32 %v2178_v55 }
 0x2e6   : > { %3545 = vrcp.f32 %v2180_v57 }
 0x2ed   : > { %v5675_v24 = vpop.eup %3539 }
 0x2ee   : > { %v5677_v19 = vpop.eup %3541  ;;  %v2659_v40 = vrot.slane %v5675_v24, 7 }
 0x2ef   : > { %v5680_v61 = vpop.eup %3543  ;;  %v2663_v17 = vrot.slane %v5677_v19, 7 }
 0x2f0   : > { %v5683_v20 = vpop.eup %3545  ;;  %v2660_v36 = vsel %vm408_vm0, %v2655_v3, %v2659_v40  ;;  %v5687_v45 = vmul.f32 %v3586_v60, %v2659_v40  ;;  %v2661_v58 = vrot.slane %v5680_v61, 7 }
 0x2f1   : > { %v5691_v29 = vmul.f32 %v5459_v27, %v2660_v36  ;;  %v2664_v0 = vsel %vm408_vm0, %v2657_v7, %v2663_v17  ;;  %v5697_v37 = vmul.f32 %v3587_v33, %v2663_v17  ;;  %v2665_v38 = vrot.slane %v5683_v20, 7 }
 0x2f2   : > { %v2731_v3 = vsub.f32 %v5687_v45, %v5597_v23  ;;  %v5703_v11 = vmul.f32 %v5468_v47, %v2664_v0  ;;  %v2662_v27 = vsel %vm408_vm0, %v2656_v48, %v2661_v58  ;;  %v5709_v54 = vmul.f32 %v5438_v13, %v2661_v58 }
 0x2f3   : > { %v2727_v7 = vsub.f32 %v5691_v29, %v5614_v16  ;;  %v2733_v43 = vsub.f32 %v5697_v37, %v5603_v32  ;;  %v5716_v10 = vmul.f32 %v5434_v5, %v2662_v27  ;;  %v2666_v47 = vsel %vm408_vm0, %v2658_v56, %v2665_v38 }
 0x2f4   : > { %v2729_v26 = vsub.f32 %v5703_v11, %v5623_v6  ;;  %v2732_v13 = vsub.f32 %v5709_v54, %v5616_v50  ;;  %v5726_v48 = vmul.f32 %v5446_v42, %v2666_v47  ;;  %v5729_v30 = vmul.f32 %v5450_v62, %v2665_v38 }
 0x2f5   : > { %v2728_v5 = vsub.f32 %v5716_v10, %v5630_v35  ;;  %v2743_v33 = vlaneseq }
 0x2f6   : > { %v2734_v56 = vsub.f32 %v5729_v30, %v5625_v41 }
 0x3b0   : > { %v2551_v1 = vpop.f32.mrb[10].mxu0  ;;  %v2622_v44 = vpop.f32.mrb[10].mxu1 }
 0x3b1   : > { %v2627_v12 = vsub.f32 0.0, %v2551_v1  ;;  %v2629_v52 = vsub.f32 0.0, %v2622_v44  ;;  %v2553_v49 = vpop.f32.mrb[11].mxu0  ;;  %v2624_v14 = vpop.f32.mrb[11].mxu1  ;;  %v2744_v44 = vshrl.u32 %v2743_v33, 7 }
 0x3b2   : > { %v2628_v42 = vsub.f32 0.0, %v2553_v49  ;;  %v2630_v55 = vsub.f32 0.0, %v2624_v14  ;;  %v2735_v14 = vsub.f32 1.0, %v5637_v9 }
 0x3b3   : > { %v2631_v57 = vmul.f32 1.442695, %v2627_v12  ;;  %v2635_v62 = vmul.f32 1.442695, %v2629_v52  ;;  %v2745_v12 = vsub.s32 0, %v2744_v44 }
 0x3b4   : > { %v2633_v40 = vmul.f32 1.442695, %v2628_v42  ;;  %v2637_v17 = vmul.f32 1.442695, %v2630_v55  ;;  %v2737_v42 = vsub.f32 1.0, %v5639_v22  ;;  %v2739_v55 = vsub.f32 1.0, %v5675_v24 }
 0x3b5   : > { %3547 = vpow2.f32 %v2631_v57  ;;  %v2742_v22 = vsub.f32 1.0, %v5683_v20 }
 0x3b6   : > { %3549 = vpow2.f32 %v2635_v62 }
 0x3b7   : > { %3551 = vpow2.f32 %v2633_v40  ;;  %v2736_v40 = vsub.f32 1.0, %v5642_v63 }
 0x3b8   : > { %3553 = vpow2.f32 %v2637_v17  ;;  %v2738_v17 = vsub.f32 1.0, %v5645_v59 }
 0x3bf   : > { %v3548_v36 = vpop.eup %3547 }
 0x3c0   : > { %v3550_v60 = vpop.eup %3549  ;;  %v2639_v58 = vadd.f32 1.0, %v3548_v36  ;;  %v2741_v36 = vsub.f32 1.0, %v5677_v19 }
 0x3c1   : > { %v3552_v0 = vpop.eup %3551  ;;  %v2641_v38 = vadd.f32 1.0, %v3550_v60 }
 0x3c2   : > { %v3554_v27 = vpop.eup %3553  ;;  %3555 = vrcp.f32 %v2639_v58  ;;  %v2640_v47 = vadd.f32 1.0, %v3552_v0  ;;  %v2740_v0 = vsub.f32 1.0, %v5680_v61 }
 0x3c3   : > { %3557 = vrcp.f32 %v2641_v38  ;;  %v2642_v1 = vadd.f32 1.0, %v3554_v27 }
 0x3c4   : > { %3559 = vrcp.f32 %v2640_v47 }
 0x3c5   : > { %3561 = vrcp.f32 %v2642_v1 }
 0x3cc   : > { %v3556_v52 = vpop.eup %3555 }
 0x3cd   : > { %v3558_v49 = vpop.eup %3557  ;;  %v2746_v57 = vrot.slane %v3556_v52, %v2745_v12 }
 0x3ce   : > { %v3560_v62 = vpop.eup %3559  ;;  %v2754_v60 = vrot.slane %v3558_v49, %v2745_v12 }
 0x3cf   : > { %v3562_v58 = vpop.eup %3561  ;;  %v2759_v33 = vmul.f32 %v2746_v57, %v2735_v14  ;;  %v2763_v38 = vmul.f32 %v2746_v57, %v2739_v55  ;;  %v2750_v9 = vrot.slane %v3560_v62, %v2745_v12 }
 0x3d0   : > { %v2761_v24 = vmul.f32 %v2754_v60, %v2737_v42  ;;  %v2765_v27 = vmul.f32 %v2754_v60, %v2741_v36  ;;  %v2758_v47 = vrot.slane %v3562_v58, %v2745_v12 }
 0x3d1   : > { %v2775_v1 = vrot.slane %v2759_v33, 7  ;;  %v2779_v63 = vrot.slane %v2763_v38, 7  ;;  %v2760_v44 = vmul.f32 %v2750_v9, %v2736_v40  ;;  %v2764_v59 = vmul.f32 %v2750_v9, %v2740_v0 }
 0x3d2   : > { %v2777_v52 = vrot.slane %v2761_v24, 7  ;;  %v2783_v19 = vrot.slane %v2765_v27, 7  ;;  %v2762_v49 = vmul.f32 %v2758_v47, %v2738_v17  ;;  %v2766_v21 = vmul.f32 %v2758_v47, %v2742_v22 }
 0x3d3   : > { %v2780_v61 = vsel %vm408_vm0, %v2775_v1, %v2779_v63  ;;  %v2799_v20 = vadd.f32 %v2775_v1, %v2723_v34  ;;  %v2807_v12 = vadd.f32 %v2779_v63, %v2731_v3  ;;  %v2776_v14 = vrot.slane %v2760_v44, 7 }
 0x3d4   : > { %v2803_v42 = vadd.f32 %v2780_v61, %v2727_v7  ;;  %v2784_v55 = vsel %vm408_vm0, %v2777_v52, %v2783_v19  ;;  %v2801_v57 = vadd.f32 %v2777_v52, %v2725_v2  ;;  %v2809_v53 = vadd.f32 %v2783_v19, %v2733_v43 }
 0x3d5   : > { %v2823_v46 = vrot.slane %v2799_v20, 1  ;;  %v2835_v34 = vrot.slane %v2807_v12, 1  ;;  %v2805_v23 = vadd.f32 %v2784_v55, %v2729_v26  ;;  %v2781_v45 = vrot.slane %v2764_v59, 7 }
 0x3d6   : > { %v2824_v3 = vrot.slane %v2803_v42, 1  ;;  %v2829_v16 = vrot.slane %v2801_v57, 1  ;;  %v2839_v29 = vrot.slane %v2809_v53, 1  ;;  %v2800_v7 = vadd.f32 %v2776_v14, %v2724_v8 }
 0x3d7   : > { %v2830_v18 = vrot.slane %v2805_v23, 1  ;;  %v2782_v39 = vsel %vm408_vm0, %v2776_v14, %v2781_v45  ;;  %v2808_v32 = vadd.f32 %v2781_v45, %v2732_v13  ;;  %v2778_v2 = vrot.slane %v2762_v49, 7 }
 0x3d8   : > { %v2825_v37 = vsel %vm457_vm1, %v2823_v46, %v2824_v3  ;;  %v2836_v6 = vsel %vm457_vm1, %v2824_v3, %v2835_v34  ;;  %v2804_v11 = vadd.f32 %v2782_v39, %v2728_v5  ;;  %v2826_v43 = vrot.slane %v2800_v7, 1 }
 0x3d9   : > { %2851 = vst [vmem:[%s301_s23] sm:$0xff] %v2825_v37  ;;  %2855 = vst [vmem:[%s301_s23 + $0x20] sm:$0xff] %v2836_v6  ;;  %v2831_v15 = vsel %vm457_vm1, %v2829_v16, %v2830_v18  ;;  %v2840_v25 = vsel %vm457_vm1, %v2830_v18, %v2839_v29  ;;  %v2837_v50 = vrot.slane %v2808_v32, 1  ;;  %v2785_v8 = vrot.slane %v2766_v21, 7 }
 0x3da   : > { %2853 = vst [vmem:[%s301_s23 + $0x10] sm:$0xff] %v2831_v15  ;;  %2857 = vst [vmem:[%s301_s23 + $0x30] sm:$0xff] %v2840_v25  ;;  %v2827_v54 = vrot.slane %v2804_v11, 1  ;;  %v2802_v26 = vadd.f32 %v2778_v2, %v2726_v51  ;;  %v6146_v21 = vsub.f32 %v5726_v48, %v5635_v31 }
 0x3db   : > { %v2786_v35 = vsel %vm408_vm0, %v2778_v2, %v2785_v8  ;;  %v2810_v10 = vadd.f32 %v2785_v8, %v2734_v56 }
 0x3dc   : > { %v2828_v13 = vsel %vm457_vm1, %v2826_v43, %v2827_v54  ;;  %v2838_v5 = vsel %vm457_vm1, %v2827_v54, %v2837_v50  ;;  %v2806_v62 = vadd.f32 %v2786_v35, %v6146_v21  ;;  %v2832_v4 = vrot.slane %v2802_v26, 1 }
 0x3dd   : > { %2852 = vst [vmem:[%s301_s23 + $0x8] sm:$0xff] %v2828_v13  ;;  %2856 = vst [vmem:[%s301_s23 + $0x28] sm:$0xff] %v2838_v5  ;;  %v2841_v28 = vrot.slane %v2810_v10, 1 }
 0x3de   : > { %v2833_v51 = vrot.slane %v2806_v62, 1 }
 0x3e0   : > { %v2834_v41 = vsel %vm457_vm1, %v2832_v4, %v2833_v51  ;;  %v2842_v31 = vsel %vm457_vm1, %v2833_v51, %v2841_v28 }
 0x3e1   : > { %2854 = vst [vmem:[%s301_s23 + $0x18] sm:$0xff] %v2834_v41  ;;  %2858 = vst [vmem:[%s301_s23 + $0x38] sm:$0xff] %v2842_v31 }
 0x3e2   : > { %3657 = shalt.err (!%p3654_p11)
}
 0x3e3   : > { %s3658_s16 = scalar_lea.hbm %s5798_s28, 1024  ;;  %s3662_s21 = scalar_lea.hbm %s5854_s7, 2048 }
 0x3e4   : > { %p3659_p13 = scmp.ne.s32.totalorder %s5798_s28, %s3658_s16  ;;  %p3663_p6 = scmp.lt.u32.totalorder %s5798_s28, %s5854_s7 }
 0x3e5   : > { %p3664_p9 = scmp.lt.u32.totalorder %s3662_s21, %s3658_s16  ;;  %p3666_p10 = scmp.lt.u32.totalorder %s3658_s16, %s5798_s28 }
 0x3e6   : > { %p3660_p0 = pnand %p3659_p13, %p6147_p1 }
 0x3e7   : > { %p3665_p12 = por %p3664_p9, %p3663_p6 }
 0x3e8   : > { %p3661_p5 = pneg %p3660_p0 }
 0x3e9   : > { %p3667_p2 = por %p3666_p10, %p3665_p12 }
 0x3eb   : > { %p3668_p3 = pnand %p3667_p2, %p3661_p5 }
 0x3ed   : > { %3671 = shalt.err (!%p3668_p3)
}
 0x3ee   : > { %s3724_s29 = smov 512   ;;  %s3725_s9 = smov 32  }
 0x3ef   : > { %3454 = dma.vmem_to_hbm [thread:$0]  (%p6147_p1), %s5800_s8, 1024, %s5798_s28, %s5806_s10, %s3724_s29, %s3724_s29, %s3725_s9  }
 0x3f0 PF: > { %p3471_p4 = scmp.ge.s32.totalorder %s3714_s27, 2  ;;  %s2888_s15 = sand.u32 1, %s3702_s24  }
 0x3f1   : > { %p6148_p7 = scmp.ne.s32.totalorder %s5981_s12, 0  ;;  %s2889_s14 = scalar_lea.sflag [#allocation4], %s2888_s15 }
 0x3f3   : > { %p3464_p8 = pnand %p3471_p4, %p6148_p7 }
 0x3f5   : > { %3697 = dma.done.wait (!%p3464_p8), %s2889_s14, 1024  }
 0x3f6   : > { %3699 = vsyncadd (!%p3464_p8), %s2889_s14, 4294966272  ;;  %s6149_s17 = sld [smem:[#allocation11_spill]]  ;;  %p19_p11 = scmp.ge.s32.totalorder %s3791_s30, 4  }
 0x3f7   : > { %s6150_s24 = smov %s3706_s25  ;;  %s6151_s25 = smov %s3710_s26 }
 0x3f8   : > { %s6153_s27 = smov %s3791_s30  ;;  %21 = sbr.rel (!%p19_p11) target bundleno = 5 (0x5), region = 108 }
 0x3fc   : > { %s6152_s26 = smov %s6149_s17 }
 0x3ff   :  { %2894 = vsyncpa [#allocation3], 1 }
 0x400   :  { %2896 = vsyncpa [#allocation3 + $0x1], 1 }
 0x401   :  { %2897 = vsyncpa [#allocation6], 1 }
 0x402   :  { %2898 = vsyncpa [#allocation4], 1 }
 0x403   :  { %2900 = vsyncpa [#allocation4 + $0x1], 1 }

</bundles_post_ra>
